<compile_context>
chip_gen: v5e
topology: v5e:2x2
jax: 0.10.0
libtpu: 0.0.40
codegen_flags: <defaults>
</compile_context>

<pallas_src>
import functools

import jax
import jax.numpy as jnp
from jax.experimental import pallas as pl
from jax.experimental.pallas import tpu as pltpu


def _round_up(x, m):
    return (x + m - 1) // m * m


def _pick_row_block(h, target=8):
    for rb in (target, 4, 2, 1):
        if h % rb == 0:
            return rb
    return 1


# ----------------------------------------------------------------------------
# Fused bottleneck kernel: one (batch, row-block) tile per grid step
# ----------------------------------------------------------------------------
def _bottleneck_kernel(x_ref, w1_ref, b1_ref, w2_ref, b2_ref, w3_ref, b3_ref,
                       wsc_ref, bsc_ref, o_ref, t1_ref,
                       *, H, W, S, RB, Cin, planes, Cexp):
    # x_ref : (1, H, W, Cin)  bf16 full-image block (resident across row blocks)
    # w1    : (Cin, planes)      bf16, BN1 scale folded
    # w2    : (9*planes, planes) bf16, tap-major [(di*3+dj)*planes + cin, cout]
    # w3    : (planes, Cexp)     bf16, BN3 scale folded
    # wsc   : (Cin, Cexp)        bf16, BNsc scale folded
    # b*    : (1, C) f32 folded BN biases
    # o_ref : (1, RB, W, Cexp) output tile for this row block
    # t1_ref: (RB+3, S, planes) bf16 rolling conv1 window (halo rows included);
    #         row p holds conv1(true row r0-1+p), last row is an always-zero
    #         pad row so the (di=2, dj=2) tap slice never reads out of bounds.
    bf16 = jnp.bfloat16
    f32 = jnp.float32

    rb_idx = pl.program_id(1)
    r0 = pl.multiple_of(rb_idx * RB, RB)          # first true output row

    # ---- hoist weights / biases once per grid step --------------------------
    w1 = w1_ref[...]
    b1 = b1_ref[...]
    w2 = w2_ref[...]
    b2 = b2_ref[...]
    w3 = w3_ref[...]
    b3 = b3_ref[...]
    wsc = wsc_ref[...]
    bsc = bsc_ref[...]

    # ---- border-only zeroing of the scratch halo ----------------------------
    # (interior rows / columns 1..W are fully overwritten below)
    t1_ref[0:1, :, :] = jnp.zeros((1, S, planes), bf16)
    t1_ref[RB + 1:RB + 3, :, :] = jnp.zeros((2, S, planes), bf16)
    t1_ref[:, 0:1, :] = jnp.zeros((RB + 3, 1, planes), bf16)
    t1_ref[:, W + 1:S, :] = jnp.zeros((RB + 3, S - W - 1, planes), bf16)

    def conv1_rows(rows_bf16):
        # (R*W, Cin) bf16 -> (R*W, planes) f32, BN1 + ReLU applied
        h = jnp.dot(rows_bf16, w1, preferred_element_type=f32)
        return jnp.maximum(h + b1, 0.0)

    # ---- phase A: conv1 (1x1) + bn1 + relu into the rolling window ----------
    # top halo row (true row r0 - 1); stays zero at the image top
    @pl.when(rb_idx > 0)
    def _():
        xr = x_ref[:, pl.ds(r0 - 1, 1), :, :].reshape(W, Cin)
        t1_ref[0:1, 1:W + 1, :] = (
            conv1_rows(xr).reshape(1, W, planes).astype(bf16))

    # bottom halo row (true row r0 + RB); stays zero at the image bottom
    @pl.when(rb_idx < pl.num_programs(1) - 1)
    def _():
        xr = x_ref[:, pl.ds(r0 + RB, 1), :, :].reshape(W, Cin)
        t1_ref[RB + 1:RB + 2, 1:W + 1, :] = (
            conv1_rows(xr).reshape(1, W, planes).astype(bf16))

    # interior rows r0 .. r0+RB-1 (xs is reused for the projection shortcut)
    xs = x_ref[:, pl.ds(r0, RB), :, :].reshape(RB * W, Cin)
    h1 = conv1_rows(xs)
    t1_ref[1:RB + 1, 1:W + 1, :] = h1.reshape(RB, W, planes).astype(bf16)

    # ---- phase B: conv2 (3x3) + bn2 + relu ----------------------------------
    # Row stride S makes every tap a contiguous slice of the flattened window:
    # the value at virtual output position k = i*S + j (j < W valid, j >= W
    # harmless garbage dropped later) reads flat[(i+di)*S + (j+dj)].
    flat = t1_ref[...].reshape((RB + 3) * S, planes)      # free collapse (S%16==0)
    n_sh = (RB + 2) * S
    # build the dj-shifted copies ONCE (only dj=1,2 need a sublane shift);
    # per-di slices below start at di*S (multiple of 16) and are aligned.
    shifted = [flat[dj:dj + n_sh, :] for dj in range(3)]

    acc = jnp.zeros((RB * S, planes), f32)
    for di in range(3):
        for dj in range(3):
            t = di * 3 + dj
            w_tap = w2[t * planes:(t + 1) * planes, :]
            patch = shifted[dj][di * S:di * S + RB * S, :]
            acc = acc + jnp.dot(patch, w_tap, preferred_element_type=f32)
    h2 = jnp.maximum(acc + b2, 0.0)                        # (RB*S, planes) f32

    # ---- conv3 (1x1) + bn3, drop the pad columns ----------------------------
    y3 = jnp.dot(h2.astype(bf16), w3, preferred_element_type=f32) + b3
    y3 = y3.reshape(RB, S, Cexp)[:, :W, :]                 # (RB, W, Cexp)

    # ---- projection shortcut (1x1 conv + bn) on the resident x rows ---------
    sc = jnp.dot(xs, wsc, preferred_element_type=f32) + bsc
    sc = sc.reshape(RB, W, Cexp)

    out = jnp.maximum(y3 + sc, 0.0)
    o_ref[...] = out.reshape(1, RB, W, Cexp).astype(o_ref.dtype)


# ----------------------------------------------------------------------------
# Wrappers
# ----------------------------------------------------------------------------
def bottleneck_forward_nhwc(x_nhwc, kp, out_dtype=jnp.bfloat16, row_block=None):
    """Fused Bottleneck forward, NHWC in -> NHWC out (fast path, no transposes)."""
    N, H, W, Cin = x_nhwc.shape
    planes = kp["w1"].shape[1]
    Cexp = kp["w3"].shape[1]
    RB = _pick_row_block(H) if row_block is None else row_block
    assert H % RB == 0, (H, RB)
    S = _round_up(W + 2, 16)                    # padded row stride (bf16 sublanes)

    x = x_nhwc.astype(jnp.bfloat16)

    kernel = functools.partial(_bottleneck_kernel, H=H, W=W, S=S, RB=RB,
                               Cin=Cin, planes=planes, Cexp=Cexp)

    out_bpe = jnp.dtype(out_dtype).itemsize
    w_bytes = sum(int(v.size) * v.dtype.itemsize for v in kp.values())
    flops = 2 * N * H * W * (Cin * planes + 9 * planes * planes
                             + planes * Cexp + Cin * Cexp)
    bytes_accessed = int(x.size * 2 + N * H * W * Cexp * out_bpe + w_bytes)

    # VMEM working set (v7x budget is 64 MiB): resident x block + double-
    # buffered output block + weights + rolling scratch + headroom.
    x_blk = H * W * Cin * 2
    o_blk = RB * W * Cexp * out_bpe
    scratch_b = (RB + 3) * S * planes * 2
    vmem_limit = int(min(64 << 20,
                         max(8 << 20,
                             2 * x_blk + 2 * o_blk + 2 * w_bytes
                             + scratch_b + (4 << 20))))

    return pl.pallas_call(
        kernel,
        out_shape=jax.ShapeDtypeStruct((N, H, W, Cexp), out_dtype),
        grid=(N, H // RB),
        in_specs=[
            pl.BlockSpec((1, H, W, Cin), lambda n, r: (n, 0, 0, 0)),
            pl.BlockSpec(kp["w1"].shape, lambda n, r: (0, 0)),
            pl.BlockSpec(kp["b1"].shape, lambda n, r: (0, 0)),
            pl.BlockSpec(kp["w2"].shape, lambda n, r: (0, 0)),
            pl.BlockSpec(kp["b2"].shape, lambda n, r: (0, 0)),
            pl.BlockSpec(kp["w3"].shape, lambda n, r: (0, 0)),
            pl.BlockSpec(kp["b3"].shape, lambda n, r: (0, 0)),
            pl.BlockSpec(kp["wsc"].shape, lambda n, r: (0, 0)),
            pl.BlockSpec(kp["bsc"].shape, lambda n, r: (0, 0)),
        ],
        out_specs=pl.BlockSpec((1, RB, W, Cexp), lambda n, r: (n, r, 0, 0)),
        scratch_shapes=[pltpu.VMEM((RB + 3, S, planes), jnp.bfloat16)],
        compiler_params=pltpu.CompilerParams(
            dimension_semantics=("parallel", "parallel"),
            vmem_limit_bytes=vmem_limit),
        cost_estimate=pl.CostEstimate(flops=flops, transcendentals=0,
                                      bytes_accessed=bytes_accessed),
    )(x, kp["w1"], kp["b1"], kp["w2"], kp["b2"], kp["w3"], kp["b3"],
      kp["wsc"], kp["bsc"])


def bottleneck_forward(x_nchw, kp, out_dtype=jnp.bfloat16):
    """NCHW adapter (parity with the PyTorch module). Production code should
    call bottleneck_forward_nhwc directly and keep the surrounding graph NHWC."""
    x = jnp.transpose(x_nchw, (0, 2, 3, 1))
    y = bottleneck_forward_nhwc(x, kp, out_dtype=out_dtype)
    return jnp.transpose(y, (0, 3, 1, 2))


# ----------------------------------------------------------------------------
# Parameters (module-level, f32) and kernel-ready (BN-folded, bf16) versions
# ----------------------------------------------------------------------------
def make_module_params(key, in_planes, planes, expansion=4):
    out_planes = expansion * planes
    ks = jax.random.split(key, 8)
    w1 = 0.1 * jax.random.normal(ks[0], (planes, in_planes, 1, 1), jnp.float32)
    w2 = 0.1 * jax.random.normal(ks[1], (planes, planes, 3, 3), jnp.float32)
    w3 = 0.1 * jax.random.normal(ks[2], (out_planes, planes, 1, 1), jnp.float32)
    wsc = 0.1 * jax.random.normal(ks[3], (out_planes, in_planes, 1, 1), jnp.float32)

    def bn(k, c):
        kg, kb, km, kv = jax.random.split(k, 4)
        return dict(gamma=1.0 + 0.1 * jax.random.normal(kg, (c,), jnp.float32),
                    beta=0.1 * jax.random.normal(kb, (c,), jnp.float32),
                    mean=0.1 * jax.random.normal(km, (c,), jnp.float32),
                    var=1.0 + 0.1 * jax.random.uniform(kv, (c,), jnp.float32))

    return dict(w1=w1, w2=w2, w3=w3, wsc=wsc,
                bn1=bn(ks[4], planes), bn2=bn(ks[5], planes),
                bn3=bn(ks[6], out_planes), bnsc=bn(ks[7], out_planes))


def _fold_bn(p, eps=1e-5):
    scale = p["gamma"] / jnp.sqrt(p["var"] + eps)
    bias = p["beta"] - p["mean"] * scale
    return scale, bias


def prepare_kernel_params(mp):
    """Fold BN into conv weights (f32), then cast weights to bf16."""
    s1, b1 = _fold_bn(mp["bn1"])
    s2, b2 = _fold_bn(mp["bn2"])
    s3, b3 = _fold_bn(mp["bn3"])
    ssc, bsc = _fold_bn(mp["bnsc"])

    def io_1x1(w_oihw, scale):      # OIHW 1x1 -> (Cin, Cout), scale folded
        w = jnp.transpose(w_oihw[:, :, 0, 0], (1, 0)) * scale[None, :]
        return w.astype(jnp.bfloat16)

    planes = mp["w2"].shape[0]
    w2 = jnp.transpose(mp["w2"], (2, 3, 1, 0)) * s2[None, None, None, :]  # HWIO
    w2 = w2.reshape(9 * planes, planes).astype(jnp.bfloat16)

    return dict(
        w1=io_1x1(mp["w1"], s1), b1=b1.reshape(1, -1),
        w2=w2, b2=b2.reshape(1, -1),
        w3=io_1x1(mp["w3"], s3), b3=b3.reshape(1, -1),
        wsc=io_1x1(mp["wsc"], ssc), bsc=bsc.reshape(1, -1),
    )


# ----------------------------------------------------------------------------
# Pure-JAX reference (true f32 module semantics)
# ----------------------------------------------------------------------------
def bottleneck_reference(x_nchw, mp, eps=1e-5):
    x = jnp.transpose(x_nchw, (0, 2, 3, 1))

    def conv(x, w_oihw, padding="VALID"):
        w = jnp.transpose(w_oihw, (2, 3, 1, 0))   # HWIO
        return jax.lax.conv_general_dilated(
            x, w, (1, 1), padding, dimension_numbers=("NHWC", "HWIO", "NHWC"))

    def bn(x, p):
        scale = p["gamma"] / jnp.sqrt(p["var"] + eps)
        return x * scale + (p["beta"] - p["mean"] * scale)

    out = jax.nn.relu(bn(conv(x, mp["w1"]), mp["bn1"]))
    out = jax.nn.relu(bn(conv(out, mp["w2"], padding="SAME"), mp["bn2"]))
    out = bn(conv(out, mp["w3"]), mp["bn3"])
    sc = bn(conv(x, mp["wsc"]), mp["bnsc"])
    return jnp.transpose(jax.nn.relu(out + sc), (0, 3, 1, 2))


# ----------------------------------------------------------------------------
if __name__ == "__main__":
    key = jax.random.PRNGKey(0)
    kx, kparam = jax.random.split(key)

    # small shapes: batch=2, in_planes=4, planes=4 -> out channels 16, 16x16
    in_planes, planes = 4, 4
    x = jax.random.normal(kx, (2, in_planes, 16, 16), jnp.float32)  # NCHW
    mparams = make_module_params(kparam, in_planes, planes)
    kparams = prepare_kernel_params(mparams)

    y = jax.block_until_ready(bottleneck_forward(x, kparams,
                                                 out_dtype=jnp.bfloat16))
    y_ref = jax.block_until_ready(bottleneck_reference(x, mparams))

    assert y.shape == (2, 16, 16, 16), y.shape
    # bf16 matmul inputs / bf16 output with f32 accumulation -> loosened
    # tolerance vs the f32 reference.
    y_f32 = y.astype(jnp.float32)
    assert jnp.allclose(y_f32, y_ref, rtol=3e-2, atol=3e-2), (
        float(jnp.max(jnp.abs(y_f32 - y_ref))))

    print("KERNEL_OK")
</pallas_src>

<mosaic_0001>
module attributes {stable_mosaic.version = 11 : i64} {
  func.func @_bottleneck_kernel(%arg0: i32, %arg1: i32, %arg2: memref<1x16x16x4xbf16, #tpu.memory_space<vmem>>, %arg3: memref<4x4xbf16, #tpu.memory_space<vmem>>, %arg4: memref<1x4xf32, #tpu.memory_space<vmem>>, %arg5: memref<36x4xbf16, #tpu.memory_space<vmem>>, %arg6: memref<1x4xf32, #tpu.memory_space<vmem>>, %arg7: memref<4x16xbf16, #tpu.memory_space<vmem>>, %arg8: memref<1x16xf32, #tpu.memory_space<vmem>>, %arg9: memref<4x16xbf16, #tpu.memory_space<vmem>>, %arg10: memref<1x16xf32, #tpu.memory_space<vmem>>, %arg11: memref<1x8x16x16xbf16, #tpu.memory_space<vmem>>, %arg12: memref<11x32x4xbf16, #tpu.memory_space<vmem>>) attributes {dimension_semantics = [#tpu.dimension_semantics<parallel>, #tpu.dimension_semantics<parallel>], iteration_bounds = array<i64: 2, 2>, scalar_prefetch = 0 : i64, scratch_operands = 1 : i64, tpu.core_type = #tpu.core_type<tc>, window_params = [{transform_indices = @transform_0, window_bounds = array<i64: 1, 16, 16, 4>}, {pipeline_mode = #tpu.pipeline_mode<synchronous>, transform_indices = @transform_1, window_bounds = array<i64: 4, 4>}, {pipeline_mode = #tpu.pipeline_mode<synchronous>, transform_indices = @transform_2, window_bounds = array<i64: 1, 4>}, {pipeline_mode = #tpu.pipeline_mode<synchronous>, transform_indices = @transform_3, window_bounds = array<i64: 36, 4>}, {pipeline_mode = #tpu.pipeline_mode<synchronous>, transform_indices = @transform_4, window_bounds = array<i64: 1, 4>}, {pipeline_mode = #tpu.pipeline_mode<synchronous>, transform_indices = @transform_5, window_bounds = array<i64: 4, 16>}, {pipeline_mode = #tpu.pipeline_mode<synchronous>, transform_indices = @transform_6, window_bounds = array<i64: 1, 16>}, {pipeline_mode = #tpu.pipeline_mode<synchronous>, transform_indices = @transform_7, window_bounds = array<i64: 4, 16>}, {pipeline_mode = #tpu.pipeline_mode<synchronous>, transform_indices = @transform_8, window_bounds = array<i64: 1, 16>}, {transform_indices = @transform_9, window_bounds = array<i64: 1, 8, 16, 16>}]} {
    %c8_i32 = arith.constant 8 : i32
    %0 = arith.muli %arg1, %c8_i32 : i32
    %1 = tpu.assume_multiple %0, 8 : i32
    %c0 = arith.constant 0 : index
    %c0_0 = arith.constant 0 : index
    %2 = vector.load %arg3[%c0, %c0_0] : memref<4x4xbf16, #tpu.memory_space<vmem>>, vector<4x4xbf16>
    %c0_1 = arith.constant 0 : index
    %c0_2 = arith.constant 0 : index
    %3 = vector.load %arg4[%c0_1, %c0_2] : memref<1x4xf32, #tpu.memory_space<vmem>>, vector<1x4xf32>
    %c0_3 = arith.constant 0 : index
    %c0_4 = arith.constant 0 : index
    %4 = vector.load %arg5[%c0_3, %c0_4] : memref<36x4xbf16, #tpu.memory_space<vmem>>, vector<36x4xbf16>
    %c0_5 = arith.constant 0 : index
    %c0_6 = arith.constant 0 : index
    %5 = vector.load %arg6[%c0_5, %c0_6] : memref<1x4xf32, #tpu.memory_space<vmem>>, vector<1x4xf32>
    %c0_7 = arith.constant 0 : index
    %c0_8 = arith.constant 0 : index
    %6 = vector.load %arg7[%c0_7, %c0_8] : memref<4x16xbf16, #tpu.memory_space<vmem>>, vector<4x16xbf16>
    %c0_9 = arith.constant 0 : index
    %c0_10 = arith.constant 0 : index
    %7 = vector.load %arg8[%c0_9, %c0_10] : memref<1x16xf32, #tpu.memory_space<vmem>>, vector<1x16xf32>
    %c0_11 = arith.constant 0 : index
    %c0_12 = arith.constant 0 : index
    %8 = vector.load %arg9[%c0_11, %c0_12] : memref<4x16xbf16, #tpu.memory_space<vmem>>, vector<4x16xbf16>
    %c0_13 = arith.constant 0 : index
    %c0_14 = arith.constant 0 : index
    %9 = vector.load %arg10[%c0_13, %c0_14] : memref<1x16xf32, #tpu.memory_space<vmem>>, vector<1x16xf32>
    %cst = arith.constant 0.000000e+00 : bf16
    %10 = vector.broadcast %cst : bf16 to vector<1x32x4xbf16>
    %c0_15 = arith.constant 0 : index
    %c0_16 = arith.constant 0 : index
    %c0_17 = arith.constant 0 : index
    %11 = vector.load %arg12[%c0_15, %c0_16, %c0_17] : memref<11x32x4xbf16, #tpu.memory_space<vmem>>, vector<1x32x4xbf16>
    tpu.vector_store %arg12[%c0_15, %c0_16, %c0_17], %10 {strides = array<i32>} : memref<11x32x4xbf16, #tpu.memory_space<vmem>>, vector<1x32x4xbf16>,
    %cst_18 = arith.constant 0.000000e+00 : bf16
    %12 = vector.broadcast %cst_18 : bf16 to vector<2x32x4xbf16>
    %c9 = arith.constant 9 : index
    %c0_19 = arith.constant 0 : index
    %c0_20 = arith.constant 0 : index
    %13 = vector.load %arg12[%c9, %c0_19, %c0_20] : memref<11x32x4xbf16, #tpu.memory_space<vmem>>, vector<2x32x4xbf16>
    tpu.vector_store %arg12[%c9, %c0_19, %c0_20], %12 {strides = array<i32>} : memref<11x32x4xbf16, #tpu.memory_space<vmem>>, vector<2x32x4xbf16>,
    %cst_21 = arith.constant 0.000000e+00 : bf16
    %14 = vector.broadcast %cst_21 : bf16 to vector<11x1x4xbf16>
    %c0_22 = arith.constant 0 : index
    %c0_23 = arith.constant 0 : index
    %c0_24 = arith.constant 0 : index
    %15 = vector.load %arg12[%c0_22, %c0_23, %c0_24] : memref<11x32x4xbf16, #tpu.memory_space<vmem>>, vector<11x1x4xbf16>
    tpu.vector_store %arg12[%c0_22, %c0_23, %c0_24], %14 {strides = array<i32>} : memref<11x32x4xbf16, #tpu.memory_space<vmem>>, vector<11x1x4xbf16>,
    %cst_25 = arith.constant 0.000000e+00 : bf16
    %16 = vector.broadcast %cst_25 : bf16 to vector<11x15x4xbf16>
    %c0_26 = arith.constant 0 : index
    %c17 = arith.constant 17 : index
    %c0_27 = arith.constant 0 : index
    %17 = vector.load %arg12[%c0_26, %c17, %c0_27] : memref<11x32x4xbf16, #tpu.memory_space<vmem>>, vector<11x15x4xbf16>
    tpu.vector_store %arg12[%c0_26, %c17, %c0_27], %16 {strides = array<i32>} : memref<11x32x4xbf16, #tpu.memory_space<vmem>>, vector<11x15x4xbf16>,
    %c0_i32 = arith.constant 0 : i32
    %18 = arith.cmpi sgt, %arg1, %c0_i32 : i32
    %19 = arith.extui %18 : i1 to i32
    %c0_i32_28 = arith.constant 0 : i32
    %20 = arith.cmpi ne, %19, %c0_i32_28 : i32
    scf.if %20 {
      %c1_i32_58 = arith.constant 1 : i32
      %97 = arith.subi %1, %c1_i32_58 : i32
      %c0_59 = arith.constant 0 : index
      %98 = arith.index_cast %97 : i32 to index
      %c0_60 = arith.constant 0 : index
      %c0_61 = arith.constant 0 : index
      %99 = vector.load %arg2[%c0_59, %98, %c0_60, %c0_61] : memref<1x16x16x4xbf16, #tpu.memory_space<vmem>>, vector<1x1x16x4xbf16>
      %100 = vector.shape_cast %99 : vector<1x1x16x4xbf16> to vector<16x4xbf16>
      %cst_62 = arith.constant dense<0.000000e+00> : vector<16x4xf32>
      %101 = tpu.matmul %100, %2, %cst_62 {dimension_numbers = #tpu.dot_dimension_numbers<[1], [0], [0], [1], [0, 0, 1, 1], [], []>} : vector<16x4xbf16>, vector<4x4xbf16>, vector<16x4xf32> -> vector<16x4xf32>
      %102 = vector.broadcast %3 : vector<1x4xf32> to vector<16x4xf32>
      %103 = arith.addf %101, %102 : vector<16x4xf32>
      %cst_63 = arith.constant 0.000000e+00 : f32
      %104 = vector.broadcast %cst_63 : f32 to vector<16x4xf32>
      %105 = arith.maximumf %103, %104 : vector<16x4xf32>
      %106 = vector.shape_cast %105 : vector<16x4xf32> to vector<1x16x4xf32>
      %107 = arith.truncf %106 : vector<1x16x4xf32> to vector<1x16x4xbf16>
      %c0_64 = arith.constant 0 : index
      %c1_65 = arith.constant 1 : index
      %c0_66 = arith.constant 0 : index
      %108 = vector.load %arg12[%c0_64, %c1_65, %c0_66] : memref<11x32x4xbf16, #tpu.memory_space<vmem>>, vector<1x16x4xbf16>
      tpu.vector_store %arg12[%c0_64, %c1_65, %c0_66], %107 {strides = array<i32>} : memref<11x32x4xbf16, #tpu.memory_space<vmem>>, vector<1x16x4xbf16>,
    } else {
    }
    %c1_i32 = arith.constant 1 : i32
    %21 = arith.cmpi slt, %arg1, %c1_i32 : i32
    %22 = arith.extui %21 : i1 to i32
    %c0_i32_29 = arith.constant 0 : i32
    %23 = arith.cmpi ne, %22, %c0_i32_29 : i32
    scf.if %23 {
      %c8_i32_58 = arith.constant 8 : i32
      %97 = arith.addi %1, %c8_i32_58 : i32
      %c0_59 = arith.constant 0 : index
      %98 = arith.index_cast %97 : i32 to index
      %c0_60 = arith.constant 0 : index
      %c0_61 = arith.constant 0 : index
      %99 = vector.load %arg2[%c0_59, %98, %c0_60, %c0_61] : memref<1x16x16x4xbf16, #tpu.memory_space<vmem>>, vector<1x1x16x4xbf16>
      %100 = vector.shape_cast %99 : vector<1x1x16x4xbf16> to vector<16x4xbf16>
      %cst_62 = arith.constant dense<0.000000e+00> : vector<16x4xf32>
      %101 = tpu.matmul %100, %2, %cst_62 {dimension_numbers = #tpu.dot_dimension_numbers<[1], [0], [0], [1], [0, 0, 1, 1], [], []>} : vector<16x4xbf16>, vector<4x4xbf16>, vector<16x4xf32> -> vector<16x4xf32>
      %102 = vector.broadcast %3 : vector<1x4xf32> to vector<16x4xf32>
      %103 = arith.addf %101, %102 : vector<16x4xf32>
      %cst_63 = arith.constant 0.000000e+00 : f32
      %104 = vector.broadcast %cst_63 : f32 to vector<16x4xf32>
      %105 = arith.maximumf %103, %104 : vector<16x4xf32>
      %106 = vector.shape_cast %105 : vector<16x4xf32> to vector<1x16x4xf32>
      %107 = arith.truncf %106 : vector<1x16x4xf32> to vector<1x16x4xbf16>
      %c9_64 = arith.constant 9 : index
      %c1_65 = arith.constant 1 : index
      %c0_66 = arith.constant 0 : index
      %108 = vector.load %arg12[%c9_64, %c1_65, %c0_66] : memref<11x32x4xbf16, #tpu.memory_space<vmem>>, vector<1x16x4xbf16>
      tpu.vector_store %arg12[%c9_64, %c1_65, %c0_66], %107 {strides = array<i32>} : memref<11x32x4xbf16, #tpu.memory_space<vmem>>, vector<1x16x4xbf16>,
    } else {
    }
    %c0_30 = arith.constant 0 : index
    %24 = arith.index_cast %1 : i32 to index
    %c0_31 = arith.constant 0 : index
    %c0_32 = arith.constant 0 : index
    %25 = vector.load %arg2[%c0_30, %24, %c0_31, %c0_32] : memref<1x16x16x4xbf16, #tpu.memory_space<vmem>>, vector<1x8x16x4xbf16>
    %26 = vector.shape_cast %25 : vector<1x8x16x4xbf16> to vector<128x4xbf16>
    %cst_33 = arith.constant dense<0.000000e+00> : vector<128x4xf32>
    %27 = tpu.matmul %26, %2, %cst_33 {dimension_numbers = #tpu.dot_dimension_numbers<[1], [0], [0], [1], [0, 0, 1, 1], [], []>} : vector<128x4xbf16>, vector<4x4xbf16>, vector<128x4xf32> -> vector<128x4xf32>
    %28 = vector.broadcast %3 : vector<1x4xf32> to vector<128x4xf32>
    %29 = arith.addf %27, %28 : vector<128x4xf32>
    %cst_34 = arith.constant 0.000000e+00 : f32
    %30 = vector.broadcast %cst_34 : f32 to vector<128x4xf32>
    %31 = arith.maximumf %29, %30 : vector<128x4xf32>
    %32 = vector.shape_cast %31 : vector<128x4xf32> to vector<8x16x4xf32>
    %33 = arith.truncf %32 : vector<8x16x4xf32> to vector<8x16x4xbf16>
    %c1 = arith.constant 1 : index
    %c1_35 = arith.constant 1 : index
    %c0_36 = arith.constant 0 : index
    %34 = vector.load %arg12[%c1, %c1_35, %c0_36] : memref<11x32x4xbf16, #tpu.memory_space<vmem>>, vector<8x16x4xbf16>
    tpu.vector_store %arg12[%c1, %c1_35, %c0_36], %33 {strides = array<i32>} : memref<11x32x4xbf16, #tpu.memory_space<vmem>>, vector<8x16x4xbf16>,
    %c0_37 = arith.constant 0 : index
    %c0_38 = arith.constant 0 : index
    %c0_39 = arith.constant 0 : index
    %35 = vector.load %arg12[%c0_37, %c0_38, %c0_39] : memref<11x32x4xbf16, #tpu.memory_space<vmem>>, vector<11x32x4xbf16>
    %36 = vector.shape_cast %35 : vector<11x32x4xbf16> to vector<352x4xbf16>
    %37 = vector.extract_strided_slice %36 {offsets = [0, 0], sizes = [320, 4], strides = [1, 1]} : vector<352x4xbf16> to vector<320x4xbf16>
    %38 = vector.extract_strided_slice %36 {offsets = [1, 0], sizes = [320, 4], strides = [1, 1]} : vector<352x4xbf16> to vector<320x4xbf16>
    %39 = vector.extract_strided_slice %36 {offsets = [2, 0], sizes = [320, 4], strides = [1, 1]} : vector<352x4xbf16> to vector<320x4xbf16>
    %cst_40 = arith.constant 0.000000e+00 : f32
    %40 = vector.broadcast %cst_40 : f32 to vector<256x4xf32>
    %41 = vector.extract_strided_slice %4 {offsets = [0, 0], sizes = [4, 4], strides = [1, 1]} : vector<36x4xbf16> to vector<4x4xbf16>
    %42 = vector.extract_strided_slice %37 {offsets = [0, 0], sizes = [256, 4], strides = [1, 1]} : vector<320x4xbf16> to vector<256x4xbf16>
    %cst_41 = arith.constant dense<0.000000e+00> : vector<256x4xf32>
    %43 = tpu.matmul %42, %41, %cst_41 {dimension_numbers = #tpu.dot_dimension_numbers<[1], [0], [0], [1], [0, 0, 1, 1], [], []>} : vector<256x4xbf16>, vector<4x4xbf16>, vector<256x4xf32> -> vector<256x4xf32>
    %44 = arith.addf %40, %43 : vector<256x4xf32>
    %45 = vector.extract_strided_slice %4 {offsets = [4, 0], sizes = [4, 4], strides = [1, 1]} : vector<36x4xbf16> to vector<4x4xbf16>
    %46 = vector.extract_strided_slice %38 {offsets = [0, 0], sizes = [256, 4], strides = [1, 1]} : vector<320x4xbf16> to vector<256x4xbf16>
    %cst_42 = arith.constant dense<0.000000e+00> : vector<256x4xf32>
    %47 = tpu.matmul %46, %45, %cst_42 {dimension_numbers = #tpu.dot_dimension_numbers<[1], [0], [0], [1], [0, 0, 1, 1], [], []>} : vector<256x4xbf16>, vector<4x4xbf16>, vector<256x4xf32> -> vector<256x4xf32>
    %48 = arith.addf %44, %47 : vector<256x4xf32>
    %49 = vector.extract_strided_slice %4 {offsets = [8, 0], sizes = [4, 4], strides = [1, 1]} : vector<36x4xbf16> to vector<4x4xbf16>
    %50 = vector.extract_strided_slice %39 {offsets = [0, 0], sizes = [256, 4], strides = [1, 1]} : vector<320x4xbf16> to vector<256x4xbf16>
    %cst_43 = arith.constant dense<0.000000e+00> : vector<256x4xf32>
    %51 = tpu.matmul %50, %49, %cst_43 {dimension_numbers = #tpu.dot_dimension_numbers<[1], [0], [0], [1], [0, 0, 1, 1], [], []>} : vector<256x4xbf16>, vector<4x4xbf16>, vector<256x4xf32> -> vector<256x4xf32>
    %52 = arith.addf %48, %51 : vector<256x4xf32>
    %53 = vector.extract_strided_slice %4 {offsets = [12, 0], sizes = [4, 4], strides = [1, 1]} : vector<36x4xbf16> to vector<4x4xbf16>
    %54 = vector.extract_strided_slice %37 {offsets = [32, 0], sizes = [256, 4], strides = [1, 1]} : vector<320x4xbf16> to vector<256x4xbf16>
    %cst_44 = arith.constant dense<0.000000e+00> : vector<256x4xf32>
    %55 = tpu.matmul %54, %53, %cst_44 {dimension_numbers = #tpu.dot_dimension_numbers<[1], [0], [0], [1], [0, 0, 1, 1], [], []>} : vector<256x4xbf16>, vector<4x4xbf16>, vector<256x4xf32> -> vector<256x4xf32>
    %56 = arith.addf %52, %55 : vector<256x4xf32>
    %57 = vector.extract_strided_slice %4 {offsets = [16, 0], sizes = [4, 4], strides = [1, 1]} : vector<36x4xbf16> to vector<4x4xbf16>
    %58 = vector.extract_strided_slice %38 {offsets = [32, 0], sizes = [256, 4], strides = [1, 1]} : vector<320x4xbf16> to vector<256x4xbf16>
    %cst_45 = arith.constant dense<0.000000e+00> : vector<256x4xf32>
    %59 = tpu.matmul %58, %57, %cst_45 {dimension_numbers = #tpu.dot_dimension_numbers<[1], [0], [0], [1], [0, 0, 1, 1], [], []>} : vector<256x4xbf16>, vector<4x4xbf16>, vector<256x4xf32> -> vector<256x4xf32>
    %60 = arith.addf %56, %59 : vector<256x4xf32>
    %61 = vector.extract_strided_slice %4 {offsets = [20, 0], sizes = [4, 4], strides = [1, 1]} : vector<36x4xbf16> to vector<4x4xbf16>
    %62 = vector.extract_strided_slice %39 {offsets = [32, 0], sizes = [256, 4], strides = [1, 1]} : vector<320x4xbf16> to vector<256x4xbf16>
    %cst_46 = arith.constant dense<0.000000e+00> : vector<256x4xf32>
    %63 = tpu.matmul %62, %61, %cst_46 {dimension_numbers = #tpu.dot_dimension_numbers<[1], [0], [0], [1], [0, 0, 1, 1], [], []>} : vector<256x4xbf16>, vector<4x4xbf16>, vector<256x4xf32> -> vector<256x4xf32>
    %64 = arith.addf %60, %63 : vector<256x4xf32>
    %65 = vector.extract_strided_slice %4 {offsets = [24, 0], sizes = [4, 4], strides = [1, 1]} : vector<36x4xbf16> to vector<4x4xbf16>
    %66 = vector.extract_strided_slice %37 {offsets = [64, 0], sizes = [256, 4], strides = [1, 1]} : vector<320x4xbf16> to vector<256x4xbf16>
    %cst_47 = arith.constant dense<0.000000e+00> : vector<256x4xf32>
    %67 = tpu.matmul %66, %65, %cst_47 {dimension_numbers = #tpu.dot_dimension_numbers<[1], [0], [0], [1], [0, 0, 1, 1], [], []>} : vector<256x4xbf16>, vector<4x4xbf16>, vector<256x4xf32> -> vector<256x4xf32>
    %68 = arith.addf %64, %67 : vector<256x4xf32>
    %69 = vector.extract_strided_slice %4 {offsets = [28, 0], sizes = [4, 4], strides = [1, 1]} : vector<36x4xbf16> to vector<4x4xbf16>
    %70 = vector.extract_strided_slice %38 {offsets = [64, 0], sizes = [256, 4], strides = [1, 1]} : vector<320x4xbf16> to vector<256x4xbf16>
    %cst_48 = arith.constant dense<0.000000e+00> : vector<256x4xf32>
    %71 = tpu.matmul %70, %69, %cst_48 {dimension_numbers = #tpu.dot_dimension_numbers<[1], [0], [0], [1], [0, 0, 1, 1], [], []>} : vector<256x4xbf16>, vector<4x4xbf16>, vector<256x4xf32> -> vector<256x4xf32>
    %72 = arith.addf %68, %71 : vector<256x4xf32>
    %73 = vector.extract_strided_slice %4 {offsets = [32, 0], sizes = [4, 4], strides = [1, 1]} : vector<36x4xbf16> to vector<4x4xbf16>
    %74 = vector.extract_strided_slice %39 {offsets = [64, 0], sizes = [256, 4], strides = [1, 1]} : vector<320x4xbf16> to vector<256x4xbf16>
    %cst_49 = arith.constant dense<0.000000e+00> : vector<256x4xf32>
    %75 = tpu.matmul %74, %73, %cst_49 {dimension_numbers = #tpu.dot_dimension_numbers<[1], [0], [0], [1], [0, 0, 1, 1], [], []>} : vector<256x4xbf16>, vector<4x4xbf16>, vector<256x4xf32> -> vector<256x4xf32>
    %76 = arith.addf %72, %75 : vector<256x4xf32>
    %77 = vector.broadcast %5 : vector<1x4xf32> to vector<256x4xf32>
    %78 = arith.addf %76, %77 : vector<256x4xf32>
    %cst_50 = arith.constant 0.000000e+00 : f32
    %79 = vector.broadcast %cst_50 : f32 to vector<256x4xf32>
    %80 = arith.maximumf %78, %79 : vector<256x4xf32>
    %81 = arith.truncf %80 : vector<256x4xf32> to vector<256x4xbf16>
    %cst_51 = arith.constant dense<0.000000e+00> : vector<256x16xf32>
    %82 = tpu.matmul %81, %6, %cst_51 {dimension_numbers = #tpu.dot_dimension_numbers<[1], [0], [0], [1], [0, 0, 1, 1], [], []>} : vector<256x4xbf16>, vector<4x16xbf16>, vector<256x16xf32> -> vector<256x16xf32>
    %83 = vector.broadcast %7 : vector<1x16xf32> to vector<256x16xf32>
    %84 = arith.addf %82, %83 : vector<256x16xf32>
    %85 = vector.shape_cast %84 : vector<256x16xf32> to vector<8x32x16xf32>
    %86 = vector.extract_strided_slice %85 {offsets = [0, 0, 0], sizes = [8, 16, 16], strides = [1, 1, 1]} : vector<8x32x16xf32> to vector<8x16x16xf32>
    %cst_52 = arith.constant dense<0.000000e+00> : vector<128x16xf32>
    %87 = tpu.matmul %26, %8, %cst_52 {dimension_numbers = #tpu.dot_dimension_numbers<[1], [0], [0], [1], [0, 0, 1, 1], [], []>} : vector<128x4xbf16>, vector<4x16xbf16>, vector<128x16xf32> -> vector<128x16xf32>
    %88 = vector.broadcast %9 : vector<1x16xf32> to vector<128x16xf32>
    %89 = arith.addf %87, %88 : vector<128x16xf32>
    %90 = vector.shape_cast %89 : vector<128x16xf32> to vector<8x16x16xf32>
    %91 = arith.addf %86, %90 : vector<8x16x16xf32>
    %cst_53 = arith.constant 0.000000e+00 : f32
    %92 = vector.broadcast %cst_53 : f32 to vector<8x16x16xf32>
    %93 = arith.maximumf %91, %92 : vector<8x16x16xf32>
    %94 = vector.shape_cast %93 : vector<8x16x16xf32> to vector<1x8x16x16xf32>
    %95 = arith.truncf %94 : vector<1x8x16x16xf32> to vector<1x8x16x16xbf16>
    %c0_54 = arith.constant 0 : index
    %c0_55 = arith.constant 0 : index
    %c0_56 = arith.constant 0 : index
    %c0_57 = arith.constant 0 : index
    %96 = vector.load %arg11[%c0_54, %c0_55, %c0_56, %c0_57] : memref<1x8x16x16xbf16, #tpu.memory_space<vmem>>, vector<1x8x16x16xbf16>
    tpu.vector_store %arg11[%c0_54, %c0_55, %c0_56, %c0_57], %95 {strides = array<i32>} : memref<1x8x16x16xbf16, #tpu.memory_space<vmem>>, vector<1x8x16x16xbf16>,
    return
  }
  func.func @transform_0(%arg0: i32, %arg1: i32) -> (i32, i32, i32, i32) {
    %c0_i32 = arith.constant 0 : i32
    %c0_i32_0 = arith.constant 0 : i32
    %c0_i32_1 = arith.constant 0 : i32
    %c0_i32_2 = arith.constant 0 : i32
    return %arg0, %c0_i32, %c0_i32_0, %c0_i32_1 : i32, i32, i32, i32
  }
  func.func @transform_1(%arg0: i32, %arg1: i32) -> (i32, i32) {
    %c0_i32 = arith.constant 0 : i32
    %c0_i32_0 = arith.constant 0 : i32
    %c0_i32_1 = arith.constant 0 : i32
    return %c0_i32, %c0_i32_0 : i32, i32
  }
  func.func @transform_2(%arg0: i32, %arg1: i32) -> (i32, i32) {
    %c0_i32 = arith.constant 0 : i32
    %c0_i32_0 = arith.constant 0 : i32
    %c0_i32_1 = arith.constant 0 : i32
    return %c0_i32, %c0_i32_0 : i32, i32
  }
  func.func @transform_3(%arg0: i32, %arg1: i32) -> (i32, i32) {
    %c0_i32 = arith.constant 0 : i32
    %c0_i32_0 = arith.constant 0 : i32
    %c0_i32_1 = arith.constant 0 : i32
    return %c0_i32, %c0_i32_0 : i32, i32
  }
  func.func @transform_4(%arg0: i32, %arg1: i32) -> (i32, i32) {
    %c0_i32 = arith.constant 0 : i32
    %c0_i32_0 = arith.constant 0 : i32
    %c0_i32_1 = arith.constant 0 : i32
    return %c0_i32, %c0_i32_0 : i32, i32
  }
  func.func @transform_5(%arg0: i32, %arg1: i32) -> (i32, i32) {
    %c0_i32 = arith.constant 0 : i32
    %c0_i32_0 = arith.constant 0 : i32
    %c0_i32_1 = arith.constant 0 : i32
    return %c0_i32, %c0_i32_0 : i32, i32
  }
  func.func @transform_6(%arg0: i32, %arg1: i32) -> (i32, i32) {
    %c0_i32 = arith.constant 0 : i32
    %c0_i32_0 = arith.constant 0 : i32
    %c0_i32_1 = arith.constant 0 : i32
    return %c0_i32, %c0_i32_0 : i32, i32
  }
  func.func @transform_7(%arg0: i32, %arg1: i32) -> (i32, i32) {
    %c0_i32 = arith.constant 0 : i32
    %c0_i32_0 = arith.constant 0 : i32
    %c0_i32_1 = arith.constant 0 : i32
    return %c0_i32, %c0_i32_0 : i32, i32
  }
  func.func @transform_8(%arg0: i32, %arg1: i32) -> (i32, i32) {
    %c0_i32 = arith.constant 0 : i32
    %c0_i32_0 = arith.constant 0 : i32
    %c0_i32_1 = arith.constant 0 : i32
    return %c0_i32, %c0_i32_0 : i32, i32
  }
  func.func @transform_9(%arg0: i32, %arg1: i32) -> (i32, i32, i32, i32) {
    %c0_i32 = arith.constant 0 : i32
    %c0_i32_0 = arith.constant 0 : i32
    %c0_i32_1 = arith.constant 0 : i32
    return %arg0, %arg1, %c0_i32, %c0_i32_0 : i32, i32, i32, i32
  }
}

</mosaic_0001>

<bundles_post_ra>
// kernel: tpu_custom_call.1
= control target key start
LH: loop header
LB: loop body
LE: loop exit
PB: predicated region body
PF: predicated region fallthrough
CT: control target
= control target key end

     0   :  { %s5288_s0 = inlined_call_operand.vmem [shape: bf16[2,16,16,4], index: 0, kind: input, shape index: {}]   ;;  %s5289_s1 = inlined_call_operand.vmem [shape: bf16[4,4], index: 1, kind: input, shape index: {}]   ;;  %s5290_s2 = inlined_call_operand.vmem [shape: f32[1,4], index: 2, kind: input, shape index: {}]   ;;  %s5291_s3 = inlined_call_operand.vmem [shape: bf16[36,4], index: 3, kind: input, shape index: {}]   ;;  %s5292_s4 = inlined_call_operand.vmem [shape: f32[1,4], index: 4, kind: input, shape index: {}]   ;;  %s5293_s5 = inlined_call_operand.vmem [shape: bf16[4,16], index: 5, kind: input, shape index: {}]   ;;  %s5294_s6 = inlined_call_operand.vmem [shape: f32[1,16], index: 6, kind: input, shape index: {}]   ;;  %s5295_s7 = inlined_call_operand.vmem [shape: bf16[4,16], index: 7, kind: input, shape index: {}]   ;;  %s5296_s8 = inlined_call_operand.vmem [shape: f32[1,16], index: 8, kind: input, shape index: {}]   ;;  %s5297_s9 = inlined_call_operand.hbm [shape: bf16[2,16,16,16], index: 9, kind: output, shape index: {}]  }
   0x1   :  { %5319 = sst [smem:[#allocation47_spill]] %s5289_s1 }
   0x2   :  { %14 = vsyncpa [#allocation4], 0 }
   0x3   :  { %16 = vsyncpa [#allocation4 + $0x1], 0  ;;  %s3638_s30 = smov 0   ;;  %s3640_s10 = smov 0  }
   0x4   :  { %s3642_s11 = smov 0   ;;  %s3644_s12 = smov 0  }
   0x5   :  { %s3646_s13 = smov 0   ;;  %s3648_s14 = smov 0  }
   0x6   :  { %s3650_s15 = smov 0   ;;  %s3652_s16 = smov 0  }
   0x7 LB: > { %5320 = sst [smem:[#allocation6_spill]] %s3579_s15  ;;  %s3034_s17 = sadd.s32 4294967295, %s3583_s16   ;;  %s3583_s16 = sphi %s3652_s16, %s22_s16   ;;  %s3579_s15 = sphi %s3650_s15, %s5428_s15   ;;  %s3575_s14 = sphi %s3648_s14, %s5433_s14   ;;  %s3571_s13 = sphi %s3646_s13, %s5426_s13   ;;  %s3567_s12 = sphi %s3644_s12, %s5432_s12   ;;  %s3563_s11 = sphi %s3642_s11, %s5431_s11   ;;  %s3559_s10 = sphi %s3640_s10, %s5430_s10   ;;  %s3555_s30 = sphi %s3638_s30, %s5429_s30  }
   0x8   : > { %s3035_s18 = sadd.s32 4294967294, %s3583_s16   ;;  %s31_s19 = sadd.s32 1, %s3575_s14 }
   0x9   : > { %p32_p0 = scmp.ge.s32.totalorder %s31_s19, 2  ;;  %s34_s20 = sadd.s32 1, %s3579_s15 }
   0xa   : > { %p247_p1 = scmp.ne.s32.totalorder %s3563_s11, %s3559_s10  ;;  %p248_p2 = scmp.eq.s32.totalorder %s3034_s17, 3 }
   0xb   : > { %s5435_s19 = smov (%p32_p0, %s31_s19), 0  ;;  %s5437_s20 = smov (!%p32_p0, %s34_s20), %s3579_s15 }
   0xc   : > { %5321 = sst [smem:[#allocation7_spill]] %s5435_s19  ;;  %s233_s21 = ssub.s32 %s3575_s14, %s5435_s19 }
   0xd   : > { %p3689_p3 = por %p248_p2, %p247_p1  ;;  %p36_p4 = scmp.ge.s32.totalorder %s5437_s20, 2 }
   0xe   : > { %p253_p5 = scmp.ne.s32.totalorder %s3559_s10, %s3555_s30  ;;  %p254_p6 = scmp.eq.s32.totalorder %s3035_s18, 3 }
   0xf   : > { %p3038_p7 = scmp.ge.s32.totalorder %s3583_s16, 1  ;;  %s5439_s20 = smov (%p36_p4, %s5437_s20), 0 }
  0x10   : > { %5323 = sst [smem:[#allocation8_spill]] %s5439_s20  ;;  %p3698_p8 = por %p254_p6, %p253_p5 }
  0x11   : > { %p304_p9 = scmp.lt.s32.totalorder %s3583_s16, 5  ;;  %s232_s24 = ssub.s32 %s3579_s15, %s5439_s20 }
  0x12   : > { %s237_s25 = sadd.s32 1, %s3563_s11  ;;  %s234_s26 = sor.u32 %s233_s21, %s232_s24 }
  0x13   : > { %p305_p10 = pnand %p3038_p7, %p304_p9  ;;  %p235_p11 = scmp.eq.s32.totalorder %s234_s26, 0 }
  0x15   : > { %s3707_s27 = scalar_select %p235_p11, %s3563_s11, %s237_s25  }
  0x16   : > { %308 = sbr.rel (%p305_p10) target bundleno = 1545 (0x609), region = 56 }
  0x1b   : > { %s5301_s28 = sand.u32 1, %s3559_s10   ;;  %p340_p12 = scmp.lt.s32.totalorder %s3571_s13, 1  ;;  %v3719_v1 = vld [vmem:[%s5290_s2] sm:$0x1]  ;;  %v3734_v3 = vld [vmem:[%s5291_s3 + $0x4] sm:$0xf] }
  0x1c   : > { %s5325_s1 = sld [smem:[#allocation47_spill]]  ;;  %s3723_s21 = sshll.u32 %s5301_s28, 6  ;;  %v3729_v2 = vld [vmem:[%s5291_s3] sm:$0xf]  ;;  %v3739_v4 = vld [vmem:[%s5291_s3 + $0x8] sm:$0xf] }
  0x1d   : > { %v3744_v5 = vld [vmem:[%s5291_s3 + $0xc] sm:$0xf]  ;;  %vm360_vm0 = vcmask 27648   ;;  %s341_s28 = scalar_select %p340_p12, %s3571_s13, 1  ;;  %v3750_v6 = vld [vmem:[%s5291_s3 + $0x10] sm:$0x3] }
  0x1e   : > { %v3755_v7 = vld [vmem:[%s5292_s4] sm:$0x1]  ;;  %v3585_v12 = vmov 0   ;;  %vm374_vm1 = vcmask 24576   ;;  %vm375_vm2 = vsmask.f32 256 }
  0x1f   : > { %5326 = vst [vmem:[#allocation9_spill] sm:$0xff] %v3755_v7  ;;  %v3760_v8 = vld [vmem:[%s5293_s5] sm:$0x3]  ;;  %s3351_s25 = sshll.u32 %s341_s28, 7  ;;  %vm3799_vm3 = vmand %vm374_vm1, %vm375_vm2  ;;  %v380_v15 = vld [vmem:[#allocation2 + $0x10] sm:$0x1] }
  0x20   : > { %v3765_v9 = vld [vmem:[%s5294_s6] sm:$0x1]  ;;  %361 = vst.msk [vmem:[#allocation2] sm:$0xf] %vm360_vm0, %v3585_v12  ;;  %s3781_s17 = scalar_lea.vmem %s5288_s0, %s3351_s25  ;;  %v381_v18 = vsel %vm3799_vm3, 0, %v380_v15  ;;  %p3043_p13 = scmp.le.s32.totalorder %s3567_s12, 0 }
  0x21   : > { %5327 = vst [vmem:[#allocation10_spill] sm:$0xff] %v3765_v9  ;;  %v3770_v10 = vld [vmem:[%s5295_s7] sm:$0x3]  ;;  %v386_v19 = vld [vmem:[#allocation2 + $0x30] sm:$0x1]  ;;  %s5334_s28 = sshll.u32 (!%p3043_p13), %s3567_s12, 3 }
  0x22   : > { %v3714_v0 = vld [vmem:[%s5325_s1] sm:$0x3]  ;;  %5328 = vst [vmem:[#allocation11_spill] sm:$0xff] %v3770_v10  ;;  %v392_v21 = vld [vmem:[#allocation2 + $0x50] sm:$0x1]  ;;  %v387_v23 = vsel %vm3799_vm3, 0, %v386_v19 }
  0x23   : > { %v3775_v11 = vld [vmem:[%s5296_s8] sm:$0x1]  ;;  %362 = vst.msk [vmem:[#allocation2 + $0x4] sm:$0xf] %vm360_vm0, %v3585_v12  ;;  %v393_v26 = vsel %vm3799_vm3, 0, %v392_v21  ;;  %s3857_s1 = scalar_lea.vmem [#allocation3], %s3723_s21 }
  0x24   : > { %5329 = vst [vmem:[#allocation12_spill] sm:$0xff] %v3775_v11  ;;  %v383_v16 = vld [vmem:[#allocation2 + $0x20] sm:$0x1]  ;;  %v398_v27 = vld [vmem:[#allocation2 + $0x70] sm:$0x1]  ;;  %s3044_s24 = sadd.s32 (!%p3043_p13), 4294967295, %s5334_s28 }
  0x25   : > { %363 = vst.msk [vmem:[#allocation2 + $0x8] sm:$0xf] %vm360_vm0, %v3585_v12  ;;  %v389_v20 = vld [vmem:[#allocation2 + $0x40] sm:$0x1]  ;;  %v384_v22 = vsel %vm3799_vm3, 0, %v383_v16  ;;  %v399_v31 = vsel %vm3799_vm3, 0, %v398_v27 }
  0x26   : > { %364 = vst.msk [vmem:[#allocation2 + $0xc] sm:$0xf] %vm360_vm0, %v3585_v12  ;;  %v395_v24 = vld [vmem:[#allocation2 + $0x60] sm:$0x1]  ;;  %v390_v25 = vsel %vm3799_vm3, 0, %v389_v20  ;;  %s3352_s20 = sshll.u32 (!%p3043_p13), %s3044_s24, 3 }
  0x27   : > { %366 = vst.msk [vmem:[#allocation2 + $0x90] sm:$0xf] %vm360_vm0, %v3585_v12  ;;  %v377_v14 = vld [vmem:[#allocation2] sm:$0x1]  ;;  %vm411_vm4 = vsmask.f32 7938  ;;  %s464_s18 = scalar_lea.vmem (!%p3043_p13), %s3781_s17, %s3352_s20 }
  0x28   : > { %367 = vst.msk [vmem:[#allocation2 + $0x94] sm:$0xf] %vm360_vm0, %v3585_v12  ;;  %v378_v17 = vsel %vm3799_vm3, 0, %v377_v14  ;;  %v401_v28 = vld [vmem:[#allocation2 + $0x80] sm:$0x1]  ;;  %v396_v29 = vsel %vm3799_vm3, 0, %v395_v24  ;;  %vm3826_vm5 = vmand %vm360_vm0, %vm411_vm4 }
  0x29   : > { %368 = vst.msk [vmem:[#allocation2 + $0x98] sm:$0xf] %vm360_vm0, %v3585_v12  ;;  %v402_v33 = vsel %vm3799_vm3, 0, %v401_v28  ;;  %v417_v37 = vld [vmem:[#allocation2 + $0x18] sm:$0xf] }
  0x2a   : > { %369 = vst.msk [vmem:[#allocation2 + $0x9c] sm:$0xf] %vm360_vm0, %v3585_v12  ;;  %v421_v39 = vld [vmem:[#allocation2 + $0x28] sm:$0xf]  ;;  %v425_v41 = vld [vmem:[#allocation2 + $0x38] sm:$0xf] }
  0x2b   : > { %370 = vst.msk [vmem:[#allocation2 + $0xa0] sm:$0xf] %vm360_vm0, %v3585_v12  ;;  %v418_v42 = vsel %vm3826_vm5, 0, %v417_v37  ;;  %v429_v43 = vld [vmem:[#allocation2 + $0x48] sm:$0xf]  ;;  %v422_v44 = vsel %vm3826_vm5, 0, %v421_v39 }
  0x2c   : > { %372 = vst.msk [vmem:[#allocation2 + $0xa8] sm:$0xf] %vm360_vm0, %v3585_v12  ;;  %v413_v35 = vld [vmem:[#allocation2 + $0x8] sm:$0xf]  ;;  %v433_v45 = vld [vmem:[#allocation2 + $0x58] sm:$0xf] }
  0x2d   : > { %420 = vst.msk [vmem:[#allocation2 + $0x1c] sm:$0xf] %vm360_vm0, %v3585_v12  ;;  %v414_v40 = vsel %vm3826_vm5, 0, %v413_v35  ;;  %v426_v46 = vsel %vm3826_vm5, 0, %v425_v41  ;;  %v437_v47 = vld [vmem:[#allocation2 + $0x68] sm:$0xf] }
  0x2e   : > { %424 = vst.msk [vmem:[#allocation2 + $0x2c] sm:$0xf] %vm360_vm0, %v3585_v12  ;;  %v404_v30 = vld [vmem:[#allocation2 + $0x90] sm:$0x1]  ;;  %v430_v48 = vsel %vm3826_vm5, 0, %v429_v43  ;;  %v434_v50 = vsel %vm3826_vm5, 0, %v433_v45 }
  0x2f   : > { %428 = vst.msk [vmem:[#allocation2 + $0x3c] sm:$0xf] %vm360_vm0, %v3585_v12  ;;  %v405_v36 = vsel %vm3799_vm3, 0, %v404_v30  ;;  %v441_v49 = vld [vmem:[#allocation2 + $0x78] sm:$0xf]  ;;  %v438_v52 = vsel %vm3826_vm5, 0, %v437_v47 }
  0x30   : > { %432 = vst.msk [vmem:[#allocation2 + $0x4c] sm:$0xf] %vm360_vm0, %v3585_v12  ;;  %v445_v51 = vld [vmem:[#allocation2 + $0x88] sm:$0xf]  ;;  %v449_v53 = vld [vmem:[#allocation2 + $0x98] sm:$0xf] }
  0x31   : > { %436 = vst.msk [vmem:[#allocation2 + $0x5c] sm:$0xf] %vm360_vm0, %v3585_v12  ;;  %v442_v54 = vsel %vm3826_vm5, 0, %v441_v49  ;;  %v446_v56 = vsel %vm3826_vm5, 0, %v445_v51  ;;  %v450_v57 = vsel %vm3826_vm5, 0, %v449_v53 }
  0x32   : > { %440 = vst.msk [vmem:[#allocation2 + $0x6c] sm:$0xf] %vm360_vm0, %v3585_v12  ;;  %v407_v32 = vld [vmem:[#allocation2 + $0xa0] sm:$0x1] }
  0x33   : > { %444 = vst.msk [vmem:[#allocation2 + $0x7c] sm:$0xf] %vm360_vm0, %v3585_v12  ;;  %v408_v38 = vsel %vm3799_vm3, 0, %v407_v32  ;;  %v453_v55 = vld [vmem:[#allocation2 + $0xa8] sm:$0xf] }
  0x34   : > { %448 = vst.msk [vmem:[#allocation2 + $0x8c] sm:$0xf] %vm360_vm0, %v3585_v12  ;;  %v454_v58 = vsel %vm3826_vm5, 0, %v453_v55 }
  0x35   : > { %416 = vst.msk [vmem:[#allocation2 + $0xc] sm:$0xf] %vm360_vm0, %v3585_v12 }
  0x36   : > { %452 = vst.msk [vmem:[#allocation2 + $0x9c] sm:$0xf] %vm360_vm0, %v3585_v12 }
  0x37   : > { %379 = vst [vmem:[#allocation2] sm:$0x1] %v378_v17 }
  0x38   : > { %382 = vst [vmem:[#allocation2 + $0x10] sm:$0x1] %v381_v18 }
  0x39   : > { %385 = vst [vmem:[#allocation2 + $0x20] sm:$0x1] %v384_v22 }
  0x3a   : > { %388 = vst [vmem:[#allocation2 + $0x30] sm:$0x1] %v387_v23 }
  0x3b   : > { %391 = vst [vmem:[#allocation2 + $0x40] sm:$0x1] %v390_v25 }
  0x3c   : > { %394 = vst [vmem:[#allocation2 + $0x50] sm:$0x1] %v393_v26 }
  0x3d   : > { %397 = vst [vmem:[#allocation2 + $0x60] sm:$0x1] %v396_v29 }
  0x3e   : > { %400 = vst [vmem:[#allocation2 + $0x70] sm:$0x1] %v399_v31 }
  0x3f   : > { %403 = vst [vmem:[#allocation2 + $0x80] sm:$0x1] %v402_v33 }
  0x40   : > { %406 = vst [vmem:[#allocation2 + $0x90] sm:$0x1] %v405_v36 }
  0x41   : > { %409 = vst [vmem:[#allocation2 + $0xa0] sm:$0x1] %v408_v38 }
  0x42   : > { %415 = vst [vmem:[#allocation2 + $0x8] sm:$0xf] %v414_v40 }
  0x43   : > { %419 = vst [vmem:[#allocation2 + $0x18] sm:$0xf] %v418_v42 }
  0x44   : > { %423 = vst [vmem:[#allocation2 + $0x28] sm:$0xf] %v422_v44 }
  0x45   : > { %427 = vst [vmem:[#allocation2 + $0x38] sm:$0xf] %v426_v46 }
  0x46   : > { %431 = vst [vmem:[#allocation2 + $0x48] sm:$0xf] %v430_v48 }
  0x47   : > { %435 = vst [vmem:[#allocation2 + $0x58] sm:$0xf] %v434_v50 }
  0x48   : > { %439 = vst [vmem:[#allocation2 + $0x68] sm:$0xf] %v438_v52  ;;  %460 = sbr.rel (%p3043_p13) target bundleno = 231 (0xe7), region = 60 }
  0x49   : > { %443 = vst [vmem:[#allocation2 + $0x78] sm:$0xf] %v442_v54 }
  0x4a   : > { %447 = vst [vmem:[#allocation2 + $0x88] sm:$0xf] %v446_v56 }
  0x4b   : > { %451 = vst [vmem:[#allocation2 + $0x98] sm:$0xf] %v450_v57 }
  0x4c   : > { %455 = vst [vmem:[#allocation2 + $0xa8] sm:$0xf] %v454_v58 }
  0x4d   : > { %vm479_vm6 = vcmask 1041408   ;;  %vm475_vm7 = vcmask 31744   ;;  %v3353_v60 = vld [vmem:[%s464_s18] sm:$0xff]  ;;  %v468_v61 = vperm.slane %v3719_v1, 0  ;;  %vm501_vm8 = vsmask.f32 4368 }
  0x4e   : > { %v481_v59 = vsel %vm479_vm6, %v3714_v0, 0  ;;  %v523_v20 = vld [vmem:[#allocation2] sm:$0xf]  ;;  %vm502_vm9 = vmor %vm375_vm2, %vm501_vm8  ;;  %v527_v28 = vld [vmem:[#allocation2 + $0x8] sm:$0x1] }
  0x4f   : > { %490 = vmatpush.bf16.msra.mxu0 %v481_v59 }
  0x52   : > { %3051 = vmatmul.msk.bf16.vlgmr.msra.gmra.mxu0 %vm475_vm7, %v3353_v60 }
  0xcf   : > { %v492_v62 = vpop.f32.mrf.mxu0 }
  0xd0   : > { %v493_v63 = vadd.f32 %v492_v62, %v468_v61 }
  0xd2   : > { %v497_v12 = vmax.f32 %v493_v63, 0.0 }
  0xd4   : > { %v499_v14 = vpack.c.bf16 %v497_v12, %v497_v12 }
  0xd6   : > { %v504_v15 = vshrl.u32 %v499_v14, 16  ;;  %v507_v18 = vshll.u32 %v499_v14, 16 }
  0xd7   : > { %v494_v16 = vpop.f32.mrf.mxu0 }
  0xd8   : > { %v506_v17 = vrot.slane %v504_v15, 7  ;;  %v495_v19 = vadd.f32 %v494_v16, %v468_v61 }
  0xda   : > { %v509_v21 = vor.u32 %v507_v18, %v506_v17  ;;  %v498_v22 = vmax.f32 %v495_v19, 0.0  ;;  %v510_v29 = vrot.slane %v506_v17, 4 }
  0xdc   : > { %v524_v23 = vsel %vm3826_vm5, %v509_v21, %v523_v20  ;;  %v500_v24 = vpack.c.bf16 %v498_v22, %v498_v22 }
  0xdd   : > { %525 = vst [vmem:[#allocation2] sm:$0xf] %v524_v23 }
  0xde   : > { %v512_v25 = vshrl.u32 %v500_v24, 16  ;;  %v515_v27 = vshll.u32 %v500_v24, 16 }
  0xe0   : > { %v514_v26 = vrot.slane %v512_v25, 7 }
  0xe2   : > { %v517_v30 = vor.u32 %v515_v27, %v514_v26  ;;  %v519_v31 = vrot.slane %v514_v26, 4 }
  0xe4   : > { %v518_v32 = vsel %vm502_vm9, %v510_v29, %v517_v30  ;;  %v528_v33 = vsel %vm3799_vm3, %v519_v31, %v527_v28 }
  0xe5   : > { %526 = vst.msk [vmem:[#allocation2 + $0x4] sm:$0xf] %vm360_vm0, %v518_v32 }
  0xe6   : > { %529 = vst [vmem:[#allocation2 + $0x8] sm:$0x1] %v528_v33 }
  0xe7 PF: > { %p3052_p0 = scmp.ge.s32.totalorder %s3567_s12, 1 }
  0xe8   : > { %s3354_s21 = sshll.u32 (!%p3052_p0), %s3567_s12, 6 }
  0xe9   : > { %533 = sbr.rel (%p3052_p0) target bundleno = 392 (0x188), region = 64  ;;  %s2987_s25 = scalar_lea.vmem (!%p3052_p0), %s3781_s17, %s3354_s21 }
  0xee   : > { %vm552_vm10 = vcmask 1041408   ;;  %v3355_v36 = vld [vmem:[%s2987_s25 + $0x40] sm:$0xff]  ;;  %vm548_vm11 = vcmask 31744   ;;  %v541_v37 = vperm.slane %v3719_v1, 0  ;;  %v596_v47 = vld [vmem:[#allocation2 + $0x90] sm:$0xf] }
  0xef   : > { %v554_v35 = vsel %vm552_vm10, %v3714_v0, 0  ;;  %vm574_vm12 = vsmask.f32 4368  ;;  %v600_v55 = vld [vmem:[#allocation2 + $0x98] sm:$0x1] }
  0xf0   : > { %563 = vmatpush.bf16.msra.mxu0 %v554_v35  ;;  %vm575_vm13 = vmor %vm375_vm2, %vm574_vm12 }
  0xf3   : > { %3061 = vmatmul.msk.bf16.vlgmr.msra.gmra.mxu0 %vm548_vm11, %v3355_v36 }
 0x170   : > { %v565_v38 = vpop.f32.mrf.mxu0 }
 0x171   : > { %v566_v39 = vadd.f32 %v565_v38, %v541_v37 }
 0x173   : > { %v570_v40 = vmax.f32 %v566_v39, 0.0 }
 0x175   : > { %v572_v41 = vpack.c.bf16 %v570_v40, %v570_v40 }
 0x177   : > { %v577_v42 = vshrl.u32 %v572_v41, 16  ;;  %v580_v45 = vshll.u32 %v572_v41, 16 }
 0x178   : > { %v567_v43 = vpop.f32.mrf.mxu0 }
 0x179   : > { %v579_v44 = vrot.slane %v577_v42, 7  ;;  %v568_v46 = vadd.f32 %v567_v43, %v541_v37 }
 0x17b   : > { %v582_v48 = vor.u32 %v580_v45, %v579_v44  ;;  %v571_v49 = vmax.f32 %v568_v46, 0.0  ;;  %v583_v56 = vrot.slane %v579_v44, 4 }
 0x17d   : > { %v597_v50 = vsel %vm3826_vm5, %v582_v48, %v596_v47  ;;  %v573_v51 = vpack.c.bf16 %v571_v49, %v571_v49 }
 0x17e   : > { %598 = vst [vmem:[#allocation2 + $0x90] sm:$0xf] %v597_v50 }
 0x17f   : > { %v585_v52 = vshrl.u32 %v573_v51, 16  ;;  %v588_v54 = vshll.u32 %v573_v51, 16 }
 0x181   : > { %v587_v53 = vrot.slane %v585_v52, 7 }
 0x183   : > { %v590_v57 = vor.u32 %v588_v54, %v587_v53  ;;  %v592_v58 = vrot.slane %v587_v53, 4 }
 0x185   : > { %v591_v59 = vsel %vm575_vm13, %v583_v56, %v590_v57  ;;  %v601_v60 = vsel %vm3799_vm3, %v592_v58, %v600_v55 }
 0x186   : > { %599 = vst.msk [vmem:[#allocation2 + $0x94] sm:$0xf] %vm360_vm0, %v591_v59 }
 0x187   : > { %602 = vst [vmem:[#allocation2 + $0x98] sm:$0x1] %v601_v60 }
 0x188 PF: > { %vm690_vm14 = vcmask 1041408   ;;  %s3357_s26 = sshll.u32 %s3567_s12, 6  ;;  %vm665_vm15 = vcmask 31744   ;;  %v3902_v17 = vld [vmem:[#allocation2] sm:$0xff]  ;;  %v1252_v19 = vunpack.c.l.b16 %v3729_v2  ;;  %v3909_v21 = vld [vmem:[#allocation2 + $0x8] sm:$0xff]  ;;  %v3920_v30 = vperm.slane %v3719_v1, 0 }
 0x189   : > { %v692_v61 = vsel %vm690_vm14, %v3714_v0, 0  ;;  %s3886_s15 = scalar_lea.vmem %s3781_s17, %s3357_s26  ;;  %v1428_v15 = vsel %vm690_vm14, %v3729_v2, 0  ;;  %v1122_v25 = vshll.u32 %v3902_v17, 16  ;;  %v1120_v26 = vshrl.u32 %v3902_v17, 16  ;;  %v938_v42 = vld [vmem:[#allocation2 + $0x10] sm:$0xf] }
 0x18a   : > { %701 = vmatpush.bf16.msra.mxu0 %v692_v61  ;;  %v3358_v62 = vld [vmem:[%s3886_s15] sm:$0xff]  ;;  %v3359_v63 = vld [vmem:[%s3886_s15 + $0x8] sm:$0xff]  ;;  %v3360_v12 = vld [vmem:[%s3886_s15 + $0x10] sm:$0xff]  ;;  %1437 = vmatpush.bf16.msra.mxu2 %v1428_v15  ;;  %v1253_v20 = vpack.c.b16 %v1252_v19, %v1252_v19  ;;  %v1127_v2 = vshll.u32 %v3909_v21, 16  ;;  %vm1118_vm1 = vsmask.f32 7424 }
 0x18b   : > { %v3361_v0 = vld [vmem:[%s3886_s15 + $0x18] sm:$0xff]  ;;  %v3362_v14 = vld [vmem:[%s3886_s15 + $0x20] sm:$0xff]  ;;  %3396 = vmatpush.bf16.msra.mxu3 %v1428_v15  ;;  %v3363_v16 = vld [vmem:[%s3886_s15 + $0x28] sm:$0xff]  ;;  %v1124_v27 = vrot.slane %v1122_v25, 1  ;;  %vm775_vm4 = vsmask.f32 4368 }
 0x18c   : > { %v3364_v18 = vld [vmem:[%s3886_s15 + $0x30] sm:$0xff]  ;;  %v3365_v22 = vld [vmem:[%s3886_s15 + $0x38] sm:$0xff]  ;;  %v1254_v23 = vrot.slane %v1253_v20, 2  ;;  %v1129_v29 = vrot.slane %v1127_v2, 1  ;;  %vm3930_vm6 = vmor %vm375_vm2, %vm775_vm4  ;;  %vm1519_vm2 = vcmask 1046528   ;;  %s3384_s19 = sshll.u32 %s3567_s12, 4 }
 0x18d   : > { %3096 = vmatmul.msk.bf16.vlgmr.msra.gmra.mxu0 %vm665_vm15, %v3358_v62  ;;  %3184 = vmatmul.msk.bf16.vlgmr.msra.gmra.mxu2 %vm665_vm15, %v3902_v17  ;;  %v1125_v28 = vor.u32 %v1124_v27, %v1120_v26  ;;  %v942_v52 = vld [vmem:[#allocation2 + $0x18] sm:$0x1]  ;;  %s3347_s29 = sshll.u32 %s3571_s13, 5  ;;  %s2947_s12 = sshll.u32 %s3857_s1, 4  ;;  %s2948_s12 = int_to_ptr.vmem [resolvable:$true] %s2947_s12 }
 0x18e   : > { %v1304_v24 = vsel %vm690_vm14, %v1254_v23, 0  ;;  %v1521_v23 = vrot.slane %v3909_v21, 1  ;;  %s2944_s17 = sadd.s32 %s3384_s19, %s3347_s29  ;;  %s5425_s21 = sand.u32 1, %s3559_s10  }
 0x18f   : > { %1313 = vmatpush.bf16.msrb.mxu0 %v1304_v24  ;;  %3395 = vmatpush.bf16.msra.mxu1 %v1304_v24  ;;  %v1130_v32 = vsel %vm1118_vm1, %v1125_v28, %v1129_v29  ;;  %s3348_s28 = sshll.u32 %s2944_s17, 2  ;;  %s2932_s25 = scalar_lea.sflag [#allocation4], %s5425_s21 }
 0x190   : > { %s2946_s18 = scalar_lea.hbm %s5297_s9, %s3348_s28  ;;  %s3509_s17 = scalar_lea.hbm %s5297_s9, 256 }
 0x191   : > { %s2949_s13 = sshll.u32 %s2946_s18, 4  ;;  %s2950_s13 = int_to_ptr.hbm [resolvable:$true] %s2949_s13 }
 0x192   : > { %s3503_s26 = sshra.s32 %s2950_s13, 4  ;;  %s3504_s26 = int_to_ptr.hbm [resolvable:$true] %s3503_s26 }
 0x193   : > { %p3510_p5 = scmp.lt.s32.totalorder %s3504_s26, %s5297_s9 }
 0x19d   : > { %3097 = vmatmul.msk.bf16.gmra.mxu0 %vm665_vm15, %v3359_v63  ;;  %3185 = vmatmul.msk.bf16.gmra.mxu2 %vm665_vm15, %v3909_v21 }
 0x1ad   : > { %3098 = vmatmul.msk.bf16.gmra.mxu0 %vm665_vm15, %v3360_v12 }
 0x1bd   : > { %3099 = vmatmul.msk.bf16.gmra.mxu0 %vm665_vm15, %v3361_v0  ;;  %v945_v0 = vld [vmem:[#allocation2 + $0x20] sm:$0xf] }
 0x1cd   : > { %3100 = vmatmul.msk.bf16.gmra.mxu0 %vm665_vm15, %v3362_v14 }
 0x1dd   : > { %3101 = vmatmul.msk.bf16.gmra.mxu0 %vm665_vm15, %v3363_v16  ;;  %v1131_v16 = vshrl.u32 %v3909_v21, 16 }
 0x1df   : > { %v1133_v25 = vor.u32 %v1131_v16, %v1129_v29 }
 0x1ed   : > { %3102 = vmatmul.msk.bf16.gmra.mxu0 %vm665_vm15, %v3364_v18 }
 0x1fd   : > { %3103 = vmatmul.msk.bf16.gmra.mxu0 %vm665_vm15, %v3365_v22  ;;  %v1899_v22 = vsel %vm690_vm14, %v3739_v4, 0 }
 0x1fe   : > { %1908 = vmatpush.bf16.msrb.mxu1 %v1899_v22 }
 0x20a   : > { %v703_v31 = vpop.f32.mrf.mxu0 }
 0x20b   : > { %v704_v33 = vadd.f32 %v703_v31, %v3920_v30 }
 0x20d   : > { %v743_v35 = vmax.f32 %v704_v33, 0.0  ;;  %3168 = vmatmul.msk.bf16.vlgmr.msrb.gmra.mxu0 %vm665_vm15, %v1130_v32 }
 0x20f   : > { %v759_v36 = vpack.c.bf16 %v743_v35, %v743_v35 }
 0x211   : > { %v778_v37 = vshrl.u32 %v759_v36, 16  ;;  %v781_v40 = vshll.u32 %v759_v36, 16  ;;  %v949_v36 = vld [vmem:[#allocation2 + $0x28] sm:$0x1] }
 0x212   : > { %v705_v38 = vpop.f32.mrf.mxu0 }
 0x213   : > { %v780_v39 = vrot.slane %v778_v37, 7  ;;  %v706_v41 = vadd.f32 %v705_v38, %v3920_v30 }
 0x215   : > { %v783_v43 = vor.u32 %v781_v40, %v780_v39  ;;  %v744_v1 = vmax.f32 %v706_v41, 0.0  ;;  %v784_v53 = vrot.slane %v780_v39, 4 }
 0x217   : > { %v939_v44 = vsel %vm3826_vm5, %v783_v43, %v938_v42  ;;  %v760_v45 = vpack.c.bf16 %v744_v1, %v744_v1 }
 0x218   : > { %940 = vst [vmem:[#allocation2 + $0x10] sm:$0xf] %v939_v44 }
 0x219   : > { %v786_v46 = vshrl.u32 %v760_v45, 16  ;;  %v789_v49 = vshll.u32 %v760_v45, 16 }
 0x21a   : > { %v708_v47 = vpop.f32.mrf.mxu0 }
 0x21b   : > { %v788_v48 = vrot.slane %v786_v46, 7  ;;  %v709_v50 = vadd.f32 %v708_v47, %v3920_v30 }
 0x21d   : > { %v791_v54 = vor.u32 %v789_v49, %v788_v48  ;;  %v793_v55 = vrot.slane %v788_v48, 4  ;;  %v745_v56 = vmax.f32 %v709_v50, 0.0  ;;  %v952_v49 = vld [vmem:[#allocation2 + $0x30] sm:$0xf] }
 0x21f   : > { %v792_v57 = vsel %vm3930_vm6, %v784_v53, %v791_v54  ;;  %v943_v58 = vsel %vm3799_vm3, %v793_v55, %v942_v52  ;;  %v761_v59 = vpack.c.bf16 %v745_v56, %v745_v56  ;;  %v1734_v53 = vunpack.c.l.b16 %v3734_v3 }
 0x220   : > { %941 = vst.msk [vmem:[#allocation2 + $0x14] sm:$0xf] %vm360_vm0, %v792_v57 }
 0x221   : > { %944 = vst [vmem:[#allocation2 + $0x18] sm:$0x1] %v943_v58  ;;  %v795_v60 = vshrl.u32 %v761_v59, 16  ;;  %v798_v63 = vshll.u32 %v761_v59, 16  ;;  %v1735_v59 = vpack.c.b16 %v1734_v53, %v1734_v53 }
 0x222   : > { %v710_v61 = vpop.f32.mrf.mxu0 }
 0x223   : > { %v797_v62 = vrot.slane %v795_v60, 7  ;;  %v711_v12 = vadd.f32 %v710_v61, %v3920_v30  ;;  %v1736_v16 = vrot.slane %v1735_v59, 2 }
 0x225   : > { %v800_v14 = vor.u32 %v798_v63, %v797_v62  ;;  %v746_v15 = vmax.f32 %v711_v12, 0.0  ;;  %v801_v35 = vrot.slane %v797_v62, 4 }
 0x227   : > { %v946_v18 = vsel %vm3826_vm5, %v800_v14, %v945_v0  ;;  %v762_v19 = vpack.c.bf16 %v746_v15, %v746_v15  ;;  %v3943_v20 = vld [vmem:[#allocation2 + $0x10] sm:$0xff] }
 0x228   : > { %947 = vst [vmem:[#allocation2 + $0x20] sm:$0xf] %v946_v18  ;;  %3186 = vmatmul.msk.bf16.gmra.mxu2 %vm665_vm15, %v3943_v20  ;;  %v1135_v26 = vshll.u32 %v3943_v20, 16  ;;  %v1523_v2 = vrot.slane %v3943_v20, 1  ;;  %v3967_v46 = vld [vmem:[#allocation2 + $0x18] sm:$0xff]  ;;  %v1139_v54 = vshrl.u32 %v3943_v20, 16 }
 0x229   : > { %v803_v24 = vshrl.u32 %v762_v19, 16  ;;  %v806_v31 = vshll.u32 %v762_v19, 16  ;;  %v1143_v55 = vshll.u32 %v3967_v46, 16  ;;  %v1147_v53 = vshrl.u32 %v3967_v46, 16 }
 0x22a   : > { %v713_v27 = vpop.f32.mrf.mxu0  ;;  %v1137_v33 = vrot.slane %v1135_v26, 1  ;;  %v3958_v29 = vsel %vm1519_vm2, %v1521_v23, %v1523_v2  ;;  %v956_v26 = vld [vmem:[#allocation2 + $0x38] sm:$0x1] }
 0x22b   : > { %v805_v28 = vrot.slane %v803_v24, 7  ;;  %v714_v32 = vadd.f32 %v713_v27, %v3920_v30  ;;  %v1145_v14 = vrot.slane %v1143_v55, 1 }
 0x22c   : > { %v1138_v40 = vsel %vm1118_vm1, %v1133_v25, %v1137_v33  ;;  %v1141_v60 = vor.u32 %v1139_v54, %v1137_v33 }
 0x22d   : > { %v808_v37 = vor.u32 %v806_v31, %v805_v28  ;;  %v810_v38 = vrot.slane %v805_v28, 4  ;;  %v747_v39 = vmax.f32 %v714_v32, 0.0  ;;  %3169 = vmatmul.msk.bf16.gmra.mxu0 %vm665_vm15, %v1138_v40  ;;  %v1744_v31 = vsel %vm690_vm14, %v1736_v16, 0 }
 0x22e   : > { %v3986_v27 = vsel %vm1118_vm1, %v1141_v60, %v1145_v14  ;;  %1753 = vmatpush.bf16.msra.mxu0 %v1744_v31  ;;  %v1149_v59 = vor.u32 %v1147_v53, %v1145_v14 }
 0x22f   : > { %v809_v41 = vsel %vm3930_vm6, %v801_v35, %v808_v37  ;;  %v950_v42 = vsel %vm3799_vm3, %v810_v38, %v949_v36  ;;  %v763_v43 = vpack.c.bf16 %v747_v39, %v747_v39 }
 0x230   : > { %948 = vst.msk [vmem:[#allocation2 + $0x24] sm:$0xf] %vm360_vm0, %v809_v41 }
 0x231   : > { %951 = vst [vmem:[#allocation2 + $0x28] sm:$0x1] %v950_v42  ;;  %v812_v1 = vshrl.u32 %v763_v43, 16  ;;  %v815_v44 = vshll.u32 %v763_v43, 16 }
 0x232   : > { %v715_v45 = vpop.f32.mrf.mxu0 }
 0x233   : > { %v814_v47 = vrot.slane %v812_v1, 7  ;;  %v716_v48 = vadd.f32 %v715_v45, %v3920_v30  ;;  %v959_v45 = vld [vmem:[#allocation2 + $0x40] sm:$0xf] }
 0x235   : > { %v817_v50 = vor.u32 %v815_v44, %v814_v47  ;;  %v748_v52 = vmax.f32 %v716_v48, 0.0  ;;  %v818_v25 = vrot.slane %v814_v47, 4 }
 0x237   : > { %v953_v56 = vsel %vm3826_vm5, %v817_v50, %v952_v49  ;;  %v764_v57 = vpack.c.bf16 %v748_v52, %v748_v52  ;;  %v3975_v58 = vld [vmem:[#allocation2 + $0x20] sm:$0xff] }
 0x238   : > { %954 = vst [vmem:[#allocation2 + $0x30] sm:$0xf] %v953_v56  ;;  %v3977_v61 = vld [vmem:[#allocation2 + $0x28] sm:$0xff]  ;;  %3187 = vmatmul.msk.bf16.gmra.mxu2 %vm665_vm15, %v3967_v46  ;;  %v1151_v63 = vshll.u32 %v3975_v58, 16  ;;  %v1155_v24 = vshrl.u32 %v3975_v58, 16 }
 0x239   : > { %v820_v62 = vshrl.u32 %v764_v57, 16  ;;  %v823_v12 = vshll.u32 %v764_v57, 16  ;;  %v1159_v15 = vshll.u32 %v3977_v61, 16  ;;  %v1163_v60 = vshrl.u32 %v3977_v61, 16 }
 0x23a   : > { %v718_v0 = vpop.f32.mrf.mxu0  ;;  %v1153_v22 = vrot.slane %v1151_v63, 1 }
 0x23b   : > { %v822_v18 = vrot.slane %v820_v62, 7  ;;  %v719_v19 = vadd.f32 %v718_v0, %v3920_v30  ;;  %v1161_v28 = vrot.slane %v1159_v15, 1  ;;  %v963_v15 = vld [vmem:[#allocation2 + $0x48] sm:$0x1] }
 0x23c   : > { %v1157_v36 = vor.u32 %v1155_v24, %v1153_v22  ;;  %v4013_v16 = vsel %vm1118_vm1, %v1149_v59, %v1153_v22 }
 0x23d   : > { %v825_v32 = vor.u32 %v823_v12, %v822_v18  ;;  %v827_v33 = vrot.slane %v822_v18, 4  ;;  %v749_v35 = vmax.f32 %v719_v19, 0.0  ;;  %3170 = vmatmul.msk.bf16.gmra.mxu0 %vm665_vm15, %v3986_v27 }
 0x23e   : > { %v3996_v40 = vsel %vm1118_vm1, %v1157_v36, %v1161_v28 }
 0x23f   : > { %v826_v37 = vsel %vm3930_vm6, %v818_v25, %v825_v32  ;;  %v957_v38 = vsel %vm3799_vm3, %v827_v33, %v956_v26  ;;  %v765_v39 = vpack.c.bf16 %v749_v35, %v749_v35  ;;  %3172 = vmatmul.msk.bf16.vlgmr.msra.gmra.mxu1 %vm665_vm15, %v3996_v40  ;;  %v1165_v25 = vor.u32 %v1163_v60, %v1161_v28 }
 0x240   : > { %955 = vst.msk [vmem:[#allocation2 + $0x34] sm:$0xf] %vm360_vm0, %v826_v37  ;;  %v966_v37 = vld [vmem:[#allocation2 + $0x50] sm:$0xf] }
 0x241   : > { %958 = vst [vmem:[#allocation2 + $0x38] sm:$0x1] %v957_v38  ;;  %v829_v41 = vshrl.u32 %v765_v39, 16  ;;  %v832_v42 = vshll.u32 %v765_v39, 16 }
 0x242   : > { %v720_v43 = vpop.f32.mrf.mxu0 }
 0x243   : > { %v831_v1 = vrot.slane %v829_v41, 7  ;;  %v721_v44 = vadd.f32 %v720_v43, %v3920_v30 }
 0x245   : > { %v834_v47 = vor.u32 %v832_v42, %v831_v1  ;;  %v750_v48 = vmax.f32 %v721_v44, 0.0  ;;  %v835_v62 = vrot.slane %v831_v1, 4 }
 0x247   : > { %v960_v49 = vsel %vm3826_vm5, %v834_v47, %v959_v45  ;;  %v766_v50 = vpack.c.bf16 %v750_v48, %v750_v48  ;;  %v4004_v52 = vld [vmem:[#allocation2 + $0x30] sm:$0xff] }
 0x248   : > { %961 = vst [vmem:[#allocation2 + $0x40] sm:$0xf] %v960_v49  ;;  %3188 = vmatmul.msk.bf16.gmra.mxu2 %vm665_vm15, %v3975_v58  ;;  %v1167_v56 = vshll.u32 %v4004_v52, 16  ;;  %v4028_v41 = vld [vmem:[#allocation2 + $0x38] sm:$0xff]  ;;  %v1171_v45 = vshrl.u32 %v4004_v52, 16 }
 0x249   : > { %v837_v54 = vshrl.u32 %v766_v50, 16  ;;  %v840_v55 = vshll.u32 %v766_v50, 16  ;;  %v1175_v47 = vshll.u32 %v4028_v41, 16 }
 0x24a   : > { %v723_v57 = vpop.f32.mrf.mxu0  ;;  %v1169_v0 = vrot.slane %v1167_v56, 1 }
 0x24b   : > { %v839_v63 = vrot.slane %v837_v54, 7  ;;  %v724_v12 = vadd.f32 %v723_v57, %v3920_v30  ;;  %v1177_v60 = vrot.slane %v1175_v47, 1 }
 0x24c   : > { %v4022_v32 = vsel %vm1118_vm1, %v1165_v25, %v1169_v0  ;;  %v1173_v54 = vor.u32 %v1171_v45, %v1169_v0  ;;  %v977_v45 = vld [vmem:[#allocation2 + $0x68] sm:$0x1] }
 0x24d   : > { %v842_v18 = vor.u32 %v840_v55, %v839_v63  ;;  %v844_v19 = vrot.slane %v839_v63, 4  ;;  %v751_v24 = vmax.f32 %v724_v12, 0.0  ;;  %3171 = vmatmul.msk.bf16.gmra.mxu0 %vm665_vm15, %v4013_v16  ;;  %v970_v55 = vld [vmem:[#allocation2 + $0x58] sm:$0x1] }
 0x24f   : > { %v843_v14 = vsel %vm3930_vm6, %v835_v62, %v842_v18  ;;  %v964_v26 = vsel %vm3799_vm3, %v844_v19, %v963_v15  ;;  %v767_v31 = vpack.c.bf16 %v751_v24, %v751_v24  ;;  %3173 = vmatmul.msk.bf16.gmra.mxu1 %vm665_vm15, %v4022_v32  ;;  %v4044_v15 = vsel %vm1118_vm1, %v1173_v54, %v1177_v60 }
 0x250   : > { %962 = vst.msk [vmem:[#allocation2 + $0x44] sm:$0xf] %vm360_vm0, %v843_v14 }
 0x251   : > { %965 = vst [vmem:[#allocation2 + $0x48] sm:$0x1] %v964_v26  ;;  %v846_v22 = vshrl.u32 %v767_v31, 16  ;;  %v849_v28 = vshll.u32 %v767_v31, 16  ;;  %v973_v26 = vld [vmem:[#allocation2 + $0x60] sm:$0xf] }
 0x252   : > { %v725_v33 = vpop.f32.mrf.mxu0 }
 0x253   : > { %v848_v35 = vrot.slane %v846_v22, 7  ;;  %v726_v36 = vadd.f32 %v725_v33, %v3920_v30 }
 0x255   : > { %v851_v38 = vor.u32 %v849_v28, %v848_v35  ;;  %v752_v39 = vmax.f32 %v726_v36, 0.0  ;;  %v852_v49 = vrot.slane %v848_v35, 4 }
 0x257   : > { %v967_v42 = vsel %vm3826_vm5, %v851_v38, %v966_v37  ;;  %v768_v43 = vpack.c.bf16 %v752_v39, %v752_v39  ;;  %v4050_v14 = vld [vmem:[#allocation2 + $0x40] sm:$0xff]  ;;  %v1179_v38 = vshrl.u32 %v4028_v41, 16 }
 0x258   : > { %968 = vst [vmem:[#allocation2 + $0x50] sm:$0xf] %v967_v42  ;;  %3189 = vmatmul.msk.bf16.gmra.mxu2 %vm665_vm15, %v3977_v61  ;;  %v1183_v35 = vshll.u32 %v4050_v14, 16 }
 0x259   : > { %v854_v1 = vshrl.u32 %v768_v43, 16  ;;  %v857_v44 = vshll.u32 %v768_v43, 16 }
 0x25a   : > { %v728_v48 = vpop.f32.mrf.mxu0 }
 0x25b   : > { %v856_v50 = vrot.slane %v854_v1, 7  ;;  %v729_v53 = vadd.f32 %v728_v48, %v3920_v30  ;;  %v1185_v1 = vrot.slane %v1183_v35, 1 }
 0x25d   : > { %v859_v56 = vor.u32 %v857_v44, %v856_v50  ;;  %v861_v57 = vrot.slane %v856_v50, 4  ;;  %v753_v59 = vmax.f32 %v729_v53, 0.0  ;;  %3220 = vmatmul.msk.bf16.vlgmr.msra.gmra.mxu0 %vm665_vm15, %v3943_v20 }
 0x25f   : > { %v860_v62 = vsel %vm3930_vm6, %v852_v49, %v859_v56  ;;  %v971_v63 = vsel %vm3799_vm3, %v861_v57, %v970_v55  ;;  %v769_v12 = vpack.c.bf16 %v753_v59, %v753_v59  ;;  %3174 = vmatmul.msk.bf16.gmra.mxu1 %vm665_vm15, %v4044_v15  ;;  %v1181_v49 = vor.u32 %v1179_v38, %v1177_v60  ;;  %v4071_v60 = vld [vmem:[#allocation2 + $0x48] sm:$0xff] }
 0x260   : > { %969 = vst.msk [vmem:[#allocation2 + $0x54] sm:$0xf] %vm360_vm0, %v860_v62 }
 0x261   : > { %972 = vst [vmem:[#allocation2 + $0x58] sm:$0x1] %v971_v63  ;;  %v863_v0 = vshrl.u32 %v769_v12, 16  ;;  %v866_v18 = vshll.u32 %v769_v12, 16  ;;  %v4066_v55 = vsel %vm1118_vm1, %v1181_v49, %v1185_v1 }
 0x262   : > { %v730_v19 = vpop.f32.mrf.mxu0 }
 0x263   : > { %v865_v24 = vrot.slane %v863_v0, 7  ;;  %v731_v25 = vadd.f32 %v730_v19, %v3920_v30  ;;  %v980_v0 = vld [vmem:[#allocation2 + $0x70] sm:$0xf] }
 0x265   : > { %v868_v31 = vor.u32 %v866_v18, %v865_v24  ;;  %v754_v22 = vmax.f32 %v731_v25, 0.0  ;;  %v869_v42 = vrot.slane %v865_v24, 4  ;;  %v1191_v24 = vshll.u32 %v4071_v60, 16 }
 0x267   : > { %v974_v28 = vsel %vm3826_vm5, %v868_v31, %v973_v26  ;;  %v770_v33 = vpack.c.bf16 %v754_v22, %v754_v22  ;;  %v1187_v31 = vshrl.u32 %v4050_v14, 16  ;;  %v1193_v35 = vrot.slane %v1191_v24, 1 }
 0x268   : > { %975 = vst [vmem:[#allocation2 + $0x60] sm:$0xf] %v974_v28  ;;  %3190 = vmatmul.msk.bf16.gmra.mxu2 %vm665_vm15, %v4004_v52 }
 0x269   : > { %v871_v36 = vshrl.u32 %v770_v33, 16  ;;  %v874_v37 = vshll.u32 %v770_v33, 16  ;;  %v1189_v38 = vor.u32 %v1187_v31, %v1185_v1 }
 0x26a   : > { %v733_v39 = vpop.f32.mrf.mxu0 }
 0x26b   : > { %v873_v43 = vrot.slane %v871_v36, 7  ;;  %v734_v44 = vadd.f32 %v733_v39, %v3920_v30 }
 0x26d   : > { %v876_v47 = vor.u32 %v874_v37, %v873_v43  ;;  %v878_v48 = vrot.slane %v873_v43, 4  ;;  %v755_v50 = vmax.f32 %v734_v44, 0.0  ;;  %3221 = vmatmul.msk.bf16.gmra.mxu0 %vm665_vm15, %v3967_v46  ;;  %v984_v43 = vld [vmem:[#allocation2 + $0x78] sm:$0x1] }
 0x26f   : > { %v877_v53 = vsel %vm3930_vm6, %v869_v42, %v876_v47  ;;  %v978_v54 = vsel %vm3799_vm3, %v878_v48, %v977_v45  ;;  %v771_v56 = vpack.c.bf16 %v755_v50, %v755_v50  ;;  %3175 = vmatmul.msk.bf16.gmra.mxu1 %vm665_vm15, %v4066_v55  ;;  %v4088_v48 = vsel %vm1118_vm1, %v1189_v38, %v1193_v35 }
 0x270   : > { %976 = vst.msk [vmem:[#allocation2 + $0x64] sm:$0xf] %vm360_vm0, %v877_v53 }
 0x271   : > { %979 = vst [vmem:[#allocation2 + $0x68] sm:$0x1] %v978_v54  ;;  %v880_v57 = vshrl.u32 %v771_v56, 16  ;;  %v883_v59 = vshll.u32 %v771_v56, 16 }
 0x272   : > { %v735_v62 = vpop.f32.mrf.mxu0 }
 0x273   : > { %v882_v63 = vrot.slane %v880_v57, 7  ;;  %v736_v12 = vadd.f32 %v735_v62, %v3920_v30 }
 0x275   : > { %v885_v18 = vor.u32 %v883_v59, %v882_v63  ;;  %v756_v19 = vmax.f32 %v736_v12, 0.0  ;;  %v886_v37 = vrot.slane %v882_v63, 4  ;;  %v4097_v59 = vld [vmem:[#allocation2 + $0x50] sm:$0xff]  ;;  %v987_v63 = vld [vmem:[#allocation2 + $0x80] sm:$0xf]  ;;  %v1439_v12 = vpop.f32.mrf.mxu2 }
 0x276   : > { %5337 = vst [vmem:[#allocation13_spill] sm:$0xff] %v4097_v59  ;;  %v1203_v51 = vshrl.u32 %v4097_v59, 16 }
 0x277   : > { %v981_v25 = vsel %vm3826_vm5, %v885_v18, %v980_v0  ;;  %v4077_v26 = vld [vmem:[#allocation2 + $0x60] sm:$0xff]  ;;  %v772_v22 = vpack.c.bf16 %v756_v19, %v756_v19 }
 0x278   : > { %982 = vst [vmem:[#allocation2 + $0x70] sm:$0xf] %v981_v25  ;;  %3191 = vmatmul.msk.bf16.gmra.mxu2 %vm665_vm15, %v4028_v41  ;;  %3196 = vmatmul.msk.bf16.vlgmr.msra.gmra.mxu3 %vm665_vm15, %v4077_v26  ;;  %v4100_v0 = vld [vmem:[#allocation2 + $0x68] sm:$0xff]  ;;  %v1199_v25 = vshll.u32 %v4097_v59, 16 }
 0x279   : > { %v888_v28 = vshrl.u32 %v772_v22, 16  ;;  %v891_v33 = vshll.u32 %v772_v22, 16 }
 0x27a   : > { %v738_v36 = vpop.f32.mrf.mxu0 }
 0x27b   : > { %v890_v39 = vrot.slane %v888_v28, 7  ;;  %v739_v42 = vadd.f32 %v738_v36, %v3920_v30 }
 0x27d   : > { %v893_v44 = vor.u32 %v891_v33, %v890_v39  ;;  %v895_v45 = vrot.slane %v890_v39, 4  ;;  %v757_v47 = vmax.f32 %v739_v42, 0.0  ;;  %3222 = vmatmul.msk.bf16.gmra.mxu0 %vm665_vm15, %v3975_v58  ;;  %v991_v39 = vld [vmem:[#allocation2 + $0x88] sm:$0x1] }
 0x27f   : > { %v894_v49 = vsel %vm3930_vm6, %v886_v37, %v893_v44  ;;  %v985_v50 = vsel %vm3799_vm3, %v895_v45, %v984_v43  ;;  %v773_v1 = vpack.c.bf16 %v757_v47, %v757_v47  ;;  %3176 = vmatmul.msk.bf16.gmra.mxu1 %vm665_vm15, %v4088_v48  ;;  %v1201_v37 = vrot.slane %v1199_v25, 1  ;;  %v4114_v45 = vpop.f32.mrf.mxu2 }
 0x280   : > { %983 = vst.msk [vmem:[#allocation2 + $0x74] sm:$0xf] %vm360_vm0, %v894_v49 }
 0x281   : > { %986 = vst [vmem:[#allocation2 + $0x78] sm:$0x1] %v985_v50  ;;  %v897_v53 = vshrl.u32 %v773_v1, 16  ;;  %v900_v54 = vshll.u32 %v773_v1, 16  ;;  %v1602_v1 = vsel %vm690_vm14, %v3734_v3, 0 }
 0x282   : > { %v740_v56 = vpop.f32.mrf.mxu0  ;;  %1611 = vmatpush.bf16.msrb.mxu3 %v1602_v1 }
 0x283   : > { %v899_v57 = vrot.slane %v897_v53, 7  ;;  %v741_v62 = vadd.f32 %v740_v56, %v3920_v30  ;;  %v1195_v30 = vshrl.u32 %v4071_v60, 16  ;;  %v1205_v56 = vor.u32 %v1203_v51, %v1201_v37 }
 0x285   : > { %v902_v18 = vor.u32 %v900_v54, %v899_v57  ;;  %v758_v19 = vmax.f32 %v741_v62, 0.0  ;;  %v903_v36 = vrot.slane %v899_v57, 4  ;;  %v1197_v42 = vor.u32 %v1195_v30, %v1193_v35  ;;  %v4126_v35 = vld [vmem:[#allocation2 + $0x58] sm:$0xff] }
 0x286   : > { %5338 = vst [vmem:[#allocation14_spill] sm:$0xff] %v4126_v35  ;;  %v1207_v54 = vshll.u32 %v4126_v35, 16  ;;  %v2029_v62 = vunpack.c.l.b16 %v3739_v4  ;;  %v1215_v30 = vshll.u32 %v4077_v26, 16 }
 0x287   : > { %v988_v24 = vsel %vm3826_vm5, %v902_v18, %v987_v63  ;;  %v774_v31 = vpack.c.bf16 %v758_v19, %v758_v19  ;;  %v4117_v47 = vsel %vm1118_vm1, %v1197_v42, %v1201_v37  ;;  %v4130_v53 = vld [vmem:[#allocation2 + $0x70] sm:$0xff]  ;;  %v1444_v13 = vpop.f32.mrf.mxu2 }
 0x288   : > { %989 = vst [vmem:[#allocation2 + $0x80] sm:$0xf] %v988_v24  ;;  %3192 = vmatmul.msk.bf16.gmra.mxu2 %vm665_vm15, %v4050_v14  ;;  %3197 = vmatmul.msk.bf16.gmra.mxu3 %vm665_vm15, %v4100_v0  ;;  %v1209_v57 = vrot.slane %v1207_v54, 1  ;;  %v2030_v18 = vpack.c.b16 %v2029_v62, %v2029_v62  ;;  %v4148_v24 = vld [vmem:[#allocation2 + $0x78] sm:$0xff] }
 0x289   : > { %v905_v22 = vshrl.u32 %v774_v31, 16  ;;  %v908_v28 = vshll.u32 %v774_v31, 16  ;;  %v1211_v31 = vshrl.u32 %v4126_v35, 16 }
 0x28a   : > { %v1315_v33 = vpop.f32.mrf.mxu0  ;;  %v4141_v3 = vsel %vm1118_vm1, %v1205_v56, %v1209_v57  ;;  %v2031_v19 = vrot.slane %v2030_v18, 2 }
 0x28b   : > { %v907_v38 = vrot.slane %v905_v22, 7  ;;  %v4110_v34 = vadd.f32 %v1439_v12, %v1315_v33  ;;  %v1213_v22 = vor.u32 %v1211_v31, %v1209_v57 }
 0x28c   : > { %v2042_v25 = vsel %vm690_vm14, %v2031_v19, 0  ;;  %v1227_v19 = vshrl.u32 %v4100_v0, 16 }
 0x28d   : > { %v910_v43 = vor.u32 %v908_v28, %v907_v38  ;;  %v912_v44 = vrot.slane %v907_v38, 4  ;;  %3223 = vmatmul.msk.bf16.gmra.mxu0 %vm665_vm15, %v3977_v61  ;;  %2051 = vmatpush.bf16.msrb.mxu2 %v2042_v25  ;;  %v1217_v28 = vrot.slane %v1215_v30, 1  ;;  %v1520_v38 = vrot.slane %v3902_v17, 1 }
 0x28e   : > { %v1231_v25 = vshll.u32 %v4130_v53, 16 }
 0x28f   : > { %v911_v49 = vsel %vm3930_vm6, %v903_v36, %v910_v43  ;;  %v992_v50 = vsel %vm3799_vm3, %v912_v44, %v991_v39  ;;  %3177 = vmatmul.msk.bf16.gmra.mxu1 %vm665_vm15, %v4117_v47  ;;  %v1446_v12 = vpop.f32.mrf.mxu2  ;;  %v4162_v37 = vsel %vm1118_vm1, %v1213_v22, %v1217_v28  ;;  %v1522_v44 = vsel %vm1519_vm2, %v1520_v38, %v1521_v23 }
 0x290   : > { %990 = vst.msk [vmem:[#allocation2 + $0x84] sm:$0xf] %vm360_vm0, %v911_v49  ;;  %v1219_v49 = vshrl.u32 %v4077_v26, 16  ;;  %v1233_v22 = vrot.slane %v1231_v25, 1  ;;  %v2326_v25 = vunpack.c.l.b16 %v3744_v5  ;;  %vm2914_vm0 = vcmask 125952  }
 0x291   : > { %993 = vst [vmem:[#allocation2 + $0x88] sm:$0x1] %v992_v50  ;;  %v1223_v50 = vshll.u32 %v4100_v0, 16 }
 0x292   : > { %v4146_v63 = vpop.f32.mrf.mxu0  ;;  %v1221_v51 = vor.u32 %v1219_v49, %v1217_v28 }
 0x293   : > { %v1225_v17 = vrot.slane %v1223_v50, 1  ;;  %v2180_v50 = vsel %vm690_vm14, %v3744_v5, 0  ;;  %v1529_v5 = vrot.slane %v3977_v61, 1 }
 0x294   : > { %2189 = vmatpush.bf16.msra.mxu3 %v2180_v50 }
 0x295   : > { %v4182_v21 = vsel %vm1118_vm1, %v1221_v51, %v1225_v17  ;;  %v1239_v51 = vshll.u32 %v4148_v24, 16 }
 0x298   : > { %3193 = vmatmul.msk.bf16.gmra.mxu2 %vm665_vm15, %v4071_v60  ;;  %3198 = vmatmul.msk.bf16.gmra.mxu3 %vm665_vm15, %v4130_v53 }
 0x29d   : > { %3224 = vmatmul.msk.bf16.gmra.mxu0 %vm665_vm15, %v4004_v52 }
 0x29f   : > { %3178 = vmatmul.msk.bf16.gmra.mxu1 %vm665_vm15, %v4141_v3 }
 0x2a8   : > { %3194 = vmatmul.msk.bf16.gmra.mxu2 %vm665_vm15, %v4097_v59  ;;  %3199 = vmatmul.msk.bf16.gmra.mxu3 %vm665_vm15, %v4148_v24 }
 0x2aa   : > { %v1320_v4 = vpop.f32.mrf.mxu0 }
 0x2ab   : > { %v4157_v33 = vadd.f32 %v1444_v13, %v1320_v4  ;;  %v1449_v36 = vpop.f32.mrf.mxu2  ;;  %v1229_v4 = vor.u32 %v1227_v19, %v1225_v17 }
 0x2ad   : > { %3225 = vmatmul.msk.bf16.gmra.mxu0 %vm665_vm15, %v4028_v41  ;;  %v4204_v20 = vsel %vm1118_vm1, %v1229_v4, %v1233_v22  ;;  %v2478_v4 = vsel %vm690_vm14, %v3750_v6, 0 }
 0x2ae   : > { %2487 = vmatpush.bf16.msra.mxu1 %v2478_v4 }
 0x2af   : > { %3179 = vmatmul.msk.bf16.gmra.mxu1 %vm665_vm15, %v4162_v37 }
 0x2b2   : > { %v1322_v39 = vpop.f32.mrf.mxu0 }
 0x2b3   : > { %v4167_v42 = vadd.f32 %v1446_v12, %v1322_v39  ;;  %v1451_v43 = vpop.f32.mrf.mxu2  ;;  %v1525_v12 = vrot.slane %v3967_v46, 1 }
 0x2b5   : > { %v1526_v31 = vsel %vm1519_vm2, %v1523_v2, %v1525_v12 }
 0x2b8   : > { %3195 = vmatmul.msk.bf16.gmra.mxu2 %vm665_vm15, %v4126_v35  ;;  %3200 = vmatmul.msk.bf16.vlgmr.msrb.gmra.mxu3 %vm665_vm15, %v1522_v44 }
 0x2ba   : > { %v1325_v1 = vpop.f32.mrf.mxu0 }
 0x2bb   : > { %v4177_v54 = vadd.f32 %v1449_v36, %v1325_v1  ;;  %v1454_v13 = vpop.f32.mrf.mxu2  ;;  %v1235_v1 = vshrl.u32 %v4130_v53, 16 }
 0x2bc   : > { %v1335_v56 = vpop.f32.mrf.mxu1 }
 0x2bd   : > { %3226 = vmatmul.msk.bf16.gmra.mxu0 %vm665_vm15, %v4050_v14 }
 0x2bf   : > { %3180 = vmatmul.msk.bf16.gmra.mxu1 %vm665_vm15, %v4182_v21 }
 0x2c2   : > { %v1327_v23 = vpop.f32.mrf.mxu0 }
 0x2c3   : > { %v4186_v57 = vadd.f32 %v1451_v43, %v1327_v23  ;;  %v1456_v62 = vpop.f32.mrf.mxu2  ;;  %v1527_v43 = vrot.slane %v3975_v58, 1  ;;  %v1237_v58 = vor.u32 %v1235_v1, %v1233_v22 }
 0x2c4   : > { %v1337_v18 = vpop.f32.mrf.mxu1 }
 0x2c5   : > { %v1528_v17 = vsel %vm1519_vm2, %v1525_v12, %v1527_v43  ;;  %v4248_v6 = vsel %vm1519_vm2, %v1527_v43, %v1529_v5 }
 0x2c6   : > { %5340 = vst [vmem:[#allocation16_spill] sm:$0xff] %v4248_v6 }
 0x2c8   : > { %3201 = vmatmul.msk.bf16.gmra.mxu3 %vm665_vm15, %v3958_v29  ;;  %3252 = vmatmul.msk.bf16.vlgmr.msrb.gmra.mxu2 %vm665_vm15, %v1526_v31 }
 0x2ca   : > { %v1330_v30 = vpop.f32.mrf.mxu0 }
 0x2cb   : > { %v4197_v28 = vadd.f32 %v1454_v13, %v1330_v30  ;;  %v1459_v46 = vpop.f32.mrf.mxu2  ;;  %v2327_v30 = vpack.c.b16 %v2326_v25, %v2326_v25 }
 0x2cc   : > { %v4199_v36 = vadd.f32 %v1459_v46, %v1335_v56  ;;  %v1340_v38 = vpop.f32.mrf.mxu1  ;;  %v1241_v56 = vrot.slane %v1239_v51, 1  ;;  %v1243_v51 = vshrl.u32 %v4148_v24, 16 }
 0x2cd   : > { %3227 = vmatmul.msk.bf16.gmra.mxu0 %vm665_vm15, %v4071_v60  ;;  %v2328_v22 = vrot.slane %v2327_v30, 2 }
 0x2ce   : > { %v4230_v12 = vsel %vm1118_vm1, %v1237_v58, %v1241_v56  ;;  %v4255_v61 = vor.u32 %v1243_v51, %v1241_v56 }
 0x2cf   : > { %3181 = vmatmul.msk.bf16.gmra.mxu1 %vm665_vm15, %v4204_v20  ;;  %5339 = vst [vmem:[#allocation15_spill] sm:$0xff] %v4230_v12 }
 0x2d0   : > { %5341 = vst [vmem:[#allocation17_spill] sm:$0xff] %v4255_v61 }
 0x2d2   : > { %v1332_v2 = vpop.f32.mrf.mxu0 }
 0x2d3   : > { %v4208_v29 = vadd.f32 %v1456_v62, %v1332_v2  ;;  %v1461_v39 = vpop.f32.mrf.mxu2  ;;  %v4222_v62 = vld [vmem:[#allocation2 + $0x80] sm:$0xff]  }
 0x2d4   : > { %v4211_v44 = vadd.f32 %v1461_v39, %v1337_v18  ;;  %v1342_v49 = vpop.f32.mrf.mxu1  ;;  %v2339_v39 = vsel %vm690_vm14, %v2328_v22, 0  ;;  %v1531_v22 = vrot.slane %v4004_v52, 1 }
 0x2d5   : > { %2348 = vmatpush.bf16.msrb.mxu0 %v2339_v39 }
 0x2d8   : > { %3202 = vmatmul.msk.bf16.gmra.mxu3 %vm665_vm15, %v1526_v31  ;;  %3253 = vmatmul.msk.bf16.gmra.mxu2 %vm665_vm15, %v1528_v17  ;;  %v3387_v31 = vunpack.c.l.b16 %v4222_v62 }
 0x2da   : > { %v4220_v13 = vpop.f32.mrf.mxu0 }
 0x2db   : > { %v1464_v23 = vpop.f32.mrf.mxu2 }
 0x2dc   : > { %v4224_v18 = vadd.f32 %v1464_v23, %v1340_v38  ;;  %v1345_v19 = vpop.f32.mrf.mxu1  ;;  %v4239_v38 = vpack.c.b16 %v3387_v31, %v3387_v31 }
 0x2dd   : > { %3228 = vmatmul.msk.bf16.gmra.mxu0 %vm665_vm15, %v4097_v59 }
 0x2de   : > { %v1247_v58 = vshll.u32 %v4239_v38, 16 }
 0x2df   : > { %3182 = vmatmul.msk.bf16.gmra.mxu1 %vm665_vm15, %v4230_v12 }
 0x2e2   : > { %v4237_v46 = vpop.f32.mrf.mxu0 }
 0x2e3   : > { %v1466_v2 = vpop.f32.mrf.mxu2 }
 0x2e4   : > { %v4243_v50 = vadd.f32 %v1466_v2, %v1342_v49  ;;  %v1347_v1 = vpop.f32.mrf.mxu1  ;;  %v1249_v49 = vrot.slane %v1247_v58, 1 }
 0x2e6   : > { %v1250_v43 = vsel %vm1118_vm1, %v4255_v61, %v1249_v49 }
 0x2e8   : > { %3203 = vmatmul.msk.bf16.gmra.mxu3 %vm665_vm15, %v1528_v17  ;;  %3254 = vmatmul.msk.bf16.gmra.mxu2 %vm665_vm15, %v4248_v6 }
 0x2ea   : > { %v4253_v23 = vpop.f32.mrf.mxu0 }
 0x2eb   : > { %v1469_v25 = vpop.f32.mrf.mxu2 }
 0x2ec   : > { %v4257_v31 = vadd.f32 %v1469_v25, %v1345_v19  ;;  %v1350_v30 = vpop.f32.mrf.mxu1  ;;  %v4270_v19 = vsel %vm1519_vm2, %v1529_v5, %v1531_v22 }
 0x2ed   : > { %3229 = vmatmul.msk.bf16.gmra.mxu0 %vm665_vm15, %v4126_v35  ;;  %5342 = vst [vmem:[#allocation18_spill] sm:$0xff] %v4270_v19 }
 0x2ef   : > { %3183 = vmatmul.msk.bf16.gmra.mxu1 %vm665_vm15, %v1250_v43  ;;  %v1533_v43 = vrot.slane %v4028_v41, 1 }
 0x2f2   : > { %v4264_v17 = vpop.f32.mrf.mxu0 }
 0x2f3   : > { %v1471_v4 = vpop.f32.mrf.mxu2 }
 0x2f4   : > { %v4267_v56 = vadd.f32 %v1471_v4, %v1347_v1  ;;  %v1352_v2 = vpop.f32.mrf.mxu1 }
 0x2f8   : > { %3204 = vmatmul.msk.bf16.gmra.mxu3 %vm665_vm15, %v4248_v6  ;;  %3255 = vmatmul.msk.bf16.gmra.mxu2 %vm665_vm15, %v4270_v19 }
 0x2fa   : > { %v4276_v39 = vpop.f32.mrf.mxu0 }
 0x2fb   : > { %v1474_v51 = vpop.f32.mrf.mxu2  ;;  %v4278_v58 = vpop.f32.mrf.mxu3 }
 0x2fc   : > { %v4280_v49 = vadd.f32 %v1474_v51, %v1350_v30  ;;  %v1355_v52 = vpop.f32.mrf.mxu1  ;;  %v4294_v30 = vsel %vm1519_vm2, %v1531_v22, %v1533_v43 }
 0x2fd   : > { %3230 = vmatmul.msk.bf16.gmra.mxu0 %vm665_vm15, %v4077_v26  ;;  %5344 = vst [vmem:[#allocation20_spill] sm:$0xff] %v4294_v30 }
 0x2ff   : > { %3236 = vmatmul.msk.bf16.vlgmr.msrb.gmra.mxu1 %vm665_vm15, %v3986_v27 }
 0x302   : > { %v4286_v5 = vpop.f32.mrf.mxu0 }
 0x303   : > { %v1476_v1 = vpop.f32.mrf.mxu2  ;;  %v4288_v25 = vpop.f32.mrf.mxu3 }
 0x304   : > { %v4291_v4 = vadd.f32 %v1476_v1, %v1352_v2  ;;  %v1357_v11 = vpop.f32.mrf.mxu1  ;;  %v1535_v1 = vrot.slane %v4050_v14, 1 }
 0x306   : > { %5343 = vst [vmem:[#allocation19_spill] sm:$0xff] %v4291_v4 }
 0x308   : > { %3205 = vmatmul.msk.bf16.gmra.mxu3 %vm665_vm15, %v4270_v19  ;;  %3256 = vmatmul.msk.bf16.gmra.mxu2 %vm665_vm15, %v4294_v30 }
 0x30a   : > { %v4300_v27 = vpop.f32.mrf.mxu0 }
 0x30b   : > { %v1479_v51 = vpop.f32.mrf.mxu2  ;;  %v4302_v9 = vpop.f32.mrf.mxu3 }
 0x30c   : > { %v4304_v7 = vadd.f32 %v1479_v51, %v1355_v52  ;;  %v1360_v41 = vpop.f32.mrf.mxu1  ;;  %v4318_v52 = vsel %vm1519_vm2, %v1533_v43, %v1535_v1 }
 0x30d   : > { %3231 = vmatmul.msk.bf16.gmra.mxu0 %vm665_vm15, %v4100_v0  ;;  %5347 = vst [vmem:[#allocation23_spill] sm:$0xff] %v4318_v52 }
 0x30e   : > { %5345 = vst [vmem:[#allocation21_spill] sm:$0xff] %v4304_v7 }
 0x30f   : > { %3237 = vmatmul.msk.bf16.gmra.mxu1 %vm665_vm15, %v4013_v16 }
 0x312   : > { %v4313_v19 = vpop.f32.mrf.mxu0 }
 0x313   : > { %v1481_v22 = vpop.f32.mrf.mxu2  ;;  %v4310_v2 = vpop.f32.mrf.mxu3 }
 0x314   : > { %v4315_v6 = vadd.f32 %v1481_v22, %v1357_v11  ;;  %v1362_v10 = vpop.f32.mrf.mxu1 }
 0x316   : > { %5346 = vst [vmem:[#allocation22_spill] sm:$0xff] %v4315_v6 }
 0x318   : > { %3206 = vmatmul.msk.bf16.gmra.mxu3 %vm665_vm15, %v4294_v30  ;;  %3257 = vmatmul.msk.bf16.gmra.mxu2 %vm665_vm15, %v4318_v52  ;;  %v1537_v30 = vrot.slane %v4071_v60, 1 }
 0x31a   : > { %v4330_v11 = vpop.f32.mrf.mxu0 }
 0x31b   : > { %v1484_v16 = vpop.f32.mrf.mxu2  ;;  %v4324_v51 = vpop.f32.mrf.mxu3  ;;  %5349 = vst [vmem:[#allocation25_spill] sm:$0xff] %v4330_v11 }
 0x31c   : > { %v4326_v61 = vadd.f32 %v1484_v16, %v1360_v41  ;;  %v1365_v14 = vpop.f32.mrf.mxu1  ;;  %v4340_v41 = vsel %vm1519_vm2, %v1535_v1, %v1537_v30 }
 0x31d   : > { %3232 = vmatmul.msk.bf16.gmra.mxu0 %vm665_vm15, %v4130_v53  ;;  %5351 = vst [vmem:[#allocation27_spill] sm:$0xff] %v4340_v41 }
 0x31e   : > { %5348 = vst [vmem:[#allocation24_spill] sm:$0xff] %v4326_v61 }
 0x31f   : > { %3238 = vmatmul.msk.bf16.gmra.mxu1 %vm665_vm15, %v3996_v40 }
 0x322   : > { %v4342_v16 = vpop.f32.mrf.mxu0 }
 0x323   : > { %v1486_v43 = vpop.f32.mrf.mxu2  ;;  %v4334_v22 = vpop.f32.mrf.mxu3  ;;  %5352 = vst [vmem:[#allocation28_spill] sm:$0xff] %v4342_v16 }
 0x324   : > { %v4337_v6 = vadd.f32 %v1486_v43, %v1362_v10  ;;  %v1367_v12 = vpop.f32.mrf.mxu1 }
 0x326   : > { %5350 = vst [vmem:[#allocation26_spill] sm:$0xff] %v4337_v6 }
 0x328   : > { %3207 = vmatmul.msk.bf16.gmra.mxu3 %vm665_vm15, %v4318_v52  ;;  %3258 = vmatmul.msk.bf16.gmra.mxu2 %vm665_vm15, %v4340_v41  ;;  %v1539_v52 = vrot.slane %v4097_v59, 1 }
 0x32a   : > { %v4356_v10 = vpop.f32.mrf.mxu0 }
 0x32b   : > { %v1489_v61 = vpop.f32.mrf.mxu2  ;;  %v4348_v7 = vpop.f32.mrf.mxu3  ;;  %5354 = vst [vmem:[#allocation30_spill] sm:$0xff] %v4356_v10 }
 0x32c   : > { %v4350_v11 = vadd.f32 %v1489_v61, %v1365_v14  ;;  %v1370_v60 = vpop.f32.mrf.mxu1  ;;  %v4364_v61 = vsel %vm1519_vm2, %v1537_v30, %v1539_v52 }
 0x32d   : > { %3233 = vmatmul.msk.bf16.gmra.mxu0 %vm665_vm15, %v4148_v24  ;;  %5356 = vst [vmem:[#allocation32_spill] sm:$0xff] %v4364_v61 }
 0x32e   : > { %5353 = vst [vmem:[#allocation29_spill] sm:$0xff] %v4350_v11 }
 0x32f   : > { %3239 = vmatmul.msk.bf16.gmra.mxu1 %vm665_vm15, %v4022_v32 }
 0x332   : > { %v4370_v10 = vpop.f32.mrf.mxu0 }
 0x333   : > { %v1491_v1 = vpop.f32.mrf.mxu2  ;;  %v4358_v43 = vpop.f32.mrf.mxu3 }
 0x334   : > { %v4361_v6 = vadd.f32 %v1491_v1, %v1367_v12  ;;  %v1372_v16 = vpop.f32.mrf.mxu1 }
 0x336   : > { %5355 = vst [vmem:[#allocation31_spill] sm:$0xff] %v4361_v6  ;;  %v1541_v6 = vrot.slane %v4126_v35, 1 }
 0x338   : > { %3208 = vmatmul.msk.bf16.gmra.mxu3 %vm665_vm15, %v4340_v41  ;;  %3259 = vmatmul.msk.bf16.gmra.mxu2 %vm665_vm15, %v4364_v61 }
 0x33b   : > { %v1494_v14 = vpop.f32.mrf.mxu2  ;;  %v1613_v11 = vpop.f32.mrf.mxu3 }
 0x33c   : > { %v4372_v4 = vadd.f32 %v1494_v14, %v1370_v60  ;;  %v4375_v59 = vadd.f32 %v1613_v11, %v4110_v34  ;;  %v1375_v12 = vpop.f32.mrf.mxu1  ;;  %v4392_v11 = vpop.f32.mrf.mxu0 }
 0x33d   : > { %v4378_v1 = vadd.f32 %v4278_v58, %v1375_v12  ;;  %3234 = vmatmul.msk.bf16.gmra.mxu0 %vm665_vm15, %v4222_v62  ;;  %v4395_v58 = vsel %vm1519_vm2, %v1539_v52, %v1541_v6 }
 0x33e   : > { %5360 = vst [vmem:[#allocation36_spill] sm:$0xff] %v4395_v58 }
 0x33f   : > { %5357 = vst [vmem:[#allocation33_spill] sm:$0xff] %v4378_v1  ;;  %3240 = vmatmul.msk.bf16.gmra.mxu1 %vm665_vm15, %v4044_v15 }
 0x343   : > { %v1496_v30 = vpop.f32.mrf.mxu2  ;;  %v4384_v41 = vpop.f32.mrf.mxu3 }
 0x344   : > { %v4387_v60 = vadd.f32 %v1496_v30, %v1372_v16  ;;  %v1377_v14 = vpop.f32.mrf.mxu1  ;;  %v4403_v16 = vld [vmem:[#allocation2 + $0x88] sm:$0xff]  ;;  %v4415_v52 = vpop.f32.mrf.mxu0 }
 0x345   : > { %v4390_v34 = vadd.f32 %v4288_v25, %v1377_v14 }
 0x346   : > { %5358 = vst [vmem:[#allocation34_spill] sm:$0xff] %v4387_v60 }
 0x347   : > { %5359 = vst [vmem:[#allocation35_spill] sm:$0xff] %v4390_v34  ;;  %v1543_v34 = vrot.slane %v4077_v26, 1 }
 0x348   : > { %3209 = vmatmul.msk.bf16.gmra.mxu3 %vm665_vm15, %v4364_v61  ;;  %3260 = vmatmul.msk.bf16.gmra.mxu2 %vm665_vm15, %v4395_v58 }
 0x34b   : > { %v1618_v12 = vpop.f32.mrf.mxu3  ;;  %v4401_v1 = vpop.f32.mrf.mxu2 }
 0x34c   : > { %v4406_v30 = vadd.f32 %v1618_v12, %v4157_v33  ;;  %v1380_v25 = vpop.f32.mrf.mxu1 }
 0x34d   : > { %v4409_v14 = vadd.f32 %v4302_v9, %v1380_v25  ;;  %3235 = vmatmul.msk.bf16.gmra.mxu0 %vm665_vm15, %v4403_v16  ;;  %v4427_v25 = vsel %vm1519_vm2, %v1541_v6, %v1543_v34 }
 0x34e   : > { %5363 = vst [vmem:[#allocation39_spill] sm:$0xff] %v4427_v25 }
 0x34f   : > { %5361 = vst [vmem:[#allocation37_spill] sm:$0xff] %v4409_v14  ;;  %3241 = vmatmul.msk.bf16.gmra.mxu1 %vm665_vm15, %v4066_v55  ;;  %v4433_v14 = vpop.f32.mrf.mxu0 }
 0x353   : > { %v1620_v61 = vpop.f32.mrf.mxu3  ;;  %v4417_v35 = vpop.f32.mrf.mxu2 }
 0x354   : > { %v4421_v33 = vadd.f32 %v1620_v61, %v4167_v42  ;;  %v1382_v12 = vpop.f32.mrf.mxu1 }
 0x355   : > { %v4424_v9 = vadd.f32 %v4310_v2, %v1382_v12 }
 0x357   : > { %5362 = vst [vmem:[#allocation38_spill] sm:$0xff] %v4424_v9 }
 0x358   : > { %3210 = vmatmul.msk.bf16.gmra.mxu3 %vm665_vm15, %v4395_v58  ;;  %3261 = vmatmul.msk.bf16.gmra.mxu2 %vm665_vm15, %v4427_v25  ;;  %v1545_v58 = vrot.slane %v4100_v0, 1 }
 0x35b   : > { %v1623_v60 = vpop.f32.mrf.mxu3  ;;  %v4435_v26 = vpop.f32.mrf.mxu2 }
 0x35c   : > { %v4438_v42 = vadd.f32 %v1623_v60, %v4177_v54  ;;  %v1385_v61 = vpop.f32.mrf.mxu1  ;;  %v4453_v60 = vpop.f32.mrf.mxu0 }
 0x35d   : > { %v4441_v2 = vadd.f32 %v4324_v51, %v1385_v61  ;;  %3288 = vmatmul.msk.bf16.vlgmr.msrb.gmra.mxu0 %vm665_vm15, %v3996_v40  ;;  %v4459_v61 = vsel %vm1519_vm2, %v1543_v34, %v1545_v58 }
 0x35e   : > { %5365 = vst [vmem:[#allocation41_spill] sm:$0xff] %v4459_v61 }
 0x35f   : > { %5364 = vst [vmem:[#allocation40_spill] sm:$0xff] %v4441_v2  ;;  %3242 = vmatmul.msk.bf16.gmra.mxu1 %vm665_vm15, %v4088_v48 }
 0x363   : > { %v1625_v6 = vpop.f32.mrf.mxu3  ;;  %v4447_v12 = vpop.f32.mrf.mxu2 }
 0x364   : > { %v4451_v9 = vadd.f32 %v1625_v6, %v4186_v57  ;;  %v1387_v54 = vpop.f32.mrf.mxu1  ;;  %v4477_v34 = vpop.f32.mrf.mxu0 }
 0x365   : > { %v4456_v51 = vadd.f32 %v4334_v22, %v1387_v54  ;;  %v2736_v22 = vsel %vm690_vm14, %v3760_v8, 0 }
 0x366   : > { %2745 = vmatpush.bf16.msra.mxu2 %v2736_v22 }
 0x368   : > { %3211 = vmatmul.msk.bf16.gmra.mxu3 %vm665_vm15, %v4427_v25  ;;  %3262 = vmatmul.msk.bf16.gmra.mxu2 %vm665_vm15, %v4459_v61 }
 0x36b   : > { %v1628_v40 = vpop.f32.mrf.mxu3  ;;  %v4465_v0 = vpop.f32.mrf.mxu2 }
 0x36c   : > { %v4468_v57 = vadd.f32 %v1628_v40, %v4197_v28  ;;  %v1390_v6 = vpop.f32.mrf.mxu1  ;;  %v1547_v28 = vrot.slane %v4130_v53, 1  ;;  %v4497_v22 = vpop.f32.mrf.mxu0 }
 0x36d   : > { %v4471_v2 = vadd.f32 %v4348_v7, %v1390_v6  ;;  %3289 = vmatmul.msk.bf16.gmra.mxu0 %vm665_vm15, %v4022_v32 }
 0x36e   : > { %v4491_v8 = vsel %vm1519_vm2, %v1545_v58, %v1547_v28  ;;  %v1442_v58 = vadd.f32 %v4114_v45, %v4146_v63  ;;  %v1549_v45 = vrot.slane %v4148_v24, 1 }
 0x36f   : > { %3243 = vmatmul.msk.bf16.gmra.mxu1 %vm665_vm15, %v4117_v47 }
 0x370   : > { %v1694_v25 = vadd.f32 %v4384_v41, %v1442_v58  ;;  %v4524_v41 = vsel %vm1519_vm2, %v1547_v28, %v1549_v45 }
 0x373   : > { %v1630_v54 = vpop.f32.mrf.mxu3  ;;  %v4485_v7 = vpop.f32.mrf.mxu2 }
 0x374   : > { %v4483_v40 = vadd.f32 %v1630_v54, %v4208_v29  ;;  %v1392_v6 = vpop.f32.mrf.mxu1  ;;  %v1835_v29 = vadd.f32 %v4220_v13, %v4375_v59 }
 0x375   : > { %v4488_v32 = vadd.f32 %v4358_v43, %v1392_v6 }
 0x378   : > { %3212 = vmatmul.msk.bf16.gmra.mxu3 %vm665_vm15, %v4459_v61  ;;  %3263 = vmatmul.msk.bf16.gmra.mxu2 %vm665_vm15, %v4491_v8 }
 0x37b   : > { %v1633_v53 = vpop.f32.mrf.mxu3  ;;  %v4508_v61 = vpop.f32.mrf.mxu2 }
 0x37c   : > { %v4502_v54 = vadd.f32 %v1633_v53, %v4199_v36  ;;  %v1910_v43 = vpop.f32.mrf.mxu1  ;;  %v4516_v36 = vpop.f32.mrf.mxu0  ;;  %v1836_v53 = vadd.f32 %v4237_v46, %v1694_v25 }
 0x37d   : > { %v1990_v6 = vadd.f32 %v1910_v43, %v1835_v29  ;;  %3290 = vmatmul.msk.bf16.gmra.mxu0 %vm665_vm15, %v4044_v15 }
 0x37f   : > { %3244 = vmatmul.msk.bf16.gmra.mxu1 %vm665_vm15, %v4141_v3  ;;  %v4514_v59 = vadd.f32 %v4401_v1, %v1990_v6 }
 0x383   : > { %v1635_v13 = vpop.f32.mrf.mxu3  ;;  %v4529_v1 = vpop.f32.mrf.mxu2 }
 0x384   : > { %v4521_v63 = vadd.f32 %v1635_v13, %v4211_v44  ;;  %v1912_v15 = vpop.f32.mrf.mxu1  ;;  %v1837_v44 = vadd.f32 %v4253_v23, %v4406_v30  ;;  %v4540_v28 = vpop.f32.mrf.mxu0  ;;  %v2022_v23 = vrot.slane %v4222_v62, 1 }
 0x385   : > { %v1991_v29 = vadd.f32 %v1912_v15, %v1836_v53 }
 0x387   : > { %v4527_v43 = vadd.f32 %v4417_v35, %v1991_v29  ;;  %v4560_v29 = vsel %vm1519_vm2, %v1549_v45, %v2022_v23 }
 0x388   : > { %3213 = vmatmul.msk.bf16.gmra.mxu3 %vm665_vm15, %v4491_v8  ;;  %3264 = vmatmul.msk.bf16.gmra.mxu2 %vm665_vm15, %v4524_v41  ;;  %5366 = vst [vmem:[#allocation42_spill] sm:$0xff] %v4560_v29 }
 0x38b   : > { %v1638_v24 = vpop.f32.mrf.mxu3  ;;  %v4549_v6 = vpop.f32.mrf.mxu2 }
 0x38c   : > { %v4538_v46 = vadd.f32 %v1638_v24, %v4224_v18  ;;  %v1915_v25 = vpop.f32.mrf.mxu1  ;;  %v1838_v18 = vadd.f32 %v4264_v17, %v4421_v33 }
 0x38d   : > { %v1992_v35 = vadd.f32 %v1915_v25, %v1837_v44  ;;  %3291 = vmatmul.msk.bf16.gmra.mxu0 %vm665_vm15, %v4066_v55  ;;  %v4557_v55 = vpop.f32.mrf.mxu0 }
 0x38f   : > { %3245 = vmatmul.msk.bf16.gmra.mxu1 %vm665_vm15, %v4162_v37  ;;  %v4547_v58 = vadd.f32 %v4435_v26, %v1992_v35 }
 0x393   : > { %v1640_v13 = vpop.f32.mrf.mxu3  ;;  %v4571_v33 = vpop.f32.mrf.mxu2 }
 0x394   : > { %v4555_v30 = vadd.f32 %v1640_v13, %v4243_v50  ;;  %v1917_v53 = vpop.f32.mrf.mxu1  ;;  %v1839_v50 = vadd.f32 %v4276_v39, %v4438_v42  ;;  %5367 = vst [vmem:[#allocation43_spill] sm:$0xff] %v4571_v33  ;;  %v1840_v39 = vadd.f32 %v4286_v5, %v4451_v9  ;;  %v4589_v42 = vrot.slane %v4403_v16, 1 }
 0x395   : > { %v1993_v15 = vadd.f32 %v1917_v53, %v1838_v18  ;;  %v4583_v35 = vpop.f32.mrf.mxu0  ;;  %v1841_v9 = vadd.f32 %v4300_v27, %v4468_v57 }
 0x396   : > { %5368 = vst [vmem:[#allocation44_spill] sm:$0xff] %v4589_v42 }
 0x397   : > { %v4563_v26 = vadd.f32 %v4447_v12, %v1993_v15 }
 0x398   : > { %3214 = vmatmul.msk.bf16.gmra.mxu3 %vm665_vm15, %v4524_v41  ;;  %3265 = vmatmul.msk.bf16.gmra.mxu2 %vm665_vm15, %v4560_v29 }
 0x39b   : > { %v1643_v17 = vpop.f32.mrf.mxu3  ;;  %v2078_v15 = vpop.f32.mrf.mxu2 }
 0x39c   : > { %v4574_v24 = vadd.f32 %v1643_v17, %v4257_v31  ;;  %v1920_v44 = vpop.f32.mrf.mxu1  ;;  %v1551_v31 = vrot.slane %v4239_v38, 1  ;;  %v4597_v17 = vsel %vm1519_vm2, %v2022_v23, %v4589_v42  ;;  %v4605_v38 = vld [vmem:[#allocation2 + $0x90] sm:$0xff]  }
 0x39d   : > { %v1994_v25 = vadd.f32 %v1920_v44, %v1839_v50  ;;  %3292 = vmatmul.msk.bf16.gmra.mxu0 %vm665_vm15, %v4088_v48  ;;  %5369 = vst [vmem:[#allocation45_spill] sm:$0xff] %v4597_v17 }
 0x39f   : > { %3246 = vmatmul.msk.bf16.gmra.mxu1 %vm665_vm15, %v4182_v21  ;;  %v4581_v12 = vadd.f32 %v4465_v0, %v1994_v25  ;;  %v1552_v0 = vsel %vm1519_vm2, %v1549_v45, %v1551_v31  ;;  %v3391_v45 = vunpack.c.l.b16 %v4605_v38  ;;  %v5371_v31 = vld [vmem:[#allocation19_spill] sm:$0xff] }
 0x3a1   : > { %v4619_v25 = vpack.c.b16 %v3391_v45, %v3391_v45  ;;  %v5372_v45 = vld [vmem:[#allocation25_spill] sm:$0xff] }
 0x3a3   : > { %v1645_v13 = vpop.f32.mrf.mxu3  ;;  %v2026_v57 = vrot.slane %v4619_v25, 1 }
 0x3a4   : > { %v4592_v18 = vadd.f32 %v1645_v13, %v4267_v56  ;;  %v1922_v48 = vpop.f32.mrf.mxu1  ;;  %v4607_v56 = vpop.f32.mrf.mxu0 }
 0x3a5   : > { %v1995_v53 = vadd.f32 %v1922_v48, %v1840_v39  ;;  %v4624_v39 = vpop.f32.mrf.mxu2 }
 0x3a6   : > { %5370 = vst [vmem:[#allocation46_spill] sm:$0xff] %v4624_v39  ;;  %v5379_v39 = vld [vmem:[#allocation30_spill] sm:$0xff] }
 0x3a7   : > { %v4600_v50 = vadd.f32 %v4485_v7, %v1995_v53 }
 0x3a8   : > { %3215 = vmatmul.msk.bf16.gmra.mxu3 %vm665_vm15, %v1552_v0  ;;  %3266 = vmatmul.msk.bf16.gmra.mxu2 %vm665_vm15, %v4597_v17 }
 0x3ab   : > { %v1648_v5 = vpop.f32.mrf.mxu3 }
 0x3ac   : > { %v4613_v23 = vadd.f32 %v1648_v5, %v4280_v49  ;;  %v1925_v7 = vpop.f32.mrf.mxu1  ;;  %v1842_v49 = vadd.f32 %v4313_v19, %v4483_v40  ;;  %v4632_v53 = vpop.f32.mrf.mxu0  ;;  %v2027_v5 = vsel %vm1519_vm2, %v4589_v42, %v2026_v57  ;;  %v5374_v57 = vld [vmem:[#allocation15_spill] sm:$0xff] }
 0x3ad   : > { %v1996_v44 = vadd.f32 %v1925_v7, %v1841_v9  ;;  %3293 = vmatmul.msk.bf16.gmra.mxu0 %vm665_vm15, %v4117_v47  ;;  %v3471_v9 = vld [vmem:[#allocation2 + $0x20] sm:$0xff]  ;;  %v2083_v19 = vpop.f32.mrf.mxu2  ;;  %v1843_v7 = vadd.f32 %v5372_v45, %v4502_v54 }
 0x3af   : > { %3247 = vmatmul.msk.bf16.gmra.mxu1 %vm665_vm15, %v4204_v20  ;;  %v4622_v13 = vadd.f32 %v4508_v61, %v1996_v44  ;;  %v5373_v44 = vld [vmem:[#allocation21_spill] sm:$0xff] }
 0x3b3   : > { %v1650_v27 = vpop.f32.mrf.mxu3 }
 0x3b4   : > { %v4630_v48 = vadd.f32 %v1650_v27, %v5371_v31  ;;  %v1927_v47 = vpop.f32.mrf.mxu1 }
 0x3b5   : > { %v1997_v0 = vadd.f32 %v1927_v47, %v1842_v49 }
 0x3b7   : > { %v4637_v61 = vadd.f32 %v4529_v1, %v1997_v0  ;;  %v4648_v1 = vpop.f32.mrf.mxu0 }
 0x3b8   : > { %3267 = vmatmul.msk.bf16.gmra.mxu2 %vm665_vm15, %v2027_v5  ;;  %3272 = vmatmul.msk.bf16.vlgmr.msra.gmra.mxu3 %vm665_vm15, %v3471_v9  ;;  %v5375_v5 = vld [vmem:[#allocation28_spill] sm:$0xff]  ;;  %v4657_v9 = vpop.f32.mrf.mxu2 }
 0x3b9   : > { %v1844_v54 = vadd.f32 %v5375_v5, %v4521_v63  ;;  %5376 = vst [vmem:[#allocation19_spill] sm:$0xff] %v4657_v9  ;;  %v1845_v63 = vadd.f32 %v5379_v39, %v4538_v46  ;;  %v5380_v5 = vld [vmem:[#allocation24_spill] sm:$0xff]  ;;  %v1846_v39 = vadd.f32 %v4370_v10, %v4555_v30  ;;  %v1847_v10 = vadd.f32 %v4392_v11, %v4574_v24  ;;  %v5384_v30 = vld [vmem:[#allocation29_spill] sm:$0xff]  ;;  %v5385_v24 = vld [vmem:[#allocation31_spill] sm:$0xff] }
 0x3bb   : > { %v1653_v40 = vpop.f32.mrf.mxu3 }
 0x3bc   : > { %v4644_v27 = vadd.f32 %v1653_v40, %v5373_v44  ;;  %v1930_v49 = vpop.f32.mrf.mxu1  ;;  %v5377_v40 = vld [vmem:[#allocation22_spill] sm:$0xff] }
 0x3bd   : > { %v1998_v31 = vadd.f32 %v1930_v49, %v1843_v7  ;;  %3294 = vmatmul.msk.bf16.gmra.mxu0 %vm665_vm15, %v4141_v3  ;;  %v1870_v3 = vshll.u32 %v4222_v62, 16  ;;  %v3472_v49 = vld [vmem:[#allocation2 + $0x28] sm:$0xff] }
 0x3bf   : > { %3248 = vmatmul.msk.bf16.gmra.mxu1 %vm665_vm15, %v5374_v57  ;;  %v4653_v47 = vadd.f32 %v4549_v6, %v1998_v31  ;;  %v4666_v42 = vpop.f32.mrf.mxu0  ;;  %v1872_v6 = vrot.slane %v1870_v3, 1 }
 0x3c3   : > { %v1655_v0 = vpop.f32.mrf.mxu3 }
 0x3c4   : > { %v4660_v45 = vadd.f32 %v1655_v0, %v5377_v40  ;;  %v1932_v7 = vpop.f32.mrf.mxu1 }
 0x3c5   : > { %v4662_v44 = vadd.f32 %v1932_v7, %v1844_v54  ;;  %v2088_v54 = vpop.f32.mrf.mxu2  ;;  %v5381_v7 = vld [vmem:[#allocation17_spill] sm:$0xff] }
 0x3c6   : > { %v4677_v17 = vsel %vm1118_vm1, %v5381_v7, %v1872_v6  ;;  %v1877_v7 = vshll.u32 %v4403_v16, 16 }
 0x3c7   : > { %5378 = vst [vmem:[#allocation25_spill] sm:$0xff] %v4662_v44 }
 0x3c8   : > { %3273 = vmatmul.msk.bf16.gmra.mxu3 %vm665_vm15, %v3472_v49  ;;  %v4683_v49 = vpop.f32.mrf.mxu0  ;;  %v1879_v44 = vrot.slane %v1877_v7, 1 }
 0x3cb   : > { %v1658_v31 = vpop.f32.mrf.mxu3 }
 0x3cc   : > { %v4671_v9 = vadd.f32 %v1658_v31, %v5380_v5  ;;  %v1935_v0 = vpop.f32.mrf.mxu1  ;;  %v5382_v31 = vld [vmem:[#allocation26_spill] sm:$0xff] }
 0x3cd   : > { %v2000_v40 = vadd.f32 %v1935_v0, %v1845_v63  ;;  %3295 = vmatmul.msk.bf16.gmra.mxu0 %vm665_vm15, %v4162_v37  ;;  %v1874_v0 = vshrl.u32 %v4222_v62, 16  ;;  %v4694_v33 = vpop.f32.mrf.mxu2 }
 0x3ce   : > { %5383 = vst [vmem:[#allocation21_spill] sm:$0xff] %v4694_v33 }
 0x3cf   : > { %3249 = vmatmul.msk.bf16.gmra.mxu1 %vm665_vm15, %v4677_v17  ;;  %v4681_v3 = vadd.f32 %v2078_v15, %v2000_v40  ;;  %v3473_v15 = vld [vmem:[#allocation2 + $0x30] sm:$0xff]  ;;  %v1876_v40 = vor.u32 %v1874_v0, %v1872_v6 }
 0x3d1   : > { %v4707_v33 = vsel %vm1118_vm1, %v1876_v40, %v1879_v44  ;;  %v1881_v40 = vshrl.u32 %v4403_v16, 16 }
 0x3d3   : > { %v1660_v46 = vpop.f32.mrf.mxu3 }
 0x3d4   : > { %v4688_v63 = vadd.f32 %v1660_v46, %v5382_v31  ;;  %v1937_v37 = vpop.f32.mrf.mxu1  ;;  %v4702_v31 = vpop.f32.mrf.mxu0 }
 0x3d5   : > { %v4690_v5 = vadd.f32 %v1937_v37, %v1846_v39  ;;  %v2093_v0 = vpop.f32.mrf.mxu2 }
 0x3d8   : > { %3274 = vmatmul.msk.bf16.gmra.mxu3 %vm665_vm15, %v3473_v15 }
 0x3db   : > { %v1663_v29 = vpop.f32.mrf.mxu3 }
 0x3dc   : > { %v4700_v46 = vadd.f32 %v1663_v29, %v5384_v30  ;;  %v1940_v39 = vpop.f32.mrf.mxu1  ;;  %v1848_v29 = vadd.f32 %v4415_v52, %v4592_v18  ;;  %v4727_v52 = vor.u32 %v1881_v40, %v1879_v44 }
 0x3dd   : > { %v2002_v37 = vadd.f32 %v1940_v39, %v1847_v10  ;;  %3296 = vmatmul.msk.bf16.gmra.mxu0 %vm665_vm15, %v4182_v21  ;;  %v5386_v10 = vld [vmem:[#allocation11_spill] sm:$0xff]  ;;  %v4724_v39 = vpop.f32.mrf.mxu0 }
 0x3de   : > { %v2815_v21 = vsel %vm690_vm14, %v5386_v10, 0  ;;  %v4731_v10 = vpop.f32.mrf.mxu2 }
 0x3df   : > { %3250 = vmatmul.msk.bf16.gmra.mxu1 %vm665_vm15, %v4707_v33  ;;  %v4711_v6 = vadd.f32 %v2083_v19, %v2002_v37  ;;  %2824 = vmatpush.bf16.msrb.mxu3 %v2815_v21  ;;  %v1885_v19 = vshll.u32 %v4619_v25, 16  ;;  %v3474_v37 = vld [vmem:[#allocation2 + $0x38] sm:$0xff]  ;;  %5387 = vst [vmem:[#allocation15_spill] sm:$0xff] %v4731_v10 }
 0x3e1   : > { %v1887_v18 = vrot.slane %v1885_v19, 1 }
 0x3e3   : > { %v1665_v11 = vpop.f32.mrf.mxu3  ;;  %v1888_v25 = vsel %vm1118_vm1, %v4727_v52, %v1887_v18 }
 0x3e4   : > { %v4716_v7 = vadd.f32 %v1665_v11, %v5385_v24  ;;  %v1942_v15 = vpop.f32.mrf.mxu1  ;;  %v1849_v24 = vadd.f32 %v4433_v14, %v4613_v23  ;;  %v1850_v23 = vadd.f32 %v4453_v60, %v4630_v48 }
 0x3e5   : > { %v4720_v30 = vadd.f32 %v1942_v15, %v1848_v29  ;;  %v4743_v40 = vpop.f32.mrf.mxu0 }
 0x3e8   : > { %3275 = vmatmul.msk.bf16.gmra.mxu3 %vm665_vm15, %v3474_v37 }
 0x3eb   : > { %v1668_v11 = vpop.f32.mrf.mxu3 }
 0x3ec   : > { %v4734_v29 = vadd.f32 %v1668_v11, %v4372_v4  ;;  %v1945_v15 = vpop.f32.mrf.mxu1  ;;  %v5388_v4 = vld [vmem:[#allocation34_spill] sm:$0xff] }
 0x3ed   : > { %v2004_v21 = vadd.f32 %v1945_v15, %v1849_v24  ;;  %3297 = vmatmul.msk.bf16.gmra.mxu0 %vm665_vm15, %v4204_v20  ;;  %v2098_v20 = vpop.f32.mrf.mxu2  ;;  %v3475_v24 = vld [vmem:[#allocation2 + $0x40] sm:$0xff]  ;;  %v4753_v18 = vpop.f32.mrf.mxu0  ;;  %v1851_v15 = vadd.f32 %v4477_v34, %v4644_v27 }
 0x3ee   : > { %v5392_v34 = vld [vmem:[#allocation35_spill] sm:$0xff] }
 0x3ef   : > { %3251 = vmatmul.msk.bf16.gmra.mxu1 %vm665_vm15, %v1888_v25  ;;  %v4741_v44 = vadd.f32 %v2088_v54, %v2004_v21  ;;  %v5389_v21 = vld [vmem:[#allocation33_spill] sm:$0xff] }
 0x3f3   : > { %v1670_v14 = vpop.f32.mrf.mxu3 }
 0x3f4   : > { %v4748_v19 = vadd.f32 %v1670_v14, %v5388_v4  ;;  %v1947_v37 = vpop.f32.mrf.mxu1  ;;  %v5390_v14 = vld [vmem:[#allocation16_spill] sm:$0xff] }
 0x3f5   : > { %v4750_v11 = vadd.f32 %v1947_v37, %v1850_v23  ;;  %v4766_v4 = vpop.f32.mrf.mxu2 }
 0x3f6   : > { %5391 = vst [vmem:[#allocation28_spill] sm:$0xff] %v4766_v4 }
 0x3f8   : > { %3276 = vmatmul.msk.bf16.gmra.mxu3 %vm665_vm15, %v3475_v24  ;;  %v1852_v24 = vadd.f32 %v4497_v22, %v4660_v45 }
 0x3fb   : > { %v1673_v54 = vpop.f32.mrf.mxu3 }
 0x3fc   : > { %v4758_v25 = vadd.f32 %v1673_v54, %v5389_v21  ;;  %v1950_v60 = vpop.f32.mrf.mxu1  ;;  %v4773_v21 = vpop.f32.mrf.mxu0 }
 0x3fd   : > { %v2006_v48 = vadd.f32 %v1950_v60, %v1851_v15  ;;  %3298 = vmatmul.msk.bf16.gmra.mxu0 %vm665_vm15, %v5374_v57  ;;  %v3476_v57 = vld [vmem:[#allocation2 + $0x48] sm:$0xff]  ;;  %v2103_v60 = vpop.f32.mrf.mxu2 }
 0x3ff   : > { %3304 = vmatmul.msk.bf16.vlgmr.msra.gmra.mxu1 %vm665_vm15, %v5390_v14  ;;  %v4764_v23 = vadd.f32 %v2093_v0, %v2006_v48  ;;  %v1853_v48 = vadd.f32 %v4516_v36, %v4671_v9  ;;  %v5393_v14 = vld [vmem:[#allocation37_spill] sm:$0xff]  ;;  %v5395_v9 = vld [vmem:[#allocation38_spill] sm:$0xff] }
 0x403   : > { %v1675_v37 = vpop.f32.mrf.mxu3 }
 0x404   : > { %v4771_v27 = vadd.f32 %v1675_v37, %v5392_v34  ;;  %v1952_v54 = vpop.f32.mrf.mxu1  ;;  %v4785_v37 = vpop.f32.mrf.mxu0 }
 0x405   : > { %v4775_v15 = vadd.f32 %v1952_v54, %v1852_v24  ;;  %v5394_v24 = vld [vmem:[#allocation18_spill] sm:$0xff]  ;;  %v4793_v36 = vpop.f32.mrf.mxu2 }
 0x408   : > { %3277 = vmatmul.msk.bf16.gmra.mxu3 %vm665_vm15, %v3476_v57  ;;  %v1854_v57 = vadd.f32 %v4540_v28, %v4688_v63 }
 0x40b   : > { %v1678_v0 = vpop.f32.mrf.mxu3 }
 0x40c   : > { %v4781_v4 = vadd.f32 %v1678_v0, %v5393_v14  ;;  %v1955_v22 = vpop.f32.mrf.mxu1 }
 0x40d   : > { %v2008_v45 = vadd.f32 %v1955_v22, %v1853_v48  ;;  %3299 = vmatmul.msk.bf16.gmra.mxu0 %vm665_vm15, %v4677_v17  ;;  %v5396_v17 = vld [vmem:[#allocation13_spill] sm:$0xff]  ;;  %v4802_v22 = vpop.f32.mrf.mxu0 }
 0x40f   : > { %3305 = vmatmul.msk.bf16.gmra.mxu1 %vm665_vm15, %v5394_v24  ;;  %v4789_v34 = vadd.f32 %v2098_v20, %v2008_v45  ;;  %v1855_v20 = vadd.f32 %v4557_v55, %v4700_v46  ;;  %v5397_v45 = vld [vmem:[#allocation40_spill] sm:$0xff]  ;;  %v1856_v55 = vadd.f32 %v4583_v35, %v4716_v7 }
 0x413   : > { %v1680_v54 = vpop.f32.mrf.mxu3 }
 0x414   : > { %v4796_v0 = vadd.f32 %v1680_v54, %v5395_v9  ;;  %v1957_v48 = vpop.f32.mrf.mxu1  ;;  %v2108_v54 = vpop.f32.mrf.mxu2 }
 0x415   : > { %v4798_v14 = vadd.f32 %v1957_v48, %v1854_v57  ;;  %v5398_v57 = vld [vmem:[#allocation20_spill] sm:$0xff]  ;;  %v4815_v48 = vpop.f32.mrf.mxu0 }
 0x418   : > { %3278 = vmatmul.msk.bf16.gmra.mxu3 %vm665_vm15, %v5396_v17 }
 0x41b   : > { %v1683_v24 = vpop.f32.mrf.mxu3 }
 0x41c   : > { %v4807_v10 = vadd.f32 %v1683_v24, %v5397_v45  ;;  %v1960_v28 = vpop.f32.mrf.mxu1 }
 0x41d   : > { %v2010_v63 = vadd.f32 %v1960_v28, %v1855_v20  ;;  %3300 = vmatmul.msk.bf16.gmra.mxu0 %vm665_vm15, %v4707_v33  ;;  %v2306_v20 = vshll.u32 %v4605_v38, 16  ;;  %v4825_v33 = vpop.f32.mrf.mxu2  ;;  %v5400_v28 = vld [vmem:[#allocation14_spill] sm:$0xff] }
 0x41e   : > { %5399 = vst [vmem:[#allocation22_spill] sm:$0xff] %v4825_v33 }
 0x41f   : > { %3306 = vmatmul.msk.bf16.gmra.mxu1 %vm665_vm15, %v5398_v57  ;;  %v4813_v9 = vadd.f32 %v2103_v60, %v2010_v63  ;;  %v4829_v60 = vrot.slane %v2306_v20, 1  ;;  %v1857_v57 = vadd.f32 %v4607_v56, %v4734_v29 }
 0x421   : > { %v2309_v7 = vsel %vm1118_vm1, %v4727_v52, %v4829_v60  ;;  %v3477_v52 = vld [vmem:[#allocation2 + $0x60] sm:$0xff] }
 0x423   : > { %v1685_v17 = vpop.f32.mrf.mxu3 }
 0x424   : > { %v4820_v46 = vadd.f32 %v1685_v17, %v4456_v51  ;;  %v1962_v24 = vpop.f32.mrf.mxu1  ;;  %v4837_v17 = vpop.f32.mrf.mxu0 }
 0x425   : > { %v4823_v45 = vadd.f32 %v1962_v24, %v1856_v55  ;;  %v5401_v24 = vld [vmem:[#allocation23_spill] sm:$0xff] }
 0x428   : > { %3279 = vmatmul.msk.bf16.gmra.mxu3 %vm665_vm15, %v5400_v28  ;;  %v2113_v28 = vpop.f32.mrf.mxu2 }
 0x42b   : > { %v1688_v63 = vpop.f32.mrf.mxu3 }
 0x42c   : > { %v1723_v35 = vadd.f32 %v1688_v63, %v4471_v2  ;;  %v1965_v51 = vpop.f32.mrf.mxu1  ;;  %v1858_v2 = vadd.f32 %v4632_v53, %v4748_v19  ;;  %v5402_v53 = vld [vmem:[#allocation27_spill] sm:$0xff] }
 0x42d   : > { %v2012_v55 = vadd.f32 %v1965_v51, %v1857_v57  ;;  %3301 = vmatmul.msk.bf16.gmra.mxu0 %vm665_vm15, %v2309_v7  ;;  %v1859_v51 = vadd.f32 %v4648_v1, %v4758_v25  ;;  %v3478_v25 = vld [vmem:[#allocation2 + $0x68] sm:$0xff] }
 0x42f   : > { %3307 = vmatmul.msk.bf16.gmra.mxu1 %vm665_vm15, %v5401_v24  ;;  %v4842_v20 = vadd.f32 %v2108_v54, %v2012_v55 }
 0x430   : > { %v4852_v7 = vpop.f32.mrf.mxu2 }
 0x433   : > { %v1690_v33 = vpop.f32.mrf.mxu3 }
 0x434   : > { %v1724_v56 = vadd.f32 %v1690_v33, %v4488_v32  ;;  %v1967_v29 = vpop.f32.mrf.mxu1  ;;  %v1860_v33 = vadd.f32 %v4666_v42, %v4771_v27 }
 0x435   : > { %v4847_v63 = vadd.f32 %v1967_v29, %v1858_v2 }
 0x438   : > { %3280 = vmatmul.msk.bf16.gmra.mxu3 %vm665_vm15, %v3477_v52  ;;  %v2118_v1 = vpop.f32.mrf.mxu2  ;;  %v1861_v52 = vadd.f32 %v4683_v49, %v4781_v4  ;;  %v3479_v49 = vld [vmem:[#allocation2 + $0x70] sm:$0xff] }
 0x43b   : > { %v2191_v57 = vpop.f32.mrf.mxu3 }
 0x43c   : > { %v4855_v54 = vadd.f32 %v2191_v57, %v4514_v59  ;;  %v1970_v55 = vpop.f32.mrf.mxu1 }
 0x43d   : > { %v2014_v24 = vadd.f32 %v1970_v55, %v1859_v51  ;;  %v5403_v55 = vld [vmem:[#allocation32_spill] sm:$0xff] }
 0x43f   : > { %3308 = vmatmul.msk.bf16.gmra.mxu1 %vm665_vm15, %v5402_v53  ;;  %v4859_v32 = vadd.f32 %v2113_v28, %v2014_v24  ;;  %v1862_v53 = vadd.f32 %v4702_v31, %v4796_v0  ;;  %v4893_v0 = vpop.f32.mrf.mxu0 }
 0x440   : > { %v4875_v27 = vpop.f32.mrf.mxu2 }
 0x443   : > { %v2193_v19 = vpop.f32.mrf.mxu3 }
 0x444   : > { %v1972_v2 = vpop.f32.mrf.mxu1 }
 0x445   : > { %v4863_v29 = vadd.f32 %v1972_v2, %v1860_v33 }
 0x448   : > { %3281 = vmatmul.msk.bf16.gmra.mxu3 %vm665_vm15, %v3478_v25  ;;  %v1863_v25 = vadd.f32 %v4724_v39, %v4807_v10 }
 0x44b   : > { %v2196_v59 = vpop.f32.mrf.mxu3 }
 0x44c   : > { %v4869_v57 = vadd.f32 %v2196_v59, %v4547_v58  ;;  %v1975_v28 = vpop.f32.mrf.mxu1  ;;  %v2123_v58 = vpop.f32.mrf.mxu2 }
 0x44d   : > { %v2016_v51 = vadd.f32 %v1975_v28, %v1861_v52  ;;  %v5404_v28 = vld [vmem:[#allocation36_spill] sm:$0xff] }
 0x44f   : > { %3309 = vmatmul.msk.bf16.gmra.mxu1 %vm665_vm15, %v5403_v55  ;;  %v4873_v42 = vadd.f32 %v2118_v1, %v2016_v51  ;;  %v1864_v55 = vadd.f32 %v4743_v40, %v4820_v46  ;;  %v5406_v40 = vld [vmem:[#allocation39_spill] sm:$0xff] }
 0x453   : > { %v4877_v24 = vpop.f32.mrf.mxu3 }
 0x454   : > { %v1977_v33 = vpop.f32.mrf.mxu1 }
 0x455   : > { %v4881_v2 = vadd.f32 %v1977_v33, %v1862_v53  ;;  %v4899_v53 = vpop.f32.mrf.mxu2 }
 0x456   : > { %5405 = vst [vmem:[#allocation30_spill] sm:$0xff] %v4899_v53 }
 0x458   : > { %3282 = vmatmul.msk.bf16.gmra.mxu3 %vm665_vm15, %v3479_v49  ;;  %v1865_v49 = vadd.f32 %v4753_v18, %v1723_v35 }
 0x45b   : > { %v2201_v4 = vpop.f32.mrf.mxu3 }
 0x45c   : > { %v4887_v1 = vadd.f32 %v2201_v4, %v4581_v12  ;;  %v1980_v59 = vpop.f32.mrf.mxu1  ;;  %v3480_v12 = vld [vmem:[#allocation2 + $0x78] sm:$0xff] }
 0x45d   : > { %v2018_v52 = vadd.f32 %v1980_v59, %v1863_v25  ;;  %v4908_v59 = vpop.f32.mrf.mxu0 }
 0x45f   : > { %3310 = vmatmul.msk.bf16.gmra.mxu1 %vm665_vm15, %v5404_v28  ;;  %v4891_v31 = vadd.f32 %v2123_v58, %v2018_v52  ;;  %v2128_v52 = vpop.f32.mrf.mxu2 }
 0x463   : > { %v4895_v51 = vpop.f32.mrf.mxu3 }
 0x464   : > { %v1982_v39 = vpop.f32.mrf.mxu1 }
 0x465   : > { %v4901_v10 = vadd.f32 %v1982_v39, %v1864_v55  ;;  %v1866_v55 = vadd.f32 %v4773_v21, %v1724_v56  ;;  %v4919_v18 = vpop.f32.mrf.mxu0  ;;  %v2272_v21 = vadd.f32 %v2193_v19, %v4527_v43  ;;  %v2430_v56 = vadd.f32 %v4785_v37, %v4855_v54 }
 0x467   : > { %v2431_v43 = vadd.f32 %v4802_v22, %v2272_v21 }
 0x468   : > { %3283 = vmatmul.msk.bf16.gmra.mxu3 %vm665_vm15, %v3480_v12 }
 0x46b   : > { %v2206_v33 = vpop.f32.mrf.mxu3 }
 0x46c   : > { %v4906_v58 = vadd.f32 %v2206_v33, %v4622_v13  ;;  %v1985_v4 = vpop.f32.mrf.mxu1 }
 0x46d   : > { %v2020_v25 = vadd.f32 %v1985_v4, %v1865_v49  ;;  %v4926_v49 = vld [vmem:[#allocation2 + $0x98] sm:$0xff]  ;;  %v2310_v4 = vshrl.u32 %v4605_v38, 16 }
 0x46f   : > { %3311 = vmatmul.msk.bf16.gmra.mxu1 %vm665_vm15, %v5406_v40  ;;  %v4912_v46 = vadd.f32 %v2128_v52, %v2020_v25  ;;  %v2313_v25 = vshll.u32 %v4926_v49, 16  ;;  %v5408_v52 = vld [vmem:[#allocation41_spill] sm:$0xff] }
 0x471   : > { %v2315_v40 = vrot.slane %v2313_v25, 1  ;;  %v1034_v25 = vld [vmem:[#allocation2 + $0xa0] sm:$0xf] }
 0x473   : > { %v4914_v28 = vpop.f32.mrf.mxu3 }
 0x474   : > { %v1987_v39 = vpop.f32.mrf.mxu1 }
 0x475   : > { %v4917_v12 = vadd.f32 %v1987_v39, %v1866_v55  ;;  %v5409_v55 = vld [vmem:[#allocation9_spill] sm:$0xff] }
 0x476   : > { %v4937_v39 = vperm.slane %v5409_v55, 0 }
 0x477   : > { %5407 = vst [vmem:[#allocation24_spill] sm:$0xff] %v4917_v12 }
 0x478   : > { %3284 = vmatmul.msk.bf16.gmra.mxu3 %vm665_vm15, %v4222_v62  ;;  %v2312_v62 = vor.u32 %v2310_v4, %v4829_v60 }
 0x47a   : > { %v2316_v12 = vsel %vm1118_vm1, %v2312_v62, %v2315_v40 }
 0x47b   : > { %v2211_v13 = vpop.f32.mrf.mxu3  ;;  %3302 = vmatmul.msk.bf16.gmra.mxu0 %vm665_vm15, %v2316_v12 }
 0x47c   : > { %v4924_v35 = vadd.f32 %v2211_v13, %v4653_v47  ;;  %v2489_v33 = vpop.f32.mrf.mxu1  ;;  %v4939_v13 = vpop.f32.mrf.mxu0 }
 0x47d   : > { %v2569_v47 = vadd.f32 %v2489_v33, %v2430_v56  ;;  %v2304_v56 = vunpack.c.l.b16 %v1034_v25 }
 0x47f   : > { %3312 = vmatmul.msk.bf16.gmra.mxu1 %vm665_vm15, %v5408_v52  ;;  %v2604_v54 = vadd.f32 %v4937_v39, %v2569_v47  ;;  %v4955_v21 = vpack.c.b16 %v2304_v56, %v2304_v56  ;;  %v2317_v47 = vshrl.u32 %v4926_v49, 16 }
 0x481   : > { %v2636_v33 = vmax.f32 %v2604_v54, 0.0 }
 0x483   : > { %v4942_v53 = vpop.f32.mrf.mxu3 }
 0x484   : > { %v2491_v37 = vpop.f32.mrf.mxu1  ;;  %v4950_v55 = vpop.f32.mrf.mxu0 }
 0x485   : > { %v2570_v19 = vadd.f32 %v2491_v37, %v2431_v43  ;;  %v2274_v43 = vadd.f32 %v4877_v24, %v4563_v26  ;;  %v2432_v37 = vadd.f32 %v4815_v48, %v4869_v57 }
 0x487   : > { %v2605_v60 = vadd.f32 %v4937_v39, %v2570_v19 }
 0x488   : > { %3285 = vmatmul.msk.bf16.gmra.mxu3 %vm665_vm15, %v4403_v16  ;;  %v2321_v16 = vshll.u32 %v4955_v21, 16 }
 0x489   : > { %v2637_v4 = vmax.f32 %v2605_v60, 0.0 }
 0x48a   : > { %v2323_v54 = vrot.slane %v2321_v16, 1 }
 0x48b   : > { %v2668_v52 = vpack.c.bf16 %v2637_v4, %v2636_v33  ;;  %v2216_v62 = vpop.f32.mrf.mxu3  ;;  %v2433_v4 = vadd.f32 %v4837_v17, %v2274_v43 }
 0x48c   : > { %v4953_v22 = vadd.f32 %v2216_v62, %v4681_v3  ;;  %v2494_v12 = vpop.f32.mrf.mxu1  ;;  %v2319_v3 = vor.u32 %v2317_v47, %v2315_v40  ;;  %v2372_v56 = vpop.f32.mrf.mxu0  ;;  %v2434_v47 = vadd.f32 %v4893_v0, %v4887_v1 }
 0x48d   : > { %3320 = vmatmul.msk.bf16.vlgmr.msra.gmra.mxu2 %vm665_vm15, %v2668_v52  ;;  %v2571_v19 = vadd.f32 %v2494_v12, %v2432_v37  ;;  %v2276_v12 = vadd.f32 %v4895_v51, %v4600_v50 }
 0x48e   : > { %v2324_v60 = vsel %vm1118_vm1, %v2319_v3, %v2323_v54 }
 0x48f   : > { %3313 = vmatmul.msk.bf16.gmra.mxu1 %vm665_vm15, %v4491_v8  ;;  %3303 = vmatmul.msk.bf16.gmra.mxu0 %vm665_vm15, %v2324_v60  ;;  %v2606_v26 = vadd.f32 %v4937_v39, %v2571_v19 }
 0x491   : > { %v2638_v8 = vmax.f32 %v2606_v26, 0.0  ;;  %v2436_v26 = vadd.f32 %v4919_v18, %v4906_v58 }
 0x493   : > { %v4967_v33 = vpop.f32.mrf.mxu3 }
 0x494   : > { %v2496_v25 = vpop.f32.mrf.mxu1  ;;  %v4985_v16 = vpop.f32.mrf.mxu0 }
 0x495   : > { %v2572_v24 = vadd.f32 %v2496_v25, %v2433_v4 }
 0x497   : > { %v2607_v48 = vadd.f32 %v4937_v39, %v2572_v24  ;;  %v5410_v24 = vld [vmem:[#allocation42_spill] sm:$0xff] }
 0x498   : > { %3286 = vmatmul.msk.bf16.gmra.mxu3 %vm665_vm15, %v4605_v38 }
 0x499   : > { %v2639_v57 = vmax.f32 %v2607_v48, 0.0 }
 0x49b   : > { %v2669_v40 = vpack.c.bf16 %v2639_v57, %v2638_v8  ;;  %v2221_v52 = vpop.f32.mrf.mxu3 }
 0x49c   : > { %v4976_v62 = vadd.f32 %v2221_v52, %v4711_v6  ;;  %v2499_v17 = vpop.f32.mrf.mxu1  ;;  %v2435_v6 = vadd.f32 %v4908_v59, %v2276_v12  ;;  %v2377_v0 = vpop.f32.mrf.mxu0  ;;  %v2278_v59 = vadd.f32 %v4914_v28, %v4637_v61  ;;  %v3481_v61 = vld [vmem:[%s3886_s15] sm:$0xff] }
 0x49d   : > { %3321 = vmatmul.msk.bf16.gmra.mxu2 %vm665_vm15, %v2669_v40  ;;  %v2573_v43 = vadd.f32 %v2499_v17, %v2434_v47 }
 0x49e   : > { %v2437_v57 = vadd.f32 %v4939_v13, %v2278_v59 }
 0x49f   : > { %3314 = vmatmul.msk.bf16.gmra.mxu1 %vm665_vm15, %v4524_v41  ;;  %v2608_v54 = vadd.f32 %v4937_v39, %v2573_v43 }
 0x4a1   : > { %v2640_v50 = vmax.f32 %v2608_v54, 0.0 }
 0x4a3   : > { %v4987_v37 = vpop.f32.mrf.mxu3 }
 0x4a4   : > { %v2501_v3 = vpop.f32.mrf.mxu1  ;;  %v5007_v40 = vpop.f32.mrf.mxu0 }
 0x4a5   : > { %v2574_v19 = vadd.f32 %v2501_v3, %v2435_v6  ;;  %v5411_v6 = vld [vmem:[#allocation25_spill] sm:$0xff]  ;;  %v5412_v3 = vld [vmem:[#allocation43_spill] sm:$0xff] }
 0x4a6   : > { %v2142_v54 = vadd.f32 %v5412_v3, %v5411_v6 }
 0x4a7   : > { %v2609_v60 = vadd.f32 %v4937_v39, %v2574_v19 }
 0x4a8   : > { %3287 = vmatmul.msk.bf16.gmra.mxu3 %vm665_vm15, %v4926_v49 }
 0x4a9   : > { %v2641_v1 = vmax.f32 %v2609_v60, 0.0  ;;  %v2280_v60 = vadd.f32 %v4942_v53, %v2142_v54 }
 0x4ab   : > { %v2670_v41 = vpack.c.bf16 %v2641_v1, %v2640_v50  ;;  %v2226_v51 = vpop.f32.mrf.mxu3  ;;  %v2438_v50 = vadd.f32 %v4950_v55, %v4924_v35  ;;  %v5413_v1 = vld [vmem:[#allocation45_spill] sm:$0xff]  ;;  %v2462_v35 = vrot.slane %v4605_v38, 1  ;;  %v2440_v38 = vadd.f32 %v4985_v16, %v4953_v22 }
 0x4ac   : > { %v4995_v4 = vadd.f32 %v2226_v51, %v4741_v44  ;;  %v2504_v25 = vpop.f32.mrf.mxu1  ;;  %v2382_v19 = vpop.f32.mrf.mxu0 }
 0x4ad   : > { %3322 = vmatmul.msk.bf16.gmra.mxu2 %vm665_vm15, %v2670_v41  ;;  %v2575_v48 = vadd.f32 %v2504_v25, %v2436_v26 }
 0x4af   : > { %3315 = vmatmul.msk.bf16.gmra.mxu1 %vm665_vm15, %v5410_v24  ;;  %v2610_v52 = vadd.f32 %v4937_v39, %v2575_v48 }
 0x4b1   : > { %v2642_v58 = vmax.f32 %v2610_v52, 0.0 }
 0x4b3   : > { %v5004_v8 = vpop.f32.mrf.mxu3 }
 0x4b4   : > { %v2506_v44 = vpop.f32.mrf.mxu1  ;;  %v2385_v48 = vpop.f32.mrf.mxu0 }
 0x4b5   : > { %v2576_v17 = vadd.f32 %v2506_v44, %v2437_v57  ;;  %v3482_v57 = vld [vmem:[%s3886_s15 + $0x8] sm:$0xff] }
 0x4b7   : > { %v2611_v12 = vadd.f32 %v4937_v39, %v2576_v17 }
 0x4b8   : > { %3336 = vmatmul.msk.bf16.vlgmr.msrb.gmra.mxu3 %vm665_vm15, %v3481_v61 }
 0x4b9   : > { %v2643_v28 = vmax.f32 %v2611_v12, 0.0  ;;  %v5414_v12 = vld [vmem:[#allocation46_spill] sm:$0xff] }
 0x4ba   : > { %v2144_v61 = vadd.f32 %v5414_v12, %v4690_v5  ;;  %v3484_v12 = vld [vmem:[%s3886_s15 + $0x18] sm:$0xff] }
 0x4bb   : > { %v2671_v18 = vpack.c.bf16 %v2643_v28, %v2642_v58  ;;  %v2231_v47 = vpop.f32.mrf.mxu3  ;;  %v5415_v58 = vld [vmem:[#allocation44_spill] sm:$0xff] }
 0x4bc   : > { %v5014_v43 = vadd.f32 %v2231_v47, %v4764_v23  ;;  %v2509_v13 = vpop.f32.mrf.mxu1  ;;  %v2439_v23 = vadd.f32 %v2372_v56, %v2280_v60  ;;  %v2463_v28 = vsel %vm1519_vm2, %v5415_v58, %v2462_v35 }
 0x4bd   : > { %3323 = vmatmul.msk.bf16.gmra.mxu2 %vm665_vm15, %v2671_v18  ;;  %v2577_v41 = vadd.f32 %v2509_v13, %v2438_v50  ;;  %v2282_v18 = vadd.f32 %v4967_v33, %v2144_v61  ;;  %v3483_v50 = vld [vmem:[%s3886_s15 + $0x10] sm:$0xff]  ;;  %v2464_v33 = vrot.slane %v4926_v49, 1  ;;  %v2442_v49 = vadd.f32 %v5007_v40, %v4976_v62 }
 0x4bf   : > { %3316 = vmatmul.msk.bf16.gmra.mxu1 %vm665_vm15, %v5413_v1  ;;  %v2612_v59 = vadd.f32 %v4937_v39, %v2577_v41  ;;  %v2441_v6 = vadd.f32 %v2377_v0, %v2282_v18 }
 0x4c1   : > { %v2644_v53 = vmax.f32 %v2612_v59, 0.0  ;;  %v2465_v59 = vsel %vm1519_vm2, %v2462_v35, %v2464_v33 }
 0x4c3   : > { %v5024_v51 = vpop.f32.mrf.mxu3 }
 0x4c4   : > { %v2511_v25 = vpop.f32.mrf.mxu1 }
 0x4c5   : > { %v2578_v26 = vadd.f32 %v2511_v25, %v2439_v23 }
 0x4c7   : > { %v2613_v24 = vadd.f32 %v4937_v39, %v2578_v26  ;;  %v5416_v26 = vld [vmem:[#allocation19_spill] sm:$0xff] }
 0x4c8   : > { %3337 = vmatmul.msk.bf16.gmra.mxu3 %vm665_vm15, %v3482_v57 }
 0x4c9   : > { %v2645_v44 = vmax.f32 %v2613_v24, 0.0  ;;  %v2146_v24 = vadd.f32 %v5416_v26, %v4720_v30 }
 0x4cb   : > { %v2672_v55 = vpack.c.bf16 %v2645_v44, %v2644_v53  ;;  %v2236_v52 = vpop.f32.mrf.mxu3  ;;  %v2284_v57 = vadd.f32 %v4987_v37, %v2146_v24  ;;  %v2466_v37 = vrot.slane %v4955_v21, 1  ;;  %v2444_v21 = vadd.f32 %v2385_v48, %v4995_v4 }
 0x4cc   : > { %v5032_v17 = vadd.f32 %v2236_v52, %v4789_v34  ;;  %v2514_v56 = vpop.f32.mrf.mxu1  ;;  %v2387_v34 = vpop.f32.mrf.mxu0 }
 0x4cd   : > { %3324 = vmatmul.msk.bf16.gmra.mxu2 %vm665_vm15, %v2672_v55  ;;  %v2579_v47 = vadd.f32 %v2514_v56, %v2440_v38  ;;  %v2467_v18 = vsel %vm1519_vm2, %v2464_v33, %v2466_v37  ;;  %v5417_v38 = vld [vmem:[#allocation21_spill] sm:$0xff] }
 0x4cf   : > { %3317 = vmatmul.msk.bf16.gmra.mxu1 %vm665_vm15, %v2463_v28  ;;  %v2614_v5 = vadd.f32 %v4937_v39, %v2579_v47  ;;  %v2148_v47 = vadd.f32 %v5417_v38, %v4750_v11  ;;  %v3485_v11 = vld [vmem:[%s3886_s15 + $0x20] sm:$0xff] }
 0x4d1   : > { %v2646_v1 = vmax.f32 %v2614_v5, 0.0 }
 0x4d3   : > { %v5043_v13 = vpop.f32.mrf.mxu3 }
 0x4d4   : > { %v2516_v3 = vpop.f32.mrf.mxu1  ;;  %v2390_v23 = vpop.f32.mrf.mxu0 }
 0x4d5   : > { %v2580_v54 = vadd.f32 %v2516_v3, %v2441_v6  ;;  %v2286_v6 = vadd.f32 %v5004_v8, %v2148_v47  ;;  %v2446_v24 = vadd.f32 %v2390_v23, %v5014_v43 }
 0x4d7   : > { %v2615_v60 = vadd.f32 %v4937_v39, %v2580_v54 }
 0x4d8   : > { %3338 = vmatmul.msk.bf16.gmra.mxu3 %vm665_vm15, %v3483_v50 }
 0x4d9   : > { %v2647_v22 = vmax.f32 %v2615_v60, 0.0 }
 0x4db   : > { %v2673_v16 = vpack.c.bf16 %v2647_v22, %v2646_v1  ;;  %v2241_v41 = vpop.f32.mrf.mxu3 }
 0x4dc   : > { %v5051_v25 = vadd.f32 %v2241_v41, %v4813_v9  ;;  %v2519_v0 = vpop.f32.mrf.mxu1  ;;  %v2443_v9 = vadd.f32 %v2382_v19, %v2284_v57  ;;  %v2392_v56 = vpop.f32.mrf.mxu0 }
 0x4dd   : > { %3325 = vmatmul.msk.bf16.gmra.mxu2 %vm665_vm15, %v2673_v16  ;;  %v2581_v53 = vadd.f32 %v2519_v0, %v2442_v49 }
 0x4df   : > { %3318 = vmatmul.msk.bf16.gmra.mxu1 %vm665_vm15, %v2465_v59  ;;  %v2616_v52 = vadd.f32 %v4937_v39, %v2581_v53 }
 0x4e1   : > { %v2648_v61 = vmax.f32 %v2616_v52, 0.0 }
 0x4e3   : > { %v5061_v44 = vpop.f32.mrf.mxu3 }
 0x4e4   : > { %v2521_v55 = vpop.f32.mrf.mxu1  ;;  %v2395_v3 = vpop.f32.mrf.mxu0 }
 0x4e5   : > { %v2582_v35 = vadd.f32 %v2521_v55, %v2443_v9 }
 0x4e7   : > { %v2617_v30 = vadd.f32 %v4937_v39, %v2582_v35 }
 0x4e8   : > { %3339 = vmatmul.msk.bf16.gmra.mxu3 %vm665_vm15, %v3484_v12 }
 0x4e9   : > { %v2649_v62 = vmax.f32 %v2617_v30, 0.0  ;;  %v5096_v30 = vpop.f32.mrf.mxu2 }
 0x4eb   : > { %v2674_v40 = vpack.c.bf16 %v2649_v62, %v2648_v61  ;;  %v2246_v58 = vpop.f32.mrf.mxu3  ;;  %v5419_v61 = vld [vmem:[#allocation28_spill] sm:$0xff] }
 0x4ec   : > { %v5069_v28 = vadd.f32 %v2246_v58, %v4842_v20  ;;  %v2524_v19 = vpop.f32.mrf.mxu1  ;;  %v2445_v20 = vadd.f32 %v2387_v34, %v2286_v6  ;;  %v2397_v16 = vpop.f32.mrf.mxu0  ;;  %v5418_v34 = vld [vmem:[#allocation15_spill] sm:$0xff]  ;;  %v2152_v62 = vadd.f32 %v5419_v61, %v4798_v14 }
 0x4ed   : > { %3326 = vmatmul.msk.bf16.gmra.mxu2 %vm665_vm15, %v2674_v40  ;;  %v2583_v5 = vadd.f32 %v2524_v19, %v2444_v21  ;;  %v2150_v59 = vadd.f32 %v5418_v34, %v4775_v15  ;;  %v3486_v15 = vld [vmem:[%s3886_s15 + $0x28] sm:$0xff]  ;;  %v2448_v19 = vadd.f32 %v2395_v3, %v5032_v17 }
 0x4ee   : > { %v2290_v58 = vadd.f32 %v5043_v13, %v2152_v62 }
 0x4ef   : > { %3319 = vmatmul.msk.bf16.gmra.mxu1 %vm665_vm15, %v2467_v18  ;;  %v2618_v50 = vadd.f32 %v4937_v39, %v2583_v5  ;;  %v2288_v26 = vadd.f32 %v5024_v51, %v2150_v59 }
 0x4f0   : > { %v2449_v6 = vadd.f32 %v2397_v16, %v2290_v58 }
 0x4f1   : > { %v2650_v22 = vmax.f32 %v2618_v50, 0.0  ;;  %v2447_v53 = vadd.f32 %v2392_v56, %v2288_v26  ;;  %v3487_v50 = vld [vmem:[%s3886_s15 + $0x30] sm:$0xff] }
 0x4f3   : > { %v5078_v54 = vpop.f32.mrf.mxu3 }
 0x4f4   : > { %v2526_v60 = vpop.f32.mrf.mxu1  ;;  %v2400_v9 = vpop.f32.mrf.mxu0 }
 0x4f5   : > { %v2584_v33 = vadd.f32 %v2526_v60, %v2445_v20  ;;  %v2450_v16 = vadd.f32 %v2400_v9, %v5051_v25 }
 0x4f7   : > { %v2619_v1 = vadd.f32 %v4937_v39, %v2584_v33 }
 0x4f8   : > { %3340 = vmatmul.msk.bf16.gmra.mxu3 %vm665_vm15, %v3485_v11 }
 0x4f9   : > { %v2651_v8 = vmax.f32 %v2619_v1, 0.0 }
 0x4fb   : > { %v2675_v4 = vpack.c.bf16 %v2651_v8, %v2650_v22  ;;  %v2251_v48 = vpop.f32.mrf.mxu3  ;;  %v2154_v22 = vadd.f32 %v4793_v36, %v4823_v45  ;;  %v3488_v36 = vld [vmem:[%s3886_s15 + $0x38] sm:$0xff]  ;;  %s3505_s15 = scalar_lea.hbm %s3504_s26, 64 }
 0x4fc   : > { %v5085_v41 = vadd.f32 %v2251_v48, %v4859_v32  ;;  %v2529_v0 = vpop.f32.mrf.mxu1  ;;  %v2402_v40 = vpop.f32.mrf.mxu0  ;;  %p3506_p1 = scmp.ne.s32.totalorder %s3504_s26, %s3505_s15  ;;  %p3511_p6 = scmp.lt.s32.totalorder %s3509_s17, %s3505_s15 }
 0x4fd   : > { %3327 = vmatmul.msk.bf16.gmra.mxu2 %vm665_vm15, %v2675_v4  ;;  %v2585_v57 = vadd.f32 %v2529_v0, %v2446_v24  ;;  %v2292_v8 = vadd.f32 %v5061_v44, %v2154_v22 }
 0x4fe   : > { %p3507_p2 = pnand %p3506_p1, %p3689_p3  ;;  %p3512_p7 = por %p3511_p6, %p3510_p5 }
 0x4ff   : > { %v2620_v52 = vadd.f32 %v4937_v39, %v2585_v57  ;;  %v2451_v59 = vadd.f32 %v2402_v40, %v2292_v8 }
 0x500   : > { %p3508_p4 = pneg %p3507_p2 }
 0x501   : > { %v2652_v12 = vmax.f32 %v2620_v52, 0.0 }
 0x502   : > { %p3513_p9 = pnand %p3512_p7, %p3508_p4 }
 0x503   : > { %v5092_v49 = vpop.f32.mrf.mxu3 }
 0x504   : > { %v2531_v55 = vpop.f32.mrf.mxu1  ;;  %v2405_v60 = vpop.f32.mrf.mxu0 }
 0x505   : > { %v2586_v32 = vadd.f32 %v2531_v55, %v2447_v53 }
 0x507   : > { %v2621_v35 = vadd.f32 %v4937_v39, %v2586_v32 }
 0x508   : > { %3341 = vmatmul.msk.bf16.gmra.mxu3 %vm665_vm15, %v3486_v15 }
 0x509   : > { %v2653_v51 = vmax.f32 %v2621_v35, 0.0  ;;  %v5420_v35 = vld [vmem:[#allocation22_spill] sm:$0xff] }
 0x50a   : > { %v2156_v15 = vadd.f32 %v5420_v35, %v4847_v63  ;;  %v2160_v35 = vadd.f32 %v4875_v27, %v4881_v2 }
 0x50b   : > { %v2676_v37 = vpack.c.bf16 %v2653_v51, %v2652_v12  ;;  %v2256_v43 = vpop.f32.mrf.mxu3  ;;  %v2452_v51 = vadd.f32 %v2405_v60, %v5069_v28 }
 0x50c   : > { %v5101_v23 = vadd.f32 %v2256_v43, %v4873_v42  ;;  %v2534_v56 = vpop.f32.mrf.mxu1  ;;  %v2407_v0 = vpop.f32.mrf.mxu0  ;;  %v2294_v12 = vadd.f32 %v5078_v54, %v2156_v15 }
 0x50d   : > { %3328 = vmatmul.msk.bf16.gmra.mxu2 %vm665_vm15, %v2676_v37  ;;  %v2587_v38 = vadd.f32 %v2534_v56, %v2448_v19 }
 0x50e   : > { %v2453_v61 = vadd.f32 %v2407_v0, %v2294_v12 }
 0x50f   : > { %v2622_v42 = vadd.f32 %v4937_v39, %v2587_v38  ;;  %v5421_v38 = vld [vmem:[#allocation10_spill] sm:$0xff] }
 0x510   : > { %v2747_v18 = vpop.f32.mrf.mxu2  ;;  %v5143_v63 = vperm.slane %v5421_v38, 0 }
 0x511   : > { %v2654_v13 = vmax.f32 %v2622_v42, 0.0 }
 0x512   : > { %v2748_v60 = vadd.f32 %v2747_v18, %v5143_v63 }
 0x513   : > { %v5108_v47 = vpop.f32.mrf.mxu3 }
 0x514   : > { %v2536_v21 = vpop.f32.mrf.mxu1  ;;  %v2410_v9 = vpop.f32.mrf.mxu0  ;;  %v2298_v12 = vadd.f32 %v5108_v47, %v2160_v35 }
 0x515   : > { %v2588_v5 = vadd.f32 %v2536_v21, %v2449_v6  ;;  %v5422_v21 = vld [vmem:[#allocation12_spill] sm:$0xff] }
 0x516   : > { %v5146_v54 = vperm.slane %v5422_v21, 0 }
 0x517   : > { %v2623_v20 = vadd.f32 %v4937_v39, %v2588_v5 }
 0x518   : > { %v5112_v14 = vpop.f32.mrf.mxu2  ;;  %3342 = vmatmul.msk.bf16.gmra.mxu3 %vm665_vm15, %v3487_v50 }
 0x519   : > { %v2655_v33 = vmax.f32 %v2623_v20, 0.0 }
 0x51b   : > { %v2677_v17 = vpack.c.bf16 %v2655_v33, %v2654_v13  ;;  %v2261_v3 = vpop.f32.mrf.mxu3  ;;  %v2158_v33 = vadd.f32 %v4852_v7, %v4863_v29 }
 0x51c   : > { %v5117_v1 = vadd.f32 %v2261_v3, %v4891_v31  ;;  %v2539_v11 = vpop.f32.mrf.mxu1  ;;  %v2412_v58 = vpop.f32.mrf.mxu0 }
 0x51d   : > { %3329 = vmatmul.msk.bf16.gmra.mxu2 %vm665_vm15, %v2677_v17  ;;  %v2589_v48 = vadd.f32 %v2539_v11, %v2450_v16  ;;  %v2296_v3 = vadd.f32 %v5092_v49, %v2158_v33  ;;  %v2454_v11 = vadd.f32 %v2410_v9, %v5085_v41 }
 0x51f   : > { %v2624_v31 = vadd.f32 %v4937_v39, %v2589_v48  ;;  %v2455_v0 = vadd.f32 %v2412_v58, %v2296_v3 }
 0x520   : > { %v2752_v4 = vpop.f32.mrf.mxu2 }
 0x521   : > { %v2656_v45 = vmax.f32 %v2624_v31, 0.0 }
 0x523   : > { %v5124_v34 = vpop.f32.mrf.mxu3 }
 0x524   : > { %v2541_v26 = vpop.f32.mrf.mxu1  ;;  %v2415_v22 = vpop.f32.mrf.mxu0 }
 0x525   : > { %v2590_v24 = vadd.f32 %v2541_v26, %v2451_v59  ;;  %v2750_v59 = vadd.f32 %v5112_v14, %v5143_v63 }
 0x527   : > { %v2625_v57 = vadd.f32 %v4937_v39, %v2590_v24 }
 0x528   : > { %v2753_v53 = vpop.f32.mrf.mxu2  ;;  %3343 = vmatmul.msk.bf16.gmra.mxu3 %vm665_vm15, %v3488_v36 }
 0x529   : > { %v2657_v44 = vmax.f32 %v2625_v57, 0.0 }
 0x52b   : > { %v2678_v55 = vpack.c.bf16 %v2657_v44, %v2656_v45  ;;  %v2266_v25 = vpop.f32.mrf.mxu3 }
 0x52c   : > { %v5131_v52 = vadd.f32 %v2266_v25, %v4912_v46  ;;  %v2544_v32 = vpop.f32.mrf.mxu1  ;;  %v2417_v45 = vpop.f32.mrf.mxu0 }
 0x52d   : > { %3330 = vmatmul.msk.bf16.gmra.mxu2 %vm665_vm15, %v2678_v55  ;;  %v2591_v43 = vadd.f32 %v2544_v32, %v2452_v51  ;;  %v2456_v51 = vadd.f32 %v2415_v22, %v5101_v23  ;;  %v2457_v58 = vadd.f32 %v2417_v45, %v2298_v12 }
 0x52f   : > { %v2626_v40 = vadd.f32 %v4937_v39, %v2591_v43 }
 0x530   : > { %v2755_v37 = vpop.f32.mrf.mxu2 }
 0x531   : > { %v2658_v28 = vmax.f32 %v2626_v40, 0.0  ;;  %v2756_v25 = vadd.f32 %v2755_v37, %v5143_v63 }
 0x533   : > { %v5138_v56 = vpop.f32.mrf.mxu3 }
 0x534   : > { %v2546_v62 = vpop.f32.mrf.mxu1  ;;  %v2420_v37 = vpop.f32.mrf.mxu0 }
 0x535   : > { %v2592_v46 = vadd.f32 %v2546_v62, %v2453_v61 }
 0x537   : > { %v2627_v19 = vadd.f32 %v4937_v39, %v2592_v46 }
 0x538   : > { %v2757_v6 = vpop.f32.mrf.mxu2 }
 0x539   : > { %v2659_v42 = vmax.f32 %v2627_v19, 0.0  ;;  %v2758_v19 = vadd.f32 %v2757_v6, %v5143_v63 }
 0x53b   : > { %v2679_v5 = vpack.c.bf16 %v2659_v42, %v2658_v28  ;;  %v2826_v20 = vpop.f32.mrf.mxu3 }
 0x53c   : > { %v2827_v50 = vadd.f32 %v2826_v20, %v5146_v54  ;;  %v2549_v13 = vpop.f32.mrf.mxu1  ;;  %v2422_v6 = vpop.f32.mrf.mxu0 }
 0x53d   : > { %3331 = vmatmul.msk.bf16.gmra.mxu2 %vm665_vm15, %v2679_v5  ;;  %v2593_v4 = vadd.f32 %v2549_v13, %v2454_v11  ;;  %v5423_v11 = vld [vmem:[#allocation30_spill] sm:$0xff] }
 0x53e   : > { %v2866_v17 = vadd.f32 %v2827_v50, %v2748_v60  ;;  %v2162_v22 = vadd.f32 %v5423_v11, %v4901_v10 }
 0x53f   : > { %v2628_v49 = vadd.f32 %v4937_v39, %v2593_v4 }
 0x540   : > { %v2882_v8 = vmax.f32 %v2866_v17, 0.0  ;;  %v2760_v16 = vpop.f32.mrf.mxu2  ;;  %v2300_v4 = vadd.f32 %v5124_v34, %v2162_v22 }
 0x541   : > { %v2660_v53 = vmax.f32 %v2628_v49, 0.0  ;;  %v2458_v16 = vadd.f32 %v2420_v37, %v5117_v1 }
 0x542   : > { %v2898_v18 = vpack.c.bf16 %v2882_v8, %v2882_v8 }
 0x543   : > { %v2828_v48 = vpop.f32.mrf.mxu3 }
 0x544   : > { %2915 = vst.msk [vmem:[%s3857_s1] sm:$0xf] %vm2914_vm0, %v2898_v18  ;;  %v2829_v7 = vadd.f32 %v2828_v48, %v5146_v54  ;;  %v2551_v29 = vpop.f32.mrf.mxu1  ;;  %v2425_v1 = vpop.f32.mrf.mxu0 }
 0x545   : > { %v2594_v41 = vadd.f32 %v2551_v29, %v2455_v0  ;;  %v2460_v35 = vadd.f32 %v2425_v1, %v5131_v52 }
 0x546   : > { %v2867_v26 = vadd.f32 %v2829_v7, %v2750_v59  ;;  %v2459_v7 = vadd.f32 %v2422_v6, %v2300_v4 }
 0x547   : > { %v2629_v31 = vadd.f32 %v4937_v39, %v2594_v41 }
 0x548   : > { %v2883_v24 = vmax.f32 %v2867_v26, 0.0  ;;  %v2761_v57 = vpop.f32.mrf.mxu2 }
 0x549   : > { %v2661_v36 = vmax.f32 %v2629_v31, 0.0 }
 0x54a   : > { %v2899_v44 = vpack.c.bf16 %v2883_v24, %v2883_v24 }
 0x54b   : > { %v2680_v55 = vpack.c.bf16 %v2661_v36, %v2660_v53  ;;  %v2831_v14 = vpop.f32.mrf.mxu3 }
 0x54c   : > { %2916 = vst.msk [vmem:[%s3857_s1 + $0x4] sm:$0xf] %vm2914_vm0, %v2899_v44  ;;  %v2832_v9 = vadd.f32 %v2831_v14, %v5146_v54  ;;  %v2554_v32 = vpop.f32.mrf.mxu1 }
 0x54d   : > { %3332 = vmatmul.msk.bf16.gmra.mxu2 %vm665_vm15, %v2680_v55  ;;  %v2595_v62 = vadd.f32 %v2554_v32, %v2456_v51  ;;  %v2427_v51 = vpop.f32.mrf.mxu0 }
 0x54e   : > { %v2868_v15 = vadd.f32 %v2832_v9, %v2756_v25  ;;  %v5424_v9 = vld [vmem:[#allocation24_spill] sm:$0xff] }
 0x54f   : > { %v2630_v38 = vadd.f32 %v4937_v39, %v2595_v62  ;;  %v2164_v32 = vadd.f32 %v5096_v30, %v5424_v9 }
 0x550   : > { %v2884_v43 = vmax.f32 %v2868_v15, 0.0  ;;  %v2763_v61 = vpop.f32.mrf.mxu2 }
 0x551   : > { %v2662_v5 = vmax.f32 %v2630_v38, 0.0  ;;  %v2764_v33 = vadd.f32 %v2763_v61, %v5143_v63  ;;  %v2302_v15 = vadd.f32 %v5138_v56, %v2164_v32 }
 0x552   : > { %v2900_v40 = vpack.c.bf16 %v2884_v43, %v2884_v43 }
 0x553   : > { %v2833_v46 = vpop.f32.mrf.mxu3  ;;  %v2461_v37 = vadd.f32 %v2427_v51, %v2302_v15 }
 0x554   : > { %2917 = vst.msk [vmem:[%s3857_s1 + $0x8] sm:$0xf] %vm2914_vm0, %v2900_v40  ;;  %v2834_v27 = vadd.f32 %v2833_v46, %v5146_v54  ;;  %v2556_v2 = vpop.f32.mrf.mxu1 }
 0x555   : > { %v2596_v47 = vadd.f32 %v2556_v2, %v2457_v58 }
 0x556   : > { %v2869_v21 = vadd.f32 %v2834_v27, %v2758_v19 }
 0x557   : > { %v2631_v23 = vadd.f32 %v4937_v39, %v2596_v47 }
 0x558   : > { %v2885_v28 = vmax.f32 %v2869_v21, 0.0  ;;  %v2765_v42 = vpop.f32.mrf.mxu2 }
 0x559   : > { %v2663_v20 = vmax.f32 %v2631_v23, 0.0  ;;  %v2766_v49 = vadd.f32 %v2765_v42, %v5143_v63 }
 0x55a   : > { %v2901_v60 = vpack.c.bf16 %v2885_v28, %v2885_v28 }
 0x55b   : > { %v2681_v50 = vpack.c.bf16 %v2663_v20, %v2662_v5  ;;  %v2836_v13 = vpop.f32.mrf.mxu3 }
 0x55c   : > { %2918 = vst.msk [vmem:[%s3857_s1 + $0xc] sm:$0xf] %vm2914_vm0, %v2901_v60  ;;  %v2837_v17 = vadd.f32 %v2836_v13, %v5146_v54  ;;  %v2559_v3 = vpop.f32.mrf.mxu1 }
 0x55d   : > { %3333 = vmatmul.msk.bf16.gmra.mxu2 %vm665_vm15, %v2681_v50  ;;  %v2597_v0 = vadd.f32 %v2559_v3, %v2458_v16 }
 0x55e   : > { %v2870_v8 = vadd.f32 %v2837_v17, %v2764_v33 }
 0x55f   : > { %v2632_v26 = vadd.f32 %v4937_v39, %v2597_v0 }
 0x560   : > { %v2886_v18 = vmax.f32 %v2870_v8, 0.0  ;;  %v2768_v48 = vpop.f32.mrf.mxu2 }
 0x561   : > { %v2664_v36 = vmax.f32 %v2632_v26, 0.0 }
 0x562   : > { %v2902_v59 = vpack.c.bf16 %v2886_v18, %v2886_v18 }
 0x563   : > { %v2838_v29 = vpop.f32.mrf.mxu3 }
 0x564   : > { %2919 = vst.msk [vmem:[%s3857_s1 + $0x10] sm:$0xf] %vm2914_vm0, %v2902_v59  ;;  %v2839_v10 = vadd.f32 %v2838_v29, %v5146_v54  ;;  %v2561_v41 = vpop.f32.mrf.mxu1 }
 0x565   : > { %v2598_v31 = vadd.f32 %v2561_v41, %v2459_v7 }
 0x566   : > { %v2871_v24 = vadd.f32 %v2839_v10, %v2766_v49 }
 0x567   : > { %v2633_v34 = vadd.f32 %v4937_v39, %v2598_v31 }
 0x568   : > { %v2887_v57 = vmax.f32 %v2871_v24, 0.0  ;;  %v2769_v53 = vpop.f32.mrf.mxu2 }
 0x569   : > { %v2665_v45 = vmax.f32 %v2633_v34, 0.0 }
 0x56a   : > { %v2903_v44 = vpack.c.bf16 %v2887_v57, %v2887_v57 }
 0x56b   : > { %v2682_v55 = vpack.c.bf16 %v2665_v45, %v2664_v36  ;;  %v2841_v14 = vpop.f32.mrf.mxu3 }
 0x56c   : > { %2920 = vst.msk [vmem:[%s3857_s1 + $0x14] sm:$0xf] %vm2914_vm0, %v2903_v44  ;;  %v2564_v25 = vpop.f32.mrf.mxu1  ;;  %v2842_v12 = vadd.f32 %v2841_v14, %v5146_v54 }
 0x56d   : > { %3334 = vmatmul.msk.bf16.gmra.mxu2 %vm665_vm15, %v2682_v55  ;;  %v2599_v61 = vadd.f32 %v2564_v25, %v2460_v35 }
 0x56f   : > { %v2634_v30 = vadd.f32 %v4937_v39, %v2599_v61 }
 0x570   : > { %v2771_v43 = vpop.f32.mrf.mxu2 }
 0x571   : > { %v2772_v62 = vadd.f32 %v2771_v43, %v5143_v63  ;;  %v2666_v47 = vmax.f32 %v2634_v30, 0.0 }
 0x573   : > { %v2872_v40 = vadd.f32 %v2842_v12, %v2772_v62  ;;  %v2843_v58 = vpop.f32.mrf.mxu3 }
 0x574   : > { %v2566_v46 = vpop.f32.mrf.mxu1  ;;  %v2844_v2 = vadd.f32 %v2843_v58, %v5146_v54 }
 0x575   : > { %v2888_v19 = vmax.f32 %v2872_v40, 0.0  ;;  %v2600_v27 = vadd.f32 %v2566_v46, %v2461_v37 }
 0x577   : > { %v2904_v52 = vpack.c.bf16 %v2888_v19, %v2888_v19  ;;  %v2635_v56 = vadd.f32 %v4937_v39, %v2600_v27 }
 0x578   : > { %v2773_v38 = vpop.f32.mrf.mxu2 }
 0x579   : > { %2921 = vst.msk [vmem:[%s3857_s1 + $0x18] sm:$0xf] %vm2914_vm0, %v2904_v52  ;;  %v2667_v21 = vmax.f32 %v2635_v56, 0.0  ;;  %v2774_v23 = vadd.f32 %v2773_v38, %v5143_v63 }
 0x57b   : > { %v2683_v28 = vpack.c.bf16 %v2667_v21, %v2666_v47  ;;  %v2873_v42 = vadd.f32 %v2844_v2, %v2774_v23  ;;  %v2846_v50 = vpop.f32.mrf.mxu3 }
 0x57c   : > { %v2847_v13 = vadd.f32 %v2846_v50, %v5146_v54 }
 0x57d   : > { %v2889_v5 = vmax.f32 %v2873_v42, 0.0  ;;  %3335 = vmatmul.msk.bf16.gmra.mxu2 %vm665_vm15, %v2683_v28 }
 0x57f   : > { %v2905_v20 = vpack.c.bf16 %v2889_v5, %v2889_v5 }
 0x580   : > { %v2776_v60 = vpop.f32.mrf.mxu2 }
 0x581   : > { %2922 = vst.msk [vmem:[%s3857_s1 + $0x1c] sm:$0xf] %vm2914_vm0, %v2905_v20 }
 0x583   : > { %v2848_v3 = vpop.f32.mrf.mxu3 }
 0x584   : > { %v2849_v8 = vadd.f32 %v2848_v3, %v5146_v54 }
 0x588   : > { %v2777_v39 = vpop.f32.mrf.mxu2 }
 0x58b   : > { %v2851_v29 = vpop.f32.mrf.mxu3 }
 0x58c   : > { %v2852_v49 = vadd.f32 %v2851_v29, %v5146_v54 }
 0x590   : > { %v2779_v6 = vpop.f32.mrf.mxu2 }
 0x591   : > { %v2780_v33 = vadd.f32 %v2779_v6, %v5143_v63 }
 0x593   : > { %v2874_v17 = vadd.f32 %v2847_v13, %v2780_v33  ;;  %v2853_v31 = vpop.f32.mrf.mxu3 }
 0x594   : > { %v2854_v34 = vadd.f32 %v2853_v31, %v5146_v54 }
 0x595   : > { %v2890_v11 = vmax.f32 %v2874_v17, 0.0 }
 0x597   : > { %v2906_v22 = vpack.c.bf16 %v2890_v11, %v2890_v11 }
 0x598   : > { %v2781_v16 = vpop.f32.mrf.mxu2 }
 0x599   : > { %2923 = vst.msk [vmem:[%s3857_s1 + $0x20] sm:$0xf] %vm2914_vm0, %v2906_v22  ;;  %v2782_v4 = vadd.f32 %v2781_v16, %v5143_v63 }
 0x59b   : > { %v2875_v18 = vadd.f32 %v2849_v8, %v2782_v4  ;;  %v2856_v25 = vpop.f32.mrf.mxu3 }
 0x59c   : > { %v2857_v9 = vadd.f32 %v2856_v25, %v5146_v54 }
 0x59d   : > { %v2891_v48 = vmax.f32 %v2875_v18, 0.0 }
 0x59f   : > { %v2907_v0 = vpack.c.bf16 %v2891_v48, %v2891_v48 }
 0x5a0   : > { %v2784_v59 = vpop.f32.mrf.mxu2 }
 0x5a1   : > { %2924 = vst.msk [vmem:[%s3857_s1 + $0x24] sm:$0xf] %vm2914_vm0, %v2907_v0 }
 0x5a3   : > { %v2858_v12 = vpop.f32.mrf.mxu3 }
 0x5a4   : > { %v2859_v61 = vadd.f32 %v2858_v12, %v5146_v54 }
 0x5a8   : > { %v2785_v7 = vpop.f32.mrf.mxu2 }
 0x5ab   : > { %v2861_v27 = vpop.f32.mrf.mxu3 }
 0x5ac   : > { %v2862_v52 = vadd.f32 %v2861_v27, %v5146_v54 }
 0x5b0   : > { %v2787_v10 = vpop.f32.mrf.mxu2 }
 0x5b1   : > { %v2788_v41 = vadd.f32 %v2787_v10, %v5143_v63 }
 0x5b3   : > { %v2876_v26 = vadd.f32 %v2852_v49, %v2788_v41  ;;  %v2863_v21 = vpop.f32.mrf.mxu3 }
 0x5b4   : > { %v2864_v42 = vadd.f32 %v2863_v21, %v5146_v54 }
 0x5b5   : > { %v2892_v1 = vmax.f32 %v2876_v26, 0.0 }
 0x5b7   : > { %v2908_v24 = vpack.c.bf16 %v2892_v1, %v2892_v1 }
 0x5b8   : > { %v2789_v57 = vpop.f32.mrf.mxu2 }
 0x5b9   : > { %2925 = vst.msk [vmem:[%s3857_s1 + $0x28] sm:$0xf] %vm2914_vm0, %v2908_v24  ;;  %v2790_v53 = vadd.f32 %v2789_v57, %v5143_v63 }
 0x5bb   : > { %v2877_v36 = vadd.f32 %v2854_v34, %v2790_v53 }
 0x5bd   : > { %v2893_v45 = vmax.f32 %v2877_v36, 0.0 }
 0x5bf   : > { %v2909_v44 = vpack.c.bf16 %v2893_v45, %v2893_v45 }
 0x5c0   : > { %v2792_v55 = vpop.f32.mrf.mxu2 }
 0x5c1   : > { %2926 = vst.msk [vmem:[%s3857_s1 + $0x2c] sm:$0xf] %vm2914_vm0, %v2909_v44 }
 0x5c8   : > { %v2793_v14 = vpop.f32.mrf.mxu2 }
 0x5d0   : > { %v2795_v32 = vpop.f32.mrf.mxu2 }
 0x5d1   : > { %v2796_v35 = vadd.f32 %v2795_v32, %v5143_v63 }
 0x5d3   : > { %v2878_v15 = vadd.f32 %v2857_v9, %v2796_v35 }
 0x5d5   : > { %v2894_v51 = vmax.f32 %v2878_v15, 0.0 }
 0x5d7   : > { %v2910_v43 = vpack.c.bf16 %v2894_v51, %v2894_v51 }
 0x5d8   : > { %v2797_v62 = vpop.f32.mrf.mxu2 }
 0x5d9   : > { %2927 = vst.msk [vmem:[%s3857_s1 + $0x30] sm:$0xf] %vm2914_vm0, %v2910_v43  ;;  %v2798_v37 = vadd.f32 %v2797_v62, %v5143_v63 }
 0x5db   : > { %v2879_v40 = vadd.f32 %v2859_v61, %v2798_v37 }
 0x5dd   : > { %v2895_v46 = vmax.f32 %v2879_v40, 0.0 }
 0x5df   : > { %v2911_v58 = vpack.c.bf16 %v2895_v46, %v2895_v46 }
 0x5e0   : > { %v2800_v30 = vpop.f32.mrf.mxu2 }
 0x5e1   : > { %2928 = vst.msk [vmem:[%s3857_s1 + $0x34] sm:$0xf] %vm2914_vm0, %v2911_v58 }
 0x5e8   : > { %v2801_v19 = vpop.f32.mrf.mxu2 }
 0x5f0   : > { %v2803_v56 = vpop.f32.mrf.mxu2 }
 0x5f1   : > { %v2804_v2 = vadd.f32 %v2803_v56, %v5143_v63 }
 0x5f3   : > { %v2880_v38 = vadd.f32 %v2862_v52, %v2804_v2 }
 0x5f5   : > { %v2896_v47 = vmax.f32 %v2880_v38, 0.0 }
 0x5f7   : > { %v2912_v23 = vpack.c.bf16 %v2896_v47, %v2896_v47 }
 0x5f8   : > { %v2805_v28 = vpop.f32.mrf.mxu2 }
 0x5f9   : > { %2929 = vst.msk [vmem:[%s3857_s1 + $0x38] sm:$0xf] %vm2914_vm0, %v2912_v23  ;;  %v2806_v5 = vadd.f32 %v2805_v28, %v5143_v63 }
 0x5fb   : > { %v2881_v20 = vadd.f32 %v2864_v42, %v2806_v5 }
 0x5fd   : > { %v2897_v60 = vmax.f32 %v2881_v20, 0.0 }
 0x5ff   : > { %v2913_v39 = vpack.c.bf16 %v2897_v60, %v2897_v60 }
 0x600   : > { %v2808_v50 = vpop.f32.mrf.mxu2 }
 0x601   : > { %2930 = vst.msk [vmem:[%s3857_s1 + $0x3c] sm:$0xf] %vm2914_vm0, %v2913_v39 }
 0x602   : > { %3516 = shalt.err (!%p3513_p9)
}
 0x603   : > { %s3586_s1 = smov 64   ;;  %s3587_s20 = smov 4  }
 0x604   : > { %3397 = dma.vmem_to_hbm [thread:$0]  (%p3689_p3), %s2948_s12, 1024, %s2950_s13, %s2932_s25, %s3586_s1, %s3586_s1, %s3587_s20  }
 0x608   : > { %v2809_v63 = vpop.f32.mrf.mxu2 }
 0x609 PF: > { %p3403_p10 = scmp.ge.s32.totalorder %s3583_s16, 2  ;;  %s2964_s18 = sand.u32 1, %s3555_s30  }
 0x60a   : > { %s2965_s21 = scalar_lea.sflag [#allocation4], %s2964_s18 }
 0x60b   : > { %p3400_p11 = pnand %p3403_p10, %p3698_p8 }
 0x60d   : > { %p3401_p12 = pneg %p3400_p11 }
 0x60f   : > { %3550 = dma.done.wait (%p3401_p12), %s2965_s21, 1024  }
 0x610   : > { %3552 = vsyncadd (%p3401_p12), %s2965_s21, 4294966272  ;;  %s22_s16 = sadd.s32 1, %s3583_s16   ;;  %s5426_s13 = sld [smem:[#allocation6_spill]] }
 0x611   : > { %p19_p13 = scmp.ge.s32.totalorder %s22_s16, 6   ;;  %s5427_s22 = sld [smem:[#allocation7_spill]] }
 0x612   : > { %s5428_s15 = sld [smem:[#allocation8_spill]]  ;;  %s5429_s30 = smov %s3559_s10 }
 0x613   : > { %s5430_s10 = smov %s3563_s11  ;;  %s5431_s11 = smov %s3707_s27 }
 0x614   : > { %s5432_s12 = smov %s3575_s14  ;;  %21 = sbr.rel (!%p19_p13) target bundleno = 7 (0x7), region = 104 }
 0x617   : > { %s5433_s14 = smov %s5427_s22 }
 0x619   :  { %2971 = vsyncpa [#allocation4], 1 }
 0x61a   :  { %2973 = vsyncpa [#allocation4 + $0x1], 1 }

</bundles_post_ra>
